<compile_context>
chip_gen: v7x
topology: tpu7x:2x2x1
jax: 0.10.0
libtpu: 0.0.40
codegen_flags: <defaults>
</compile_context>

<pallas_src>
import functools

import jax
import jax.numpy as jnp
import numpy as np
from jax.experimental import pallas as pl
from jax.experimental.pallas import tpu as pltpu


# ----------------------------------------------------------------------------
# Recurrent Pallas kernel: grid iterates over blocks of TS timesteps; h/c for
# both LSTM layers is carried across grid steps in VMEM scratch.
# ----------------------------------------------------------------------------
def _lstm_recurrent_kernel(ts, b_real,
                           gates0_ref, w_hh0_hbm, w1_hbm,
                           out_ref,
                           w_hh0_vmem, w1_vmem, dma_sem,
                           h0_ref, c0_ref, h1_ref, c1_ref):
    """One grid step = `ts` LSTM timesteps through both layers."""
    blk = pl.program_id(0)
    H = h0_ref.shape[-1]
    inv_b = 1.0 / b_real            # divide padded-batch sum by the true batch

    @pl.when(blk == 0)
    def _init():
        # Copy the recurrent weights once into single-buffered VMEM scratch;
        # they stay resident for the entire recurrence (no double-buffering).
        cp0 = pltpu.make_async_copy(w_hh0_hbm, w_hh0_vmem, dma_sem.at[0])
        cp1 = pltpu.make_async_copy(w1_hbm, w1_vmem, dma_sem.at[1])
        cp0.start()
        cp1.start()
        cp0.wait()
        cp1.wait()
        h0_ref[...] = jnp.zeros_like(h0_ref)
        c0_ref[...] = jnp.zeros_like(c0_ref)
        h1_ref[...] = jnp.zeros_like(h1_ref)
        c1_ref[...] = jnp.zeros_like(c1_ref)

    w_hh0 = w_hh0_vmem[...]          # (H, 4H)  bf16, resident
    w1 = w1_vmem[...]                # (2H, 4H) bf16, resident

    def gates_to_hc(gates, c):
        # PyTorch gate order i, f, g, o.  Gate slicing assumes H % 128 == 0.
        # All gate / state elementwise math stays in f32 (v5e has no bf16 VPU).
        i = jax.nn.sigmoid(gates[:, 0 * H:1 * H])
        f = jax.nn.sigmoid(gates[:, 1 * H:2 * H])
        g = jnp.tanh(gates[:, 2 * H:3 * H])
        o = jax.nn.sigmoid(gates[:, 3 * H:4 * H])
        c_new = f * c + i * g
        h_new = o * jnp.tanh(c_new)
        return h_new, c_new

    def step(s, carry):
        h0, c0, h1, c1 = carry
        # Layer 0: input projection precomputed outside; only h @ W_hh here.
        g0 = gates0_ref[s] + jnp.dot(h0.astype(jnp.bfloat16), w_hh0,
                                     preferred_element_type=jnp.float32)
        h0, c0 = gates_to_hc(g0, c0)
        # Layer 1: single fused matmul  [x, h_prev] @ [W_ih^T ; W_hh^T].
        xh = jnp.concatenate([h0, h1], axis=-1).astype(jnp.bfloat16)
        g1 = jnp.dot(xh, w1, preferred_element_type=jnp.float32)
        h1, c1 = gates_to_hc(g1, c1)
        # Mean over the (zero-padded) batch -> one lane-dense (1, H) row of the
        # (TS, H) output slab.  (Zero-padded batch rows are exactly zero.)
        out_ref[pl.ds(s, 1), :] = jnp.sum(h1, axis=0, keepdims=True) * inv_b
        return h0, c0, h1, c1

    carry = (h0_ref[...], c0_ref[...], h1_ref[...], c1_ref[...])
    carry = jax.lax.fori_loop(0, ts, step, carry, unroll=True)
    h0_ref[...], c0_ref[...], h1_ref[...], c1_ref[...] = carry


# ----------------------------------------------------------------------------
# Wrapper: hoisted input projection + recurrent pallas_call.
# ----------------------------------------------------------------------------
def lstm_aggregate_pallas(clip, params, *, ts=8):
    """clip: (T, B, D) float32.  Returns squeeze(mean over batch) -> (T, H)."""
    T, B, D = clip.shape
    H = params["w_hh0_t"].shape[0]

    b_pad = ((B + 7) // 8) * 8            # pad batch to a full sublane group
    t_pad = pl.cdiv(T, ts) * ts           # pad time to a multiple of TS

    # (1) Hoisted layer-0 input projection: one big parallel matmul for all T
    #     (bf16 operands on the MXU, f32 accumulation).  Biases are zero by
    #     module construction and are folded away.
    x = clip.astype(jnp.bfloat16).reshape(T * B, D)
    gates_in0 = jnp.dot(x, params["w_ih0_t"].astype(jnp.bfloat16),
                        preferred_element_type=jnp.float32)
    gates_in0 = gates_in0.reshape(T, B, 4 * H)
    # Zero padding: padded batch rows / trailing timesteps produce exactly-zero
    # hidden state and never affect the first T real outputs.
    gates_in0 = jnp.pad(gates_in0, ((0, t_pad - T), (0, b_pad - B), (0, 0)))

    # bf16 recurrent weights; layer-1 input+recurrent weights stacked for the
    # fused [x, h] dot.
    w_hh0 = params["w_hh0_t"].astype(jnp.bfloat16)                   # (H, 4H)
    w1 = jnp.concatenate([params["w_ih1_t"], params["w_hh1_t"]],
                         axis=0).astype(jnp.bfloat16)                # (2H, 4H)

    kernel = functools.partial(_lstm_recurrent_kernel, ts, B)

    out = pl.pallas_call(
        kernel,
        out_shape=jax.ShapeDtypeStruct((t_pad, H), jnp.float32),
        grid_spec=pltpu.PrefetchScalarGridSpec(
            num_scalar_prefetch=0,
            grid=(t_pad // ts,),
            in_specs=[
                # Precomputed layer-0 gate slabs, TS steps per grid step.
                pl.BlockSpec((ts, b_pad, 4 * H), lambda t: (t, 0, 0)),
                # Weights stay in HBM; copied once into VMEM scratch at blk 0
                # (single-buffered residency instead of double-buffered specs).
                pl.BlockSpec(memory_space=pl.ANY),     # W_hh0^T
                pl.BlockSpec(memory_space=pl.ANY),     # [W_ih1^T ; W_hh1^T]
            ],
            out_specs=pl.BlockSpec((ts, H), lambda t: (t, 0)),
            scratch_shapes=[
                pltpu.VMEM((H, 4 * H), jnp.bfloat16),        # resident W_hh0^T
                pltpu.VMEM((2 * H, 4 * H), jnp.bfloat16),    # resident layer-1 W
                pltpu.SemaphoreType.DMA((2,)),
                pltpu.VMEM((b_pad, H), jnp.float32),         # h layer 0
                pltpu.VMEM((b_pad, H), jnp.float32),         # c layer 0
                pltpu.VMEM((b_pad, H), jnp.float32),         # h layer 1
                pltpu.VMEM((b_pad, H), jnp.float32),         # c layer 1
            ],
        ),
        compiler_params=pltpu.CompilerParams(
            dimension_semantics=("arbitrary",),      # sequential recurrence
            # Headroom for the real D=H=1024 size (resident bf16 weights are
            # 24 MiB there); still below v7x's 64 MiB physical VMEM.
            vmem_limit_bytes=48 * 1024 * 1024,
        ),
    )(gates_in0, w_hh0, w1)

    return jnp.squeeze(out[:T])


# ----------------------------------------------------------------------------
# Deterministic parameter init (xavier_normal_ weights, zero biases), matching
# the PyTorch module's __init__.  Biases are zero and therefore omitted.
# ----------------------------------------------------------------------------
def init_params(key, D, H):
    def xavier_normal(k, fan_out, fan_in):
        std = float(np.sqrt(2.0 / (fan_in + fan_out)))
        return jax.random.normal(k, (fan_out, fan_in), jnp.float32) * std

    k0, k1, k2, k3 = jax.random.split(key, 4)
    w_ih0 = xavier_normal(k0, 4 * H, D)   # (4H, D)
    w_hh0 = xavier_normal(k1, 4 * H, H)   # (4H, H)
    w_ih1 = xavier_normal(k2, 4 * H, H)   # (4H, H)
    w_hh1 = xavier_normal(k3, 4 * H, H)   # (4H, H)
    return {
        # Transposed so the kernel computes x @ W^T as a plain row-major dot.
        "w_ih0_t": w_ih0.T, "w_hh0_t": w_hh0.T,
        "w_ih1_t": w_ih1.T, "w_hh1_t": w_hh1.T,
    }


# ----------------------------------------------------------------------------
# Pure-JAX reference (same semantics as PyTorch nn.LSTM forward + mean/squeeze).
# `matmul_dtype` lets us also mirror the kernel's bf16-operand MXU policy for a
# tight numerical check; float32 gives the exact PyTorch-f32 semantics.
# ----------------------------------------------------------------------------
def lstm_aggregate_ref(clip, params, matmul_dtype=jnp.float32):
    T, B, D = clip.shape
    H = params["w_hh0_t"].shape[0]
    w_ih0 = params["w_ih0_t"].astype(matmul_dtype)
    w_hh0 = params["w_hh0_t"].astype(matmul_dtype)
    w_ih1 = params["w_ih1_t"].astype(matmul_dtype)
    w_hh1 = params["w_hh1_t"].astype(matmul_dtype)

    def cell(x_in, h, c, w_ih_t, w_hh_t):
        gates = (jnp.dot(x_in.astype(matmul_dtype), w_ih_t,
                         preferred_element_type=jnp.float32)
                 + jnp.dot(h.astype(matmul_dtype), w_hh_t,
                           preferred_element_type=jnp.float32))
        i = jax.nn.sigmoid(gates[:, :H])
        f = jax.nn.sigmoid(gates[:, H:2 * H])
        g = jnp.tanh(gates[:, 2 * H:3 * H])
        o = jax.nn.sigmoid(gates[:, 3 * H:])
        c_new = f * c + i * g
        return o * jnp.tanh(c_new), c_new

    def step(carry, x_t):
        h0, c0, h1, c1 = carry
        h0, c0 = cell(x_t, h0, c0, w_ih0, w_hh0)
        h1, c1 = cell(h0, h1, c1, w_ih1, w_hh1)
        return (h0, c0, h1, c1), h1

    init = tuple(jnp.zeros((B, H), jnp.float32) for _ in range(4))
    _, hs = jax.lax.scan(step, init, clip)            # (T, B, H)
    return jnp.squeeze(hs.mean(axis=-2))              # (T, H)


if __name__ == "__main__":
    # Small sizes; module structure identical (2 layers, D == H, zero biases).
    T, B, D, H = 16, 2, 128, 128

    key = jax.random.PRNGKey(0)
    k_param, k_data = jax.random.split(key)
    params = init_params(k_param, D, H)
    clip = jax.random.normal(k_data, (T, B, D), jnp.float32)

    run = jax.jit(lstm_aggregate_pallas)
    out = jax.block_until_ready(run(clip, params))

    # Tight check against a reference that mirrors the kernel's bf16 MXU
    # operand policy (f32 accumulation / gate math).
    ref_bf16 = jax.block_until_ready(
        lstm_aggregate_ref(clip, params, jnp.bfloat16))
    np.testing.assert_allclose(np.asarray(out), np.asarray(ref_bf16),
                               rtol=2e-3, atol=2e-3)

    # Fidelity check against the pure-f32 (PyTorch-equivalent) reference; the
    # only difference is bf16 rounding of the matmul operands.
    ref_f32 = jax.block_until_ready(
        lstm_aggregate_ref(clip, params, jnp.float32))
    np.testing.assert_allclose(np.asarray(out), np.asarray(ref_f32),
                               rtol=2e-2, atol=2e-2)

    print("KERNEL_OK")
</pallas_src>

<mosaic_0001>
module attributes {stable_mosaic.version = 11 : i64} {
  func.func @_lstm_recurrent_kernel(%arg0: i32, %arg1: memref<8x8x512xf32, #tpu.memory_space<vmem>>, %arg2: memref<128x512xbf16, #tpu.memory_space<any>>, %arg3: memref<256x512xbf16, #tpu.memory_space<any>>, %arg4: memref<8x128xf32, #tpu.memory_space<vmem>>, %arg5: memref<128x512xbf16, #tpu.memory_space<vmem>>, %arg6: memref<256x512xbf16, #tpu.memory_space<vmem>>, %arg7: memref<2x!tpu.dma_semaphore, #tpu.memory_space<semaphore_mem>>, %arg8: memref<8x128xf32, #tpu.memory_space<vmem>>, %arg9: memref<8x128xf32, #tpu.memory_space<vmem>>, %arg10: memref<8x128xf32, #tpu.memory_space<vmem>>, %arg11: memref<8x128xf32, #tpu.memory_space<vmem>>) attributes {dimension_semantics = [#tpu.dimension_semantics<arbitrary>], iteration_bounds = array<i64: 2>, scalar_prefetch = 0 : i64, scratch_operands = 7 : i64, tpu.core_type = #tpu.core_type<tc>, window_params = [{transform_indices = @transform_0, window_bounds = array<i64: 8, 8, 512>}, {}, {}, {transform_indices = @transform_3, window_bounds = array<i64: 8, 128>}]} {
    %c0_i32 = arith.constant 0 : i32
    %0 = arith.cmpi eq, %arg0, %c0_i32 : i32
    %1 = arith.extui %0 : i1 to i32
    %c0_i32_0 = arith.constant 0 : i32
    %2 = arith.cmpi ne, %1, %c0_i32_0 : i32
    scf.if %2 {
      %c0_i32_124 = arith.constant 0 : i32
      %533 = tpu.memref_slice %arg7[%c0_i32_124] : memref<2x!tpu.dma_semaphore, #tpu.memory_space<semaphore_mem>> -> memref<1x!tpu.dma_semaphore, #tpu.memory_space<semaphore_mem>>
      %534 = tpu.memref_squeeze %533 : memref<1x!tpu.dma_semaphore, #tpu.memory_space<semaphore_mem>> -> memref<!tpu.dma_semaphore, #tpu.memory_space<semaphore_mem>>
      tpu.enqueue_dma source(%arg2 : memref<128x512xbf16, #tpu.memory_space<any>>) target(%arg5 : memref<128x512xbf16, #tpu.memory_space<vmem>>) target_semaphore(%534 : memref<!tpu.dma_semaphore, #tpu.memory_space<semaphore_mem>>)
      %c1_i32_125 = arith.constant 1 : i32
      %535 = tpu.memref_slice %arg7[%c1_i32_125] : memref<2x!tpu.dma_semaphore, #tpu.memory_space<semaphore_mem>> -> memref<1x!tpu.dma_semaphore, #tpu.memory_space<semaphore_mem>>
      %536 = tpu.memref_squeeze %535 : memref<1x!tpu.dma_semaphore, #tpu.memory_space<semaphore_mem>> -> memref<!tpu.dma_semaphore, #tpu.memory_space<semaphore_mem>>
      tpu.enqueue_dma source(%arg3 : memref<256x512xbf16, #tpu.memory_space<any>>) target(%arg6 : memref<256x512xbf16, #tpu.memory_space<vmem>>) target_semaphore(%536 : memref<!tpu.dma_semaphore, #tpu.memory_space<semaphore_mem>>)
      %c0_i32_126 = arith.constant 0 : i32
      %537 = tpu.memref_slice %arg7[%c0_i32_126] : memref<2x!tpu.dma_semaphore, #tpu.memory_space<semaphore_mem>> -> memref<1x!tpu.dma_semaphore, #tpu.memory_space<semaphore_mem>>
      %538 = tpu.memref_squeeze %537 : memref<1x!tpu.dma_semaphore, #tpu.memory_space<semaphore_mem>> -> memref<!tpu.dma_semaphore, #tpu.memory_space<semaphore_mem>>
      tpu.wait_dma2 semaphore(%538 : memref<!tpu.dma_semaphore, #tpu.memory_space<semaphore_mem>>) src(%arg2 : memref<128x512xbf16, #tpu.memory_space<any>>) dst(%arg5 : memref<128x512xbf16, #tpu.memory_space<vmem>>)
      %c1_i32_127 = arith.constant 1 : i32
      %539 = tpu.memref_slice %arg7[%c1_i32_127] : memref<2x!tpu.dma_semaphore, #tpu.memory_space<semaphore_mem>> -> memref<1x!tpu.dma_semaphore, #tpu.memory_space<semaphore_mem>>
      %540 = tpu.memref_squeeze %539 : memref<1x!tpu.dma_semaphore, #tpu.memory_space<semaphore_mem>> -> memref<!tpu.dma_semaphore, #tpu.memory_space<semaphore_mem>>
      tpu.wait_dma2 semaphore(%540 : memref<!tpu.dma_semaphore, #tpu.memory_space<semaphore_mem>>) src(%arg3 : memref<256x512xbf16, #tpu.memory_space<any>>) dst(%arg6 : memref<256x512xbf16, #tpu.memory_space<vmem>>)
      %cst_128 = arith.constant 0.000000e+00 : f32
      %541 = vector.broadcast %cst_128 : f32 to vector<8x128xf32>
      %c0_129 = arith.constant 0 : index
      %c0_130 = arith.constant 0 : index
      %542 = vector.load %arg8[%c0_129, %c0_130] : memref<8x128xf32, #tpu.memory_space<vmem>>, vector<8x128xf32>
      tpu.vector_store %arg8[%c0_129, %c0_130], %541 {strides = array<i32>} : memref<8x128xf32, #tpu.memory_space<vmem>>, vector<8x128xf32>,
      %cst_131 = arith.constant 0.000000e+00 : f32
      %543 = vector.broadcast %cst_131 : f32 to vector<8x128xf32>
      %c0_132 = arith.constant 0 : index
      %c0_133 = arith.constant 0 : index
      %544 = vector.load %arg9[%c0_132, %c0_133] : memref<8x128xf32, #tpu.memory_space<vmem>>, vector<8x128xf32>
      tpu.vector_store %arg9[%c0_132, %c0_133], %543 {strides = array<i32>} : memref<8x128xf32, #tpu.memory_space<vmem>>, vector<8x128xf32>,
      %cst_134 = arith.constant 0.000000e+00 : f32
      %545 = vector.broadcast %cst_134 : f32 to vector<8x128xf32>
      %c0_135 = arith.constant 0 : index
      %c0_136 = arith.constant 0 : index
      %546 = vector.load %arg10[%c0_135, %c0_136] : memref<8x128xf32, #tpu.memory_space<vmem>>, vector<8x128xf32>
      tpu.vector_store %arg10[%c0_135, %c0_136], %545 {strides = array<i32>} : memref<8x128xf32, #tpu.memory_space<vmem>>, vector<8x128xf32>,
      %cst_137 = arith.constant 0.000000e+00 : f32
      %547 = vector.broadcast %cst_137 : f32 to vector<8x128xf32>
      %c0_138 = arith.constant 0 : index
      %c0_139 = arith.constant 0 : index
      %548 = vector.load %arg11[%c0_138, %c0_139] : memref<8x128xf32, #tpu.memory_space<vmem>>, vector<8x128xf32>
      tpu.vector_store %arg11[%c0_138, %c0_139], %547 {strides = array<i32>} : memref<8x128xf32, #tpu.memory_space<vmem>>, vector<8x128xf32>,
    } else {
    }
    %c0 = arith.constant 0 : index
    %c0_1 = arith.constant 0 : index
    %3 = vector.load %arg5[%c0, %c0_1] : memref<128x512xbf16, #tpu.memory_space<vmem>>, vector<128x512xbf16>
    %c0_2 = arith.constant 0 : index
    %c0_3 = arith.constant 0 : index
    %4 = vector.load %arg6[%c0_2, %c0_3] : memref<256x512xbf16, #tpu.memory_space<vmem>>, vector<256x512xbf16>
    %c0_4 = arith.constant 0 : index
    %c0_5 = arith.constant 0 : index
    %5 = vector.load %arg8[%c0_4, %c0_5] : memref<8x128xf32, #tpu.memory_space<vmem>>, vector<8x128xf32>
    %c0_6 = arith.constant 0 : index
    %c0_7 = arith.constant 0 : index
    %6 = vector.load %arg9[%c0_6, %c0_7] : memref<8x128xf32, #tpu.memory_space<vmem>>, vector<8x128xf32>
    %c0_8 = arith.constant 0 : index
    %c0_9 = arith.constant 0 : index
    %7 = vector.load %arg10[%c0_8, %c0_9] : memref<8x128xf32, #tpu.memory_space<vmem>>, vector<8x128xf32>
    %c0_10 = arith.constant 0 : index
    %c0_11 = arith.constant 0 : index
    %8 = vector.load %arg11[%c0_10, %c0_11] : memref<8x128xf32, #tpu.memory_space<vmem>>, vector<8x128xf32>
    %c0_i32_12 = arith.constant 0 : i32
    %9 = arith.index_cast %c0_i32_12 : i32 to index
    %c0_13 = arith.constant 0 : index
    %c0_14 = arith.constant 0 : index
    %10 = vector.load %arg1[%9, %c0_13, %c0_14] : memref<8x8x512xf32, #tpu.memory_space<vmem>>, vector<1x8x512xf32>
    %11 = vector.shape_cast %10 : vector<1x8x512xf32> to vector<8x512xf32>
    %12 = arith.truncf %5 : vector<8x128xf32> to vector<8x128xbf16>
    %cst = arith.constant dense<0.000000e+00> : vector<8x512xf32>
    %13 = tpu.matmul %12, %3, %cst {dimension_numbers = #tpu.dot_dimension_numbers<[1], [0], [0], [1], [0, 0, 1, 1], [], []>} : vector<8x128xbf16>, vector<128x512xbf16>, vector<8x512xf32> -> vector<8x512xf32>
    %14 = arith.addf %11, %13 : vector<8x512xf32>
    %15 = vector.extract_strided_slice %14 {offsets = [0, 0], sizes = [8, 128], strides = [1, 1]} : vector<8x512xf32> to vector<8x128xf32>
    %16 = arith.negf %15 : vector<8x128xf32>
    %17 = math.exp %16 : vector<8x128xf32>
    %cst_15 = arith.constant 1.000000e+00 : f32
    %18 = vector.broadcast %cst_15 : f32 to vector<8x128xf32>
    %19 = arith.addf %18, %17 : vector<8x128xf32>
    %20 = arith.divf %18, %19 : vector<8x128xf32>
    %21 = vector.extract_strided_slice %14 {offsets = [0, 128], sizes = [8, 128], strides = [1, 1]} : vector<8x512xf32> to vector<8x128xf32>
    %22 = arith.negf %21 : vector<8x128xf32>
    %23 = math.exp %22 : vector<8x128xf32>
    %cst_16 = arith.constant 1.000000e+00 : f32
    %24 = vector.broadcast %cst_16 : f32 to vector<8x128xf32>
    %25 = arith.addf %24, %23 : vector<8x128xf32>
    %26 = arith.divf %24, %25 : vector<8x128xf32>
    %27 = vector.extract_strided_slice %14 {offsets = [0, 256], sizes = [8, 128], strides = [1, 1]} : vector<8x512xf32> to vector<8x128xf32>
    %28 = math.tanh %27 : vector<8x128xf32>
    %29 = vector.extract_strided_slice %14 {offsets = [0, 384], sizes = [8, 128], strides = [1, 1]} : vector<8x512xf32> to vector<8x128xf32>
    %30 = arith.negf %29 : vector<8x128xf32>
    %31 = math.exp %30 : vector<8x128xf32>
    %cst_17 = arith.constant 1.000000e+00 : f32
    %32 = vector.broadcast %cst_17 : f32 to vector<8x128xf32>
    %33 = arith.addf %32, %31 : vector<8x128xf32>
    %34 = arith.divf %32, %33 : vector<8x128xf32>
    %35 = arith.mulf %26, %6 : vector<8x128xf32>
    %36 = arith.mulf %20, %28 : vector<8x128xf32>
    %37 = arith.addf %35, %36 : vector<8x128xf32>
    %38 = math.tanh %37 : vector<8x128xf32>
    %39 = arith.mulf %34, %38 : vector<8x128xf32>
    %40 = tpu.concatenate %39, %7 in 1 : vector<8x128xf32>, vector<8x128xf32> -> vector<8x256xf32>
    %41 = arith.truncf %40 : vector<8x256xf32> to vector<8x256xbf16>
    %cst_18 = arith.constant dense<0.000000e+00> : vector<8x512xf32>
    %42 = tpu.matmul %41, %4, %cst_18 {dimension_numbers = #tpu.dot_dimension_numbers<[1], [0], [0], [1], [0, 0, 1, 1], [], []>} : vector<8x256xbf16>, vector<256x512xbf16>, vector<8x512xf32> -> vector<8x512xf32>
    %43 = vector.extract_strided_slice %42 {offsets = [0, 0], sizes = [8, 128], strides = [1, 1]} : vector<8x512xf32> to vector<8x128xf32>
    %44 = arith.negf %43 : vector<8x128xf32>
    %45 = math.exp %44 : vector<8x128xf32>
    %cst_19 = arith.constant 1.000000e+00 : f32
    %46 = vector.broadcast %cst_19 : f32 to vector<8x128xf32>
    %47 = arith.addf %46, %45 : vector<8x128xf32>
    %48 = arith.divf %46, %47 : vector<8x128xf32>
    %49 = vector.extract_strided_slice %42 {offsets = [0, 128], sizes = [8, 128], strides = [1, 1]} : vector<8x512xf32> to vector<8x128xf32>
    %50 = arith.negf %49 : vector<8x128xf32>
    %51 = math.exp %50 : vector<8x128xf32>
    %cst_20 = arith.constant 1.000000e+00 : f32
    %52 = vector.broadcast %cst_20 : f32 to vector<8x128xf32>
    %53 = arith.addf %52, %51 : vector<8x128xf32>
    %54 = arith.divf %52, %53 : vector<8x128xf32>
    %55 = vector.extract_strided_slice %42 {offsets = [0, 256], sizes = [8, 128], strides = [1, 1]} : vector<8x512xf32> to vector<8x128xf32>
    %56 = math.tanh %55 : vector<8x128xf32>
    %57 = vector.extract_strided_slice %42 {offsets = [0, 384], sizes = [8, 128], strides = [1, 1]} : vector<8x512xf32> to vector<8x128xf32>
    %58 = arith.negf %57 : vector<8x128xf32>
    %59 = math.exp %58 : vector<8x128xf32>
    %cst_21 = arith.constant 1.000000e+00 : f32
    %60 = vector.broadcast %cst_21 : f32 to vector<8x128xf32>
    %61 = arith.addf %60, %59 : vector<8x128xf32>
    %62 = arith.divf %60, %61 : vector<8x128xf32>
    %63 = arith.mulf %54, %8 : vector<8x128xf32>
    %64 = arith.mulf %48, %56 : vector<8x128xf32>
    %65 = arith.addf %63, %64 : vector<8x128xf32>
    %66 = math.tanh %65 : vector<8x128xf32>
    %67 = arith.mulf %62, %66 : vector<8x128xf32>
    %cst_22 = arith.constant dense<0.000000e+00> : vector<128xf32>
    %68 = vector.multi_reduction <add>, %67, %cst_22 [0] : vector<8x128xf32> to vector<128xf32>
    %69 = vector.shape_cast %68 : vector<128xf32> to vector<1x128xf32>
    %cst_23 = arith.constant 5.000000e-01 : f32
    %70 = vector.broadcast %cst_23 : f32 to vector<1x128xf32>
    %71 = arith.mulf %69, %70 : vector<1x128xf32>
    %72 = arith.index_cast %c0_i32_12 : i32 to index
    %c0_24 = arith.constant 0 : index
    %73 = vector.load %arg4[%72, %c0_24] : memref<8x128xf32, #tpu.memory_space<vmem>>, vector<1x128xf32>
    tpu.vector_store %arg4[%72, %c0_24], %71 {strides = array<i32>} : memref<8x128xf32, #tpu.memory_space<vmem>>, vector<1x128xf32>,
    %c1_i32 = arith.constant 1 : i32
    %74 = arith.index_cast %c1_i32 : i32 to index
    %c0_25 = arith.constant 0 : index
    %c0_26 = arith.constant 0 : index
    %75 = vector.load %arg1[%74, %c0_25, %c0_26] : memref<8x8x512xf32, #tpu.memory_space<vmem>>, vector<1x8x512xf32>
    %76 = vector.shape_cast %75 : vector<1x8x512xf32> to vector<8x512xf32>
    %77 = arith.truncf %39 : vector<8x128xf32> to vector<8x128xbf16>
    %cst_27 = arith.constant dense<0.000000e+00> : vector<8x512xf32>
    %78 = tpu.matmul %77, %3, %cst_27 {dimension_numbers = #tpu.dot_dimension_numbers<[1], [0], [0], [1], [0, 0, 1, 1], [], []>} : vector<8x128xbf16>, vector<128x512xbf16>, vector<8x512xf32> -> vector<8x512xf32>
    %79 = arith.addf %76, %78 : vector<8x512xf32>
    %80 = vector.extract_strided_slice %79 {offsets = [0, 0], sizes = [8, 128], strides = [1, 1]} : vector<8x512xf32> to vector<8x128xf32>
    %81 = arith.negf %80 : vector<8x128xf32>
    %82 = math.exp %81 : vector<8x128xf32>
    %cst_28 = arith.constant 1.000000e+00 : f32
    %83 = vector.broadcast %cst_28 : f32 to vector<8x128xf32>
    %84 = arith.addf %83, %82 : vector<8x128xf32>
    %85 = arith.divf %83, %84 : vector<8x128xf32>
    %86 = vector.extract_strided_slice %79 {offsets = [0, 128], sizes = [8, 128], strides = [1, 1]} : vector<8x512xf32> to vector<8x128xf32>
    %87 = arith.negf %86 : vector<8x128xf32>
    %88 = math.exp %87 : vector<8x128xf32>
    %cst_29 = arith.constant 1.000000e+00 : f32
    %89 = vector.broadcast %cst_29 : f32 to vector<8x128xf32>
    %90 = arith.addf %89, %88 : vector<8x128xf32>
    %91 = arith.divf %89, %90 : vector<8x128xf32>
    %92 = vector.extract_strided_slice %79 {offsets = [0, 256], sizes = [8, 128], strides = [1, 1]} : vector<8x512xf32> to vector<8x128xf32>
    %93 = math.tanh %92 : vector<8x128xf32>
    %94 = vector.extract_strided_slice %79 {offsets = [0, 384], sizes = [8, 128], strides = [1, 1]} : vector<8x512xf32> to vector<8x128xf32>
    %95 = arith.negf %94 : vector<8x128xf32>
    %96 = math.exp %95 : vector<8x128xf32>
    %cst_30 = arith.constant 1.000000e+00 : f32
    %97 = vector.broadcast %cst_30 : f32 to vector<8x128xf32>
    %98 = arith.addf %97, %96 : vector<8x128xf32>
    %99 = arith.divf %97, %98 : vector<8x128xf32>
    %100 = arith.mulf %91, %37 : vector<8x128xf32>
    %101 = arith.mulf %85, %93 : vector<8x128xf32>
    %102 = arith.addf %100, %101 : vector<8x128xf32>
    %103 = math.tanh %102 : vector<8x128xf32>
    %104 = arith.mulf %99, %103 : vector<8x128xf32>
    %105 = tpu.concatenate %104, %67 in 1 : vector<8x128xf32>, vector<8x128xf32> -> vector<8x256xf32>
    %106 = arith.truncf %105 : vector<8x256xf32> to vector<8x256xbf16>
    %cst_31 = arith.constant dense<0.000000e+00> : vector<8x512xf32>
    %107 = tpu.matmul %106, %4, %cst_31 {dimension_numbers = #tpu.dot_dimension_numbers<[1], [0], [0], [1], [0, 0, 1, 1], [], []>} : vector<8x256xbf16>, vector<256x512xbf16>, vector<8x512xf32> -> vector<8x512xf32>
    %108 = vector.extract_strided_slice %107 {offsets = [0, 0], sizes = [8, 128], strides = [1, 1]} : vector<8x512xf32> to vector<8x128xf32>
    %109 = arith.negf %108 : vector<8x128xf32>
    %110 = math.exp %109 : vector<8x128xf32>
    %cst_32 = arith.constant 1.000000e+00 : f32
    %111 = vector.broadcast %cst_32 : f32 to vector<8x128xf32>
    %112 = arith.addf %111, %110 : vector<8x128xf32>
    %113 = arith.divf %111, %112 : vector<8x128xf32>
    %114 = vector.extract_strided_slice %107 {offsets = [0, 128], sizes = [8, 128], strides = [1, 1]} : vector<8x512xf32> to vector<8x128xf32>
    %115 = arith.negf %114 : vector<8x128xf32>
    %116 = math.exp %115 : vector<8x128xf32>
    %cst_33 = arith.constant 1.000000e+00 : f32
    %117 = vector.broadcast %cst_33 : f32 to vector<8x128xf32>
    %118 = arith.addf %117, %116 : vector<8x128xf32>
    %119 = arith.divf %117, %118 : vector<8x128xf32>
    %120 = vector.extract_strided_slice %107 {offsets = [0, 256], sizes = [8, 128], strides = [1, 1]} : vector<8x512xf32> to vector<8x128xf32>
    %121 = math.tanh %120 : vector<8x128xf32>
    %122 = vector.extract_strided_slice %107 {offsets = [0, 384], sizes = [8, 128], strides = [1, 1]} : vector<8x512xf32> to vector<8x128xf32>
    %123 = arith.negf %122 : vector<8x128xf32>
    %124 = math.exp %123 : vector<8x128xf32>
    %cst_34 = arith.constant 1.000000e+00 : f32
    %125 = vector.broadcast %cst_34 : f32 to vector<8x128xf32>
    %126 = arith.addf %125, %124 : vector<8x128xf32>
    %127 = arith.divf %125, %126 : vector<8x128xf32>
    %128 = arith.mulf %119, %65 : vector<8x128xf32>
    %129 = arith.mulf %113, %121 : vector<8x128xf32>
    %130 = arith.addf %128, %129 : vector<8x128xf32>
    %131 = math.tanh %130 : vector<8x128xf32>
    %132 = arith.mulf %127, %131 : vector<8x128xf32>
    %cst_35 = arith.constant dense<0.000000e+00> : vector<128xf32>
    %133 = vector.multi_reduction <add>, %132, %cst_35 [0] : vector<8x128xf32> to vector<128xf32>
    %134 = vector.shape_cast %133 : vector<128xf32> to vector<1x128xf32>
    %cst_36 = arith.constant 5.000000e-01 : f32
    %135 = vector.broadcast %cst_36 : f32 to vector<1x128xf32>
    %136 = arith.mulf %134, %135 : vector<1x128xf32>
    %137 = arith.index_cast %c1_i32 : i32 to index
    %c0_37 = arith.constant 0 : index
    %138 = vector.load %arg4[%137, %c0_37] : memref<8x128xf32, #tpu.memory_space<vmem>>, vector<1x128xf32>
    tpu.vector_store %arg4[%137, %c0_37], %136 {strides = array<i32>} : memref<8x128xf32, #tpu.memory_space<vmem>>, vector<1x128xf32>,
    %c2_i32 = arith.constant 2 : i32
    %139 = arith.index_cast %c2_i32 : i32 to index
    %c0_38 = arith.constant 0 : index
    %c0_39 = arith.constant 0 : index
    %140 = vector.load %arg1[%139, %c0_38, %c0_39] : memref<8x8x512xf32, #tpu.memory_space<vmem>>, vector<1x8x512xf32>
    %141 = vector.shape_cast %140 : vector<1x8x512xf32> to vector<8x512xf32>
    %142 = arith.truncf %104 : vector<8x128xf32> to vector<8x128xbf16>
    %cst_40 = arith.constant dense<0.000000e+00> : vector<8x512xf32>
    %143 = tpu.matmul %142, %3, %cst_40 {dimension_numbers = #tpu.dot_dimension_numbers<[1], [0], [0], [1], [0, 0, 1, 1], [], []>} : vector<8x128xbf16>, vector<128x512xbf16>, vector<8x512xf32> -> vector<8x512xf32>
    %144 = arith.addf %141, %143 : vector<8x512xf32>
    %145 = vector.extract_strided_slice %144 {offsets = [0, 0], sizes = [8, 128], strides = [1, 1]} : vector<8x512xf32> to vector<8x128xf32>
    %146 = arith.negf %145 : vector<8x128xf32>
    %147 = math.exp %146 : vector<8x128xf32>
    %cst_41 = arith.constant 1.000000e+00 : f32
    %148 = vector.broadcast %cst_41 : f32 to vector<8x128xf32>
    %149 = arith.addf %148, %147 : vector<8x128xf32>
    %150 = arith.divf %148, %149 : vector<8x128xf32>
    %151 = vector.extract_strided_slice %144 {offsets = [0, 128], sizes = [8, 128], strides = [1, 1]} : vector<8x512xf32> to vector<8x128xf32>
    %152 = arith.negf %151 : vector<8x128xf32>
    %153 = math.exp %152 : vector<8x128xf32>
    %cst_42 = arith.constant 1.000000e+00 : f32
    %154 = vector.broadcast %cst_42 : f32 to vector<8x128xf32>
    %155 = arith.addf %154, %153 : vector<8x128xf32>
    %156 = arith.divf %154, %155 : vector<8x128xf32>
    %157 = vector.extract_strided_slice %144 {offsets = [0, 256], sizes = [8, 128], strides = [1, 1]} : vector<8x512xf32> to vector<8x128xf32>
    %158 = math.tanh %157 : vector<8x128xf32>
    %159 = vector.extract_strided_slice %144 {offsets = [0, 384], sizes = [8, 128], strides = [1, 1]} : vector<8x512xf32> to vector<8x128xf32>
    %160 = arith.negf %159 : vector<8x128xf32>
    %161 = math.exp %160 : vector<8x128xf32>
    %cst_43 = arith.constant 1.000000e+00 : f32
    %162 = vector.broadcast %cst_43 : f32 to vector<8x128xf32>
    %163 = arith.addf %162, %161 : vector<8x128xf32>
    %164 = arith.divf %162, %163 : vector<8x128xf32>
    %165 = arith.mulf %156, %102 : vector<8x128xf32>
    %166 = arith.mulf %150, %158 : vector<8x128xf32>
    %167 = arith.addf %165, %166 : vector<8x128xf32>
    %168 = math.tanh %167 : vector<8x128xf32>
    %169 = arith.mulf %164, %168 : vector<8x128xf32>
    %170 = tpu.concatenate %169, %132 in 1 : vector<8x128xf32>, vector<8x128xf32> -> vector<8x256xf32>
    %171 = arith.truncf %170 : vector<8x256xf32> to vector<8x256xbf16>
    %cst_44 = arith.constant dense<0.000000e+00> : vector<8x512xf32>
    %172 = tpu.matmul %171, %4, %cst_44 {dimension_numbers = #tpu.dot_dimension_numbers<[1], [0], [0], [1], [0, 0, 1, 1], [], []>} : vector<8x256xbf16>, vector<256x512xbf16>, vector<8x512xf32> -> vector<8x512xf32>
    %173 = vector.extract_strided_slice %172 {offsets = [0, 0], sizes = [8, 128], strides = [1, 1]} : vector<8x512xf32> to vector<8x128xf32>
    %174 = arith.negf %173 : vector<8x128xf32>
    %175 = math.exp %174 : vector<8x128xf32>
    %cst_45 = arith.constant 1.000000e+00 : f32
    %176 = vector.broadcast %cst_45 : f32 to vector<8x128xf32>
    %177 = arith.addf %176, %175 : vector<8x128xf32>
    %178 = arith.divf %176, %177 : vector<8x128xf32>
    %179 = vector.extract_strided_slice %172 {offsets = [0, 128], sizes = [8, 128], strides = [1, 1]} : vector<8x512xf32> to vector<8x128xf32>
    %180 = arith.negf %179 : vector<8x128xf32>
    %181 = math.exp %180 : vector<8x128xf32>
    %cst_46 = arith.constant 1.000000e+00 : f32
    %182 = vector.broadcast %cst_46 : f32 to vector<8x128xf32>
    %183 = arith.addf %182, %181 : vector<8x128xf32>
    %184 = arith.divf %182, %183 : vector<8x128xf32>
    %185 = vector.extract_strided_slice %172 {offsets = [0, 256], sizes = [8, 128], strides = [1, 1]} : vector<8x512xf32> to vector<8x128xf32>
    %186 = math.tanh %185 : vector<8x128xf32>
    %187 = vector.extract_strided_slice %172 {offsets = [0, 384], sizes = [8, 128], strides = [1, 1]} : vector<8x512xf32> to vector<8x128xf32>
    %188 = arith.negf %187 : vector<8x128xf32>
    %189 = math.exp %188 : vector<8x128xf32>
    %cst_47 = arith.constant 1.000000e+00 : f32
    %190 = vector.broadcast %cst_47 : f32 to vector<8x128xf32>
    %191 = arith.addf %190, %189 : vector<8x128xf32>
    %192 = arith.divf %190, %191 : vector<8x128xf32>
    %193 = arith.mulf %184, %130 : vector<8x128xf32>
    %194 = arith.mulf %178, %186 : vector<8x128xf32>
    %195 = arith.addf %193, %194 : vector<8x128xf32>
    %196 = math.tanh %195 : vector<8x128xf32>
    %197 = arith.mulf %192, %196 : vector<8x128xf32>
    %cst_48 = arith.constant dense<0.000000e+00> : vector<128xf32>
    %198 = vector.multi_reduction <add>, %197, %cst_48 [0] : vector<8x128xf32> to vector<128xf32>
    %199 = vector.shape_cast %198 : vector<128xf32> to vector<1x128xf32>
    %cst_49 = arith.constant 5.000000e-01 : f32
    %200 = vector.broadcast %cst_49 : f32 to vector<1x128xf32>
    %201 = arith.mulf %199, %200 : vector<1x128xf32>
    %202 = arith.index_cast %c2_i32 : i32 to index
    %c0_50 = arith.constant 0 : index
    %203 = vector.load %arg4[%202, %c0_50] : memref<8x128xf32, #tpu.memory_space<vmem>>, vector<1x128xf32>
    tpu.vector_store %arg4[%202, %c0_50], %201 {strides = array<i32>} : memref<8x128xf32, #tpu.memory_space<vmem>>, vector<1x128xf32>,
    %c3_i32 = arith.constant 3 : i32
    %204 = arith.index_cast %c3_i32 : i32 to index
    %c0_51 = arith.constant 0 : index
    %c0_52 = arith.constant 0 : index
    %205 = vector.load %arg1[%204, %c0_51, %c0_52] : memref<8x8x512xf32, #tpu.memory_space<vmem>>, vector<1x8x512xf32>
    %206 = vector.shape_cast %205 : vector<1x8x512xf32> to vector<8x512xf32>
    %207 = arith.truncf %169 : vector<8x128xf32> to vector<8x128xbf16>
    %cst_53 = arith.constant dense<0.000000e+00> : vector<8x512xf32>
    %208 = tpu.matmul %207, %3, %cst_53 {dimension_numbers = #tpu.dot_dimension_numbers<[1], [0], [0], [1], [0, 0, 1, 1], [], []>} : vector<8x128xbf16>, vector<128x512xbf16>, vector<8x512xf32> -> vector<8x512xf32>
    %209 = arith.addf %206, %208 : vector<8x512xf32>
    %210 = vector.extract_strided_slice %209 {offsets = [0, 0], sizes = [8, 128], strides = [1, 1]} : vector<8x512xf32> to vector<8x128xf32>
    %211 = arith.negf %210 : vector<8x128xf32>
    %212 = math.exp %211 : vector<8x128xf32>
    %cst_54 = arith.constant 1.000000e+00 : f32
    %213 = vector.broadcast %cst_54 : f32 to vector<8x128xf32>
    %214 = arith.addf %213, %212 : vector<8x128xf32>
    %215 = arith.divf %213, %214 : vector<8x128xf32>
    %216 = vector.extract_strided_slice %209 {offsets = [0, 128], sizes = [8, 128], strides = [1, 1]} : vector<8x512xf32> to vector<8x128xf32>
    %217 = arith.negf %216 : vector<8x128xf32>
    %218 = math.exp %217 : vector<8x128xf32>
    %cst_55 = arith.constant 1.000000e+00 : f32
    %219 = vector.broadcast %cst_55 : f32 to vector<8x128xf32>
    %220 = arith.addf %219, %218 : vector<8x128xf32>
    %221 = arith.divf %219, %220 : vector<8x128xf32>
    %222 = vector.extract_strided_slice %209 {offsets = [0, 256], sizes = [8, 128], strides = [1, 1]} : vector<8x512xf32> to vector<8x128xf32>
    %223 = math.tanh %222 : vector<8x128xf32>
    %224 = vector.extract_strided_slice %209 {offsets = [0, 384], sizes = [8, 128], strides = [1, 1]} : vector<8x512xf32> to vector<8x128xf32>
    %225 = arith.negf %224 : vector<8x128xf32>
    %226 = math.exp %225 : vector<8x128xf32>
    %cst_56 = arith.constant 1.000000e+00 : f32
    %227 = vector.broadcast %cst_56 : f32 to vector<8x128xf32>
    %228 = arith.addf %227, %226 : vector<8x128xf32>
    %229 = arith.divf %227, %228 : vector<8x128xf32>
    %230 = arith.mulf %221, %167 : vector<8x128xf32>
    %231 = arith.mulf %215, %223 : vector<8x128xf32>
    %232 = arith.addf %230, %231 : vector<8x128xf32>
    %233 = math.tanh %232 : vector<8x128xf32>
    %234 = arith.mulf %229, %233 : vector<8x128xf32>
    %235 = tpu.concatenate %234, %197 in 1 : vector<8x128xf32>, vector<8x128xf32> -> vector<8x256xf32>
    %236 = arith.truncf %235 : vector<8x256xf32> to vector<8x256xbf16>
    %cst_57 = arith.constant dense<0.000000e+00> : vector<8x512xf32>
    %237 = tpu.matmul %236, %4, %cst_57 {dimension_numbers = #tpu.dot_dimension_numbers<[1], [0], [0], [1], [0, 0, 1, 1], [], []>} : vector<8x256xbf16>, vector<256x512xbf16>, vector<8x512xf32> -> vector<8x512xf32>
    %238 = vector.extract_strided_slice %237 {offsets = [0, 0], sizes = [8, 128], strides = [1, 1]} : vector<8x512xf32> to vector<8x128xf32>
    %239 = arith.negf %238 : vector<8x128xf32>
    %240 = math.exp %239 : vector<8x128xf32>
    %cst_58 = arith.constant 1.000000e+00 : f32
    %241 = vector.broadcast %cst_58 : f32 to vector<8x128xf32>
    %242 = arith.addf %241, %240 : vector<8x128xf32>
    %243 = arith.divf %241, %242 : vector<8x128xf32>
    %244 = vector.extract_strided_slice %237 {offsets = [0, 128], sizes = [8, 128], strides = [1, 1]} : vector<8x512xf32> to vector<8x128xf32>
    %245 = arith.negf %244 : vector<8x128xf32>
    %246 = math.exp %245 : vector<8x128xf32>
    %cst_59 = arith.constant 1.000000e+00 : f32
    %247 = vector.broadcast %cst_59 : f32 to vector<8x128xf32>
    %248 = arith.addf %247, %246 : vector<8x128xf32>
    %249 = arith.divf %247, %248 : vector<8x128xf32>
    %250 = vector.extract_strided_slice %237 {offsets = [0, 256], sizes = [8, 128], strides = [1, 1]} : vector<8x512xf32> to vector<8x128xf32>
    %251 = math.tanh %250 : vector<8x128xf32>
    %252 = vector.extract_strided_slice %237 {offsets = [0, 384], sizes = [8, 128], strides = [1, 1]} : vector<8x512xf32> to vector<8x128xf32>
    %253 = arith.negf %252 : vector<8x128xf32>
    %254 = math.exp %253 : vector<8x128xf32>
    %cst_60 = arith.constant 1.000000e+00 : f32
    %255 = vector.broadcast %cst_60 : f32 to vector<8x128xf32>
    %256 = arith.addf %255, %254 : vector<8x128xf32>
    %257 = arith.divf %255, %256 : vector<8x128xf32>
    %258 = arith.mulf %249, %195 : vector<8x128xf32>
    %259 = arith.mulf %243, %251 : vector<8x128xf32>
    %260 = arith.addf %258, %259 : vector<8x128xf32>
    %261 = math.tanh %260 : vector<8x128xf32>
    %262 = arith.mulf %257, %261 : vector<8x128xf32>
    %cst_61 = arith.constant dense<0.000000e+00> : vector<128xf32>
    %263 = vector.multi_reduction <add>, %262, %cst_61 [0] : vector<8x128xf32> to vector<128xf32>
    %264 = vector.shape_cast %263 : vector<128xf32> to vector<1x128xf32>
    %cst_62 = arith.constant 5.000000e-01 : f32
    %265 = vector.broadcast %cst_62 : f32 to vector<1x128xf32>
    %266 = arith.mulf %264, %265 : vector<1x128xf32>
    %267 = arith.index_cast %c3_i32 : i32 to index
    %c0_63 = arith.constant 0 : index
    %268 = vector.load %arg4[%267, %c0_63] : memref<8x128xf32, #tpu.memory_space<vmem>>, vector<1x128xf32>
    tpu.vector_store %arg4[%267, %c0_63], %266 {strides = array<i32>} : memref<8x128xf32, #tpu.memory_space<vmem>>, vector<1x128xf32>,
    %c4_i32 = arith.constant 4 : i32
    %269 = arith.index_cast %c4_i32 : i32 to index
    %c0_64 = arith.constant 0 : index
    %c0_65 = arith.constant 0 : index
    %270 = vector.load %arg1[%269, %c0_64, %c0_65] : memref<8x8x512xf32, #tpu.memory_space<vmem>>, vector<1x8x512xf32>
    %271 = vector.shape_cast %270 : vector<1x8x512xf32> to vector<8x512xf32>
    %272 = arith.truncf %234 : vector<8x128xf32> to vector<8x128xbf16>
    %cst_66 = arith.constant dense<0.000000e+00> : vector<8x512xf32>
    %273 = tpu.matmul %272, %3, %cst_66 {dimension_numbers = #tpu.dot_dimension_numbers<[1], [0], [0], [1], [0, 0, 1, 1], [], []>} : vector<8x128xbf16>, vector<128x512xbf16>, vector<8x512xf32> -> vector<8x512xf32>
    %274 = arith.addf %271, %273 : vector<8x512xf32>
    %275 = vector.extract_strided_slice %274 {offsets = [0, 0], sizes = [8, 128], strides = [1, 1]} : vector<8x512xf32> to vector<8x128xf32>
    %276 = arith.negf %275 : vector<8x128xf32>
    %277 = math.exp %276 : vector<8x128xf32>
    %cst_67 = arith.constant 1.000000e+00 : f32
    %278 = vector.broadcast %cst_67 : f32 to vector<8x128xf32>
    %279 = arith.addf %278, %277 : vector<8x128xf32>
    %280 = arith.divf %278, %279 : vector<8x128xf32>
    %281 = vector.extract_strided_slice %274 {offsets = [0, 128], sizes = [8, 128], strides = [1, 1]} : vector<8x512xf32> to vector<8x128xf32>
    %282 = arith.negf %281 : vector<8x128xf32>
    %283 = math.exp %282 : vector<8x128xf32>
    %cst_68 = arith.constant 1.000000e+00 : f32
    %284 = vector.broadcast %cst_68 : f32 to vector<8x128xf32>
    %285 = arith.addf %284, %283 : vector<8x128xf32>
    %286 = arith.divf %284, %285 : vector<8x128xf32>
    %287 = vector.extract_strided_slice %274 {offsets = [0, 256], sizes = [8, 128], strides = [1, 1]} : vector<8x512xf32> to vector<8x128xf32>
    %288 = math.tanh %287 : vector<8x128xf32>
    %289 = vector.extract_strided_slice %274 {offsets = [0, 384], sizes = [8, 128], strides = [1, 1]} : vector<8x512xf32> to vector<8x128xf32>
    %290 = arith.negf %289 : vector<8x128xf32>
    %291 = math.exp %290 : vector<8x128xf32>
    %cst_69 = arith.constant 1.000000e+00 : f32
    %292 = vector.broadcast %cst_69 : f32 to vector<8x128xf32>
    %293 = arith.addf %292, %291 : vector<8x128xf32>
    %294 = arith.divf %292, %293 : vector<8x128xf32>
    %295 = arith.mulf %286, %232 : vector<8x128xf32>
    %296 = arith.mulf %280, %288 : vector<8x128xf32>
    %297 = arith.addf %295, %296 : vector<8x128xf32>
    %298 = math.tanh %297 : vector<8x128xf32>
    %299 = arith.mulf %294, %298 : vector<8x128xf32>
    %300 = tpu.concatenate %299, %262 in 1 : vector<8x128xf32>, vector<8x128xf32> -> vector<8x256xf32>
    %301 = arith.truncf %300 : vector<8x256xf32> to vector<8x256xbf16>
    %cst_70 = arith.constant dense<0.000000e+00> : vector<8x512xf32>
    %302 = tpu.matmul %301, %4, %cst_70 {dimension_numbers = #tpu.dot_dimension_numbers<[1], [0], [0], [1], [0, 0, 1, 1], [], []>} : vector<8x256xbf16>, vector<256x512xbf16>, vector<8x512xf32> -> vector<8x512xf32>
    %303 = vector.extract_strided_slice %302 {offsets = [0, 0], sizes = [8, 128], strides = [1, 1]} : vector<8x512xf32> to vector<8x128xf32>
    %304 = arith.negf %303 : vector<8x128xf32>
    %305 = math.exp %304 : vector<8x128xf32>
    %cst_71 = arith.constant 1.000000e+00 : f32
    %306 = vector.broadcast %cst_71 : f32 to vector<8x128xf32>
    %307 = arith.addf %306, %305 : vector<8x128xf32>
    %308 = arith.divf %306, %307 : vector<8x128xf32>
    %309 = vector.extract_strided_slice %302 {offsets = [0, 128], sizes = [8, 128], strides = [1, 1]} : vector<8x512xf32> to vector<8x128xf32>
    %310 = arith.negf %309 : vector<8x128xf32>
    %311 = math.exp %310 : vector<8x128xf32>
    %cst_72 = arith.constant 1.000000e+00 : f32
    %312 = vector.broadcast %cst_72 : f32 to vector<8x128xf32>
    %313 = arith.addf %312, %311 : vector<8x128xf32>
    %314 = arith.divf %312, %313 : vector<8x128xf32>
    %315 = vector.extract_strided_slice %302 {offsets = [0, 256], sizes = [8, 128], strides = [1, 1]} : vector<8x512xf32> to vector<8x128xf32>
    %316 = math.tanh %315 : vector<8x128xf32>
    %317 = vector.extract_strided_slice %302 {offsets = [0, 384], sizes = [8, 128], strides = [1, 1]} : vector<8x512xf32> to vector<8x128xf32>
    %318 = arith.negf %317 : vector<8x128xf32>
    %319 = math.exp %318 : vector<8x128xf32>
    %cst_73 = arith.constant 1.000000e+00 : f32
    %320 = vector.broadcast %cst_73 : f32 to vector<8x128xf32>
    %321 = arith.addf %320, %319 : vector<8x128xf32>
    %322 = arith.divf %320, %321 : vector<8x128xf32>
    %323 = arith.mulf %314, %260 : vector<8x128xf32>
    %324 = arith.mulf %308, %316 : vector<8x128xf32>
    %325 = arith.addf %323, %324 : vector<8x128xf32>
    %326 = math.tanh %325 : vector<8x128xf32>
    %327 = arith.mulf %322, %326 : vector<8x128xf32>
    %cst_74 = arith.constant dense<0.000000e+00> : vector<128xf32>
    %328 = vector.multi_reduction <add>, %327, %cst_74 [0] : vector<8x128xf32> to vector<128xf32>
    %329 = vector.shape_cast %328 : vector<128xf32> to vector<1x128xf32>
    %cst_75 = arith.constant 5.000000e-01 : f32
    %330 = vector.broadcast %cst_75 : f32 to vector<1x128xf32>
    %331 = arith.mulf %329, %330 : vector<1x128xf32>
    %332 = arith.index_cast %c4_i32 : i32 to index
    %c0_76 = arith.constant 0 : index
    %333 = vector.load %arg4[%332, %c0_76] : memref<8x128xf32, #tpu.memory_space<vmem>>, vector<1x128xf32>
    tpu.vector_store %arg4[%332, %c0_76], %331 {strides = array<i32>} : memref<8x128xf32, #tpu.memory_space<vmem>>, vector<1x128xf32>,
    %c5_i32 = arith.constant 5 : i32
    %334 = arith.index_cast %c5_i32 : i32 to index
    %c0_77 = arith.constant 0 : index
    %c0_78 = arith.constant 0 : index
    %335 = vector.load %arg1[%334, %c0_77, %c0_78] : memref<8x8x512xf32, #tpu.memory_space<vmem>>, vector<1x8x512xf32>
    %336 = vector.shape_cast %335 : vector<1x8x512xf32> to vector<8x512xf32>
    %337 = arith.truncf %299 : vector<8x128xf32> to vector<8x128xbf16>
    %cst_79 = arith.constant dense<0.000000e+00> : vector<8x512xf32>
    %338 = tpu.matmul %337, %3, %cst_79 {dimension_numbers = #tpu.dot_dimension_numbers<[1], [0], [0], [1], [0, 0, 1, 1], [], []>} : vector<8x128xbf16>, vector<128x512xbf16>, vector<8x512xf32> -> vector<8x512xf32>
    %339 = arith.addf %336, %338 : vector<8x512xf32>
    %340 = vector.extract_strided_slice %339 {offsets = [0, 0], sizes = [8, 128], strides = [1, 1]} : vector<8x512xf32> to vector<8x128xf32>
    %341 = arith.negf %340 : vector<8x128xf32>
    %342 = math.exp %341 : vector<8x128xf32>
    %cst_80 = arith.constant 1.000000e+00 : f32
    %343 = vector.broadcast %cst_80 : f32 to vector<8x128xf32>
    %344 = arith.addf %343, %342 : vector<8x128xf32>
    %345 = arith.divf %343, %344 : vector<8x128xf32>
    %346 = vector.extract_strided_slice %339 {offsets = [0, 128], sizes = [8, 128], strides = [1, 1]} : vector<8x512xf32> to vector<8x128xf32>
    %347 = arith.negf %346 : vector<8x128xf32>
    %348 = math.exp %347 : vector<8x128xf32>
    %cst_81 = arith.constant 1.000000e+00 : f32
    %349 = vector.broadcast %cst_81 : f32 to vector<8x128xf32>
    %350 = arith.addf %349, %348 : vector<8x128xf32>
    %351 = arith.divf %349, %350 : vector<8x128xf32>
    %352 = vector.extract_strided_slice %339 {offsets = [0, 256], sizes = [8, 128], strides = [1, 1]} : vector<8x512xf32> to vector<8x128xf32>
    %353 = math.tanh %352 : vector<8x128xf32>
    %354 = vector.extract_strided_slice %339 {offsets = [0, 384], sizes = [8, 128], strides = [1, 1]} : vector<8x512xf32> to vector<8x128xf32>
    %355 = arith.negf %354 : vector<8x128xf32>
    %356 = math.exp %355 : vector<8x128xf32>
    %cst_82 = arith.constant 1.000000e+00 : f32
    %357 = vector.broadcast %cst_82 : f32 to vector<8x128xf32>
    %358 = arith.addf %357, %356 : vector<8x128xf32>
    %359 = arith.divf %357, %358 : vector<8x128xf32>
    %360 = arith.mulf %351, %297 : vector<8x128xf32>
    %361 = arith.mulf %345, %353 : vector<8x128xf32>
    %362 = arith.addf %360, %361 : vector<8x128xf32>
    %363 = math.tanh %362 : vector<8x128xf32>
    %364 = arith.mulf %359, %363 : vector<8x128xf32>
    %365 = tpu.concatenate %364, %327 in 1 : vector<8x128xf32>, vector<8x128xf32> -> vector<8x256xf32>
    %366 = arith.truncf %365 : vector<8x256xf32> to vector<8x256xbf16>
    %cst_83 = arith.constant dense<0.000000e+00> : vector<8x512xf32>
    %367 = tpu.matmul %366, %4, %cst_83 {dimension_numbers = #tpu.dot_dimension_numbers<[1], [0], [0], [1], [0, 0, 1, 1], [], []>} : vector<8x256xbf16>, vector<256x512xbf16>, vector<8x512xf32> -> vector<8x512xf32>
    %368 = vector.extract_strided_slice %367 {offsets = [0, 0], sizes = [8, 128], strides = [1, 1]} : vector<8x512xf32> to vector<8x128xf32>
    %369 = arith.negf %368 : vector<8x128xf32>
    %370 = math.exp %369 : vector<8x128xf32>
    %cst_84 = arith.constant 1.000000e+00 : f32
    %371 = vector.broadcast %cst_84 : f32 to vector<8x128xf32>
    %372 = arith.addf %371, %370 : vector<8x128xf32>
    %373 = arith.divf %371, %372 : vector<8x128xf32>
    %374 = vector.extract_strided_slice %367 {offsets = [0, 128], sizes = [8, 128], strides = [1, 1]} : vector<8x512xf32> to vector<8x128xf32>
    %375 = arith.negf %374 : vector<8x128xf32>
    %376 = math.exp %375 : vector<8x128xf32>
    %cst_85 = arith.constant 1.000000e+00 : f32
    %377 = vector.broadcast %cst_85 : f32 to vector<8x128xf32>
    %378 = arith.addf %377, %376 : vector<8x128xf32>
    %379 = arith.divf %377, %378 : vector<8x128xf32>
    %380 = vector.extract_strided_slice %367 {offsets = [0, 256], sizes = [8, 128], strides = [1, 1]} : vector<8x512xf32> to vector<8x128xf32>
    %381 = math.tanh %380 : vector<8x128xf32>
    %382 = vector.extract_strided_slice %367 {offsets = [0, 384], sizes = [8, 128], strides = [1, 1]} : vector<8x512xf32> to vector<8x128xf32>
    %383 = arith.negf %382 : vector<8x128xf32>
    %384 = math.exp %383 : vector<8x128xf32>
    %cst_86 = arith.constant 1.000000e+00 : f32
    %385 = vector.broadcast %cst_86 : f32 to vector<8x128xf32>
    %386 = arith.addf %385, %384 : vector<8x128xf32>
    %387 = arith.divf %385, %386 : vector<8x128xf32>
    %388 = arith.mulf %379, %325 : vector<8x128xf32>
    %389 = arith.mulf %373, %381 : vector<8x128xf32>
    %390 = arith.addf %388, %389 : vector<8x128xf32>
    %391 = math.tanh %390 : vector<8x128xf32>
    %392 = arith.mulf %387, %391 : vector<8x128xf32>
    %cst_87 = arith.constant dense<0.000000e+00> : vector<128xf32>
    %393 = vector.multi_reduction <add>, %392, %cst_87 [0] : vector<8x128xf32> to vector<128xf32>
    %394 = vector.shape_cast %393 : vector<128xf32> to vector<1x128xf32>
    %cst_88 = arith.constant 5.000000e-01 : f32
    %395 = vector.broadcast %cst_88 : f32 to vector<1x128xf32>
    %396 = arith.mulf %394, %395 : vector<1x128xf32>
    %397 = arith.index_cast %c5_i32 : i32 to index
    %c0_89 = arith.constant 0 : index
    %398 = vector.load %arg4[%397, %c0_89] : memref<8x128xf32, #tpu.memory_space<vmem>>, vector<1x128xf32>
    tpu.vector_store %arg4[%397, %c0_89], %396 {strides = array<i32>} : memref<8x128xf32, #tpu.memory_space<vmem>>, vector<1x128xf32>,
    %c6_i32 = arith.constant 6 : i32
    %399 = arith.index_cast %c6_i32 : i32 to index
    %c0_90 = arith.constant 0 : index
    %c0_91 = arith.constant 0 : index
    %400 = vector.load %arg1[%399, %c0_90, %c0_91] : memref<8x8x512xf32, #tpu.memory_space<vmem>>, vector<1x8x512xf32>
    %401 = vector.shape_cast %400 : vector<1x8x512xf32> to vector<8x512xf32>
    %402 = arith.truncf %364 : vector<8x128xf32> to vector<8x128xbf16>
    %cst_92 = arith.constant dense<0.000000e+00> : vector<8x512xf32>
    %403 = tpu.matmul %402, %3, %cst_92 {dimension_numbers = #tpu.dot_dimension_numbers<[1], [0], [0], [1], [0, 0, 1, 1], [], []>} : vector<8x128xbf16>, vector<128x512xbf16>, vector<8x512xf32> -> vector<8x512xf32>
    %404 = arith.addf %401, %403 : vector<8x512xf32>
    %405 = vector.extract_strided_slice %404 {offsets = [0, 0], sizes = [8, 128], strides = [1, 1]} : vector<8x512xf32> to vector<8x128xf32>
    %406 = arith.negf %405 : vector<8x128xf32>
    %407 = math.exp %406 : vector<8x128xf32>
    %cst_93 = arith.constant 1.000000e+00 : f32
    %408 = vector.broadcast %cst_93 : f32 to vector<8x128xf32>
    %409 = arith.addf %408, %407 : vector<8x128xf32>
    %410 = arith.divf %408, %409 : vector<8x128xf32>
    %411 = vector.extract_strided_slice %404 {offsets = [0, 128], sizes = [8, 128], strides = [1, 1]} : vector<8x512xf32> to vector<8x128xf32>
    %412 = arith.negf %411 : vector<8x128xf32>
    %413 = math.exp %412 : vector<8x128xf32>
    %cst_94 = arith.constant 1.000000e+00 : f32
    %414 = vector.broadcast %cst_94 : f32 to vector<8x128xf32>
    %415 = arith.addf %414, %413 : vector<8x128xf32>
    %416 = arith.divf %414, %415 : vector<8x128xf32>
    %417 = vector.extract_strided_slice %404 {offsets = [0, 256], sizes = [8, 128], strides = [1, 1]} : vector<8x512xf32> to vector<8x128xf32>
    %418 = math.tanh %417 : vector<8x128xf32>
    %419 = vector.extract_strided_slice %404 {offsets = [0, 384], sizes = [8, 128], strides = [1, 1]} : vector<8x512xf32> to vector<8x128xf32>
    %420 = arith.negf %419 : vector<8x128xf32>
    %421 = math.exp %420 : vector<8x128xf32>
    %cst_95 = arith.constant 1.000000e+00 : f32
    %422 = vector.broadcast %cst_95 : f32 to vector<8x128xf32>
    %423 = arith.addf %422, %421 : vector<8x128xf32>
    %424 = arith.divf %422, %423 : vector<8x128xf32>
    %425 = arith.mulf %416, %362 : vector<8x128xf32>
    %426 = arith.mulf %410, %418 : vector<8x128xf32>
    %427 = arith.addf %425, %426 : vector<8x128xf32>
    %428 = math.tanh %427 : vector<8x128xf32>
    %429 = arith.mulf %424, %428 : vector<8x128xf32>
    %430 = tpu.concatenate %429, %392 in 1 : vector<8x128xf32>, vector<8x128xf32> -> vector<8x256xf32>
    %431 = arith.truncf %430 : vector<8x256xf32> to vector<8x256xbf16>
    %cst_96 = arith.constant dense<0.000000e+00> : vector<8x512xf32>
    %432 = tpu.matmul %431, %4, %cst_96 {dimension_numbers = #tpu.dot_dimension_numbers<[1], [0], [0], [1], [0, 0, 1, 1], [], []>} : vector<8x256xbf16>, vector<256x512xbf16>, vector<8x512xf32> -> vector<8x512xf32>
    %433 = vector.extract_strided_slice %432 {offsets = [0, 0], sizes = [8, 128], strides = [1, 1]} : vector<8x512xf32> to vector<8x128xf32>
    %434 = arith.negf %433 : vector<8x128xf32>
    %435 = math.exp %434 : vector<8x128xf32>
    %cst_97 = arith.constant 1.000000e+00 : f32
    %436 = vector.broadcast %cst_97 : f32 to vector<8x128xf32>
    %437 = arith.addf %436, %435 : vector<8x128xf32>
    %438 = arith.divf %436, %437 : vector<8x128xf32>
    %439 = vector.extract_strided_slice %432 {offsets = [0, 128], sizes = [8, 128], strides = [1, 1]} : vector<8x512xf32> to vector<8x128xf32>
    %440 = arith.negf %439 : vector<8x128xf32>
    %441 = math.exp %440 : vector<8x128xf32>
    %cst_98 = arith.constant 1.000000e+00 : f32
    %442 = vector.broadcast %cst_98 : f32 to vector<8x128xf32>
    %443 = arith.addf %442, %441 : vector<8x128xf32>
    %444 = arith.divf %442, %443 : vector<8x128xf32>
    %445 = vector.extract_strided_slice %432 {offsets = [0, 256], sizes = [8, 128], strides = [1, 1]} : vector<8x512xf32> to vector<8x128xf32>
    %446 = math.tanh %445 : vector<8x128xf32>
    %447 = vector.extract_strided_slice %432 {offsets = [0, 384], sizes = [8, 128], strides = [1, 1]} : vector<8x512xf32> to vector<8x128xf32>
    %448 = arith.negf %447 : vector<8x128xf32>
    %449 = math.exp %448 : vector<8x128xf32>
    %cst_99 = arith.constant 1.000000e+00 : f32
    %450 = vector.broadcast %cst_99 : f32 to vector<8x128xf32>
    %451 = arith.addf %450, %449 : vector<8x128xf32>
    %452 = arith.divf %450, %451 : vector<8x128xf32>
    %453 = arith.mulf %444, %390 : vector<8x128xf32>
    %454 = arith.mulf %438, %446 : vector<8x128xf32>
    %455 = arith.addf %453, %454 : vector<8x128xf32>
    %456 = math.tanh %455 : vector<8x128xf32>
    %457 = arith.mulf %452, %456 : vector<8x128xf32>
    %cst_100 = arith.constant dense<0.000000e+00> : vector<128xf32>
    %458 = vector.multi_reduction <add>, %457, %cst_100 [0] : vector<8x128xf32> to vector<128xf32>
    %459 = vector.shape_cast %458 : vector<128xf32> to vector<1x128xf32>
    %cst_101 = arith.constant 5.000000e-01 : f32
    %460 = vector.broadcast %cst_101 : f32 to vector<1x128xf32>
    %461 = arith.mulf %459, %460 : vector<1x128xf32>
    %462 = arith.index_cast %c6_i32 : i32 to index
    %c0_102 = arith.constant 0 : index
    %463 = vector.load %arg4[%462, %c0_102] : memref<8x128xf32, #tpu.memory_space<vmem>>, vector<1x128xf32>
    tpu.vector_store %arg4[%462, %c0_102], %461 {strides = array<i32>} : memref<8x128xf32, #tpu.memory_space<vmem>>, vector<1x128xf32>,
    %c7_i32 = arith.constant 7 : i32
    %464 = arith.index_cast %c7_i32 : i32 to index
    %c0_103 = arith.constant 0 : index
    %c0_104 = arith.constant 0 : index
    %465 = vector.load %arg1[%464, %c0_103, %c0_104] : memref<8x8x512xf32, #tpu.memory_space<vmem>>, vector<1x8x512xf32>
    %466 = vector.shape_cast %465 : vector<1x8x512xf32> to vector<8x512xf32>
    %467 = arith.truncf %429 : vector<8x128xf32> to vector<8x128xbf16>
    %cst_105 = arith.constant dense<0.000000e+00> : vector<8x512xf32>
    %468 = tpu.matmul %467, %3, %cst_105 {dimension_numbers = #tpu.dot_dimension_numbers<[1], [0], [0], [1], [0, 0, 1, 1], [], []>} : vector<8x128xbf16>, vector<128x512xbf16>, vector<8x512xf32> -> vector<8x512xf32>
    %469 = arith.addf %466, %468 : vector<8x512xf32>
    %470 = vector.extract_strided_slice %469 {offsets = [0, 0], sizes = [8, 128], strides = [1, 1]} : vector<8x512xf32> to vector<8x128xf32>
    %471 = arith.negf %470 : vector<8x128xf32>
    %472 = math.exp %471 : vector<8x128xf32>
    %cst_106 = arith.constant 1.000000e+00 : f32
    %473 = vector.broadcast %cst_106 : f32 to vector<8x128xf32>
    %474 = arith.addf %473, %472 : vector<8x128xf32>
    %475 = arith.divf %473, %474 : vector<8x128xf32>
    %476 = vector.extract_strided_slice %469 {offsets = [0, 128], sizes = [8, 128], strides = [1, 1]} : vector<8x512xf32> to vector<8x128xf32>
    %477 = arith.negf %476 : vector<8x128xf32>
    %478 = math.exp %477 : vector<8x128xf32>
    %cst_107 = arith.constant 1.000000e+00 : f32
    %479 = vector.broadcast %cst_107 : f32 to vector<8x128xf32>
    %480 = arith.addf %479, %478 : vector<8x128xf32>
    %481 = arith.divf %479, %480 : vector<8x128xf32>
    %482 = vector.extract_strided_slice %469 {offsets = [0, 256], sizes = [8, 128], strides = [1, 1]} : vector<8x512xf32> to vector<8x128xf32>
    %483 = math.tanh %482 : vector<8x128xf32>
    %484 = vector.extract_strided_slice %469 {offsets = [0, 384], sizes = [8, 128], strides = [1, 1]} : vector<8x512xf32> to vector<8x128xf32>
    %485 = arith.negf %484 : vector<8x128xf32>
    %486 = math.exp %485 : vector<8x128xf32>
    %cst_108 = arith.constant 1.000000e+00 : f32
    %487 = vector.broadcast %cst_108 : f32 to vector<8x128xf32>
    %488 = arith.addf %487, %486 : vector<8x128xf32>
    %489 = arith.divf %487, %488 : vector<8x128xf32>
    %490 = arith.mulf %481, %427 : vector<8x128xf32>
    %491 = arith.mulf %475, %483 : vector<8x128xf32>
    %492 = arith.addf %490, %491 : vector<8x128xf32>
    %493 = math.tanh %492 : vector<8x128xf32>
    %494 = arith.mulf %489, %493 : vector<8x128xf32>
    %495 = tpu.concatenate %494, %457 in 1 : vector<8x128xf32>, vector<8x128xf32> -> vector<8x256xf32>
    %496 = arith.truncf %495 : vector<8x256xf32> to vector<8x256xbf16>
    %cst_109 = arith.constant dense<0.000000e+00> : vector<8x512xf32>
    %497 = tpu.matmul %496, %4, %cst_109 {dimension_numbers = #tpu.dot_dimension_numbers<[1], [0], [0], [1], [0, 0, 1, 1], [], []>} : vector<8x256xbf16>, vector<256x512xbf16>, vector<8x512xf32> -> vector<8x512xf32>
    %498 = vector.extract_strided_slice %497 {offsets = [0, 0], sizes = [8, 128], strides = [1, 1]} : vector<8x512xf32> to vector<8x128xf32>
    %499 = arith.negf %498 : vector<8x128xf32>
    %500 = math.exp %499 : vector<8x128xf32>
    %cst_110 = arith.constant 1.000000e+00 : f32
    %501 = vector.broadcast %cst_110 : f32 to vector<8x128xf32>
    %502 = arith.addf %501, %500 : vector<8x128xf32>
    %503 = arith.divf %501, %502 : vector<8x128xf32>
    %504 = vector.extract_strided_slice %497 {offsets = [0, 128], sizes = [8, 128], strides = [1, 1]} : vector<8x512xf32> to vector<8x128xf32>
    %505 = arith.negf %504 : vector<8x128xf32>
    %506 = math.exp %505 : vector<8x128xf32>
    %cst_111 = arith.constant 1.000000e+00 : f32
    %507 = vector.broadcast %cst_111 : f32 to vector<8x128xf32>
    %508 = arith.addf %507, %506 : vector<8x128xf32>
    %509 = arith.divf %507, %508 : vector<8x128xf32>
    %510 = vector.extract_strided_slice %497 {offsets = [0, 256], sizes = [8, 128], strides = [1, 1]} : vector<8x512xf32> to vector<8x128xf32>
    %511 = math.tanh %510 : vector<8x128xf32>
    %512 = vector.extract_strided_slice %497 {offsets = [0, 384], sizes = [8, 128], strides = [1, 1]} : vector<8x512xf32> to vector<8x128xf32>
    %513 = arith.negf %512 : vector<8x128xf32>
    %514 = math.exp %513 : vector<8x128xf32>
    %cst_112 = arith.constant 1.000000e+00 : f32
    %515 = vector.broadcast %cst_112 : f32 to vector<8x128xf32>
    %516 = arith.addf %515, %514 : vector<8x128xf32>
    %517 = arith.divf %515, %516 : vector<8x128xf32>
    %518 = arith.mulf %509, %455 : vector<8x128xf32>
    %519 = arith.mulf %503, %511 : vector<8x128xf32>
    %520 = arith.addf %518, %519 : vector<8x128xf32>
    %521 = math.tanh %520 : vector<8x128xf32>
    %522 = arith.mulf %517, %521 : vector<8x128xf32>
    %cst_113 = arith.constant dense<0.000000e+00> : vector<128xf32>
    %523 = vector.multi_reduction <add>, %522, %cst_113 [0] : vector<8x128xf32> to vector<128xf32>
    %524 = vector.shape_cast %523 : vector<128xf32> to vector<1x128xf32>
    %cst_114 = arith.constant 5.000000e-01 : f32
    %525 = vector.broadcast %cst_114 : f32 to vector<1x128xf32>
    %526 = arith.mulf %524, %525 : vector<1x128xf32>
    %527 = arith.index_cast %c7_i32 : i32 to index
    %c0_115 = arith.constant 0 : index
    %528 = vector.load %arg4[%527, %c0_115] : memref<8x128xf32, #tpu.memory_space<vmem>>, vector<1x128xf32>
    tpu.vector_store %arg4[%527, %c0_115], %526 {strides = array<i32>} : memref<8x128xf32, #tpu.memory_space<vmem>>, vector<1x128xf32>,
    %c8_i32 = arith.constant 8 : i32
    %c0_116 = arith.constant 0 : index
    %c0_117 = arith.constant 0 : index
    %529 = vector.load %arg8[%c0_116, %c0_117] : memref<8x128xf32, #tpu.memory_space<vmem>>, vector<8x128xf32>
    tpu.vector_store %arg8[%c0_116, %c0_117], %494 {strides = array<i32>} : memref<8x128xf32, #tpu.memory_space<vmem>>, vector<8x128xf32>,
    %c0_118 = arith.constant 0 : index
    %c0_119 = arith.constant 0 : index
    %530 = vector.load %arg9[%c0_118, %c0_119] : memref<8x128xf32, #tpu.memory_space<vmem>>, vector<8x128xf32>
    tpu.vector_store %arg9[%c0_118, %c0_119], %492 {strides = array<i32>} : memref<8x128xf32, #tpu.memory_space<vmem>>, vector<8x128xf32>,
    %c0_120 = arith.constant 0 : index
    %c0_121 = arith.constant 0 : index
    %531 = vector.load %arg10[%c0_120, %c0_121] : memref<8x128xf32, #tpu.memory_space<vmem>>, vector<8x128xf32>
    tpu.vector_store %arg10[%c0_120, %c0_121], %522 {strides = array<i32>} : memref<8x128xf32, #tpu.memory_space<vmem>>, vector<8x128xf32>,
    %c0_122 = arith.constant 0 : index
    %c0_123 = arith.constant 0 : index
    %532 = vector.load %arg11[%c0_122, %c0_123] : memref<8x128xf32, #tpu.memory_space<vmem>>, vector<8x128xf32>
    tpu.vector_store %arg11[%c0_122, %c0_123], %520 {strides = array<i32>} : memref<8x128xf32, #tpu.memory_space<vmem>>, vector<8x128xf32>,
    return
  }
  func.func @transform_0(%arg0: i32) -> (i32, i32, i32) {
    %c0_i32 = arith.constant 0 : i32
    %c0_i32_0 = arith.constant 0 : i32
    %c0_i32_1 = arith.constant 0 : i32
    return %arg0, %c0_i32, %c0_i32_0 : i32, i32, i32
  }
  func.func @transform_3(%arg0: i32) -> (i32, i32) {
    %c0_i32 = arith.constant 0 : i32
    %c0_i32_0 = arith.constant 0 : i32
    return %arg0, %c0_i32 : i32, i32
  }
}

</mosaic_0001>

<bundles_post_ra>
// kernel: lstm_aggregate_pallas.1
= control target key start
LH: loop header
LB: loop body
LE: loop exit
PB: predicated region body
PF: predicated region fallthrough
CT: control target
= control target key end

     0   :  { %8 = vsyncpa [#allocation10], 0  ;;  %s5829_s0 = inlined_call_operand.vmem [shape: f32[16,8,512], index: 0, kind: input, shape index: {}]   ;;  %s5830_s1 = inlined_call_operand.vmem [shape: bf16[128,512], index: 1, kind: input, shape index: {}]   ;;  %s5831_s2 = inlined_call_operand.vmem [shape: bf16[256,512], index: 2, kind: input, shape index: {}]   ;;  %s5832_s3 = inlined_call_operand.hbm [shape: f32[16,128], index: 3, kind: output, shape index: {}]  }
   0x1   :  { %10 = vsyncpa [#allocation10 + $0x1], 0  ;;  %s3742_s12 = smov 0   ;;  %s3744_s13 = smov 0  }
   0x2   :  { %s3746_s14 = smov 0   ;;  %s3748_s15 = smov 0  }
   0x3 LB: > { %s3763_s16 = sadd.s32 4294967295, %s3717_s15   ;;  %s3070_s17 = sadd.s32 4294967294, %s3717_s15   ;;  %s3717_s15 = sphi %s3748_s15, %s6570_s15   ;;  %s3713_s14 = sphi %s3746_s14, %s6569_s14   ;;  %s3709_s13 = sphi %s3744_s13, %s6568_s13   ;;  %s3705_s12 = sphi %s3742_s12, %s6567_s12  }
   0x4   : > { %s3767_s18 = sadd.s32 1, %s3717_s15   ;;  %s49_s19 = sadd.s32 1, %s3713_s14 }
   0x5   : > { %s46_s20 = ssub.s32 %s3717_s15, %s3767_s18  ;;  %p59_p0 = scmp.ne.s32.totalorder %s3713_s14, %s3709_s13 }
   0x6   : > { %p47_p1 = scmp.eq.s32.totalorder %s46_s20, 0  ;;  %p60_p2 = scmp.eq.s32.totalorder %s3763_s16, 1 }
   0x7   : > { %p65_p3 = scmp.ne.s32.totalorder %s3709_s13, %s3705_s12  ;;  %p66_p4 = scmp.eq.s32.totalorder %s3070_s17, 1 }
   0x8   : > { %s3778_s21 = scalar_select %p47_p1, %s3713_s14, %s49_s19  }
   0x9   : > { %p3780_p5 = por %p60_p2, %p59_p0  ;;  %p3784_p6 = por %p66_p4, %p65_p3 }
   0xa   : > { %p3073_p7 = scmp.ge.s32.totalorder %s3717_s15, 1  ;;  %p94_p8 = scmp.lt.s32.totalorder %s3717_s15, 3 }
   0xc   : > { %p95_p9 = pnand %p3073_p7, %p94_p8 }
   0xe   : > { %98 = sbr.rel (%p95_p9) target bundleno = 2764 (0xacc), region = 24 }
  0x15   : > { %s112_s24 = sand.u32 1, %s3709_s13   ;;  %s3075_s25 = sshll.u32 %s3763_s16, 3 }
  0x16   : > { %s3074_s26 = sshll.u32 %s112_s24, 3  ;;  %p116_p10 = scmp.lt.s32.totalorder %s3075_s25, 15 }
  0x17   : > { %s3799_s4 = scalar_lea.vmem [#allocation9], %s3074_s26  ;;  %p3078_p11 = scmp.ne.s32.totalorder %s3763_s16, 0 }
  0x18   : > { %s6572_s25 = smov (!%p116_p10, %s3075_s25), 15  ;;  %v144_v0 = vld [vmem:[%s5830_s1] sm:$0xf] (!%p3078_p11)  ;;  %v146_v1 = vld [vmem:[%s5830_s1 + $0x10] sm:$0xf] (!%p3078_p11) }
  0x19   : > { %s3161_s27 = sshll.u32 %s6572_s25, 5  ;;  %126 = sbr.rel (%p3078_p11) target bundleno = 140 (0x8c), region = 28  ;;  %v148_v2 = vld [vmem:[%s5830_s1 + $0x4] sm:$0xf] (!%p3078_p11)  ;;  %145 = vst [vmem:[#allocation2] sm:$0xf] (!%p3078_p11), %v144_v0 }
  0x1a   : > { %s3797_s30 = scalar_lea.vmem %s5829_s0, %s3161_s27  ;;  %147 = vst [vmem:[#allocation2 + $0x4] sm:$0xf] (!%p3078_p11), %v146_v1  ;;  %149 = vst [vmem:[#allocation2 + $0x8] sm:$0xf] (!%p3078_p11), %v148_v2  ;;  %v150_v3 = vld [vmem:[%s5830_s1 + $0x14] sm:$0xf] (!%p3078_p11) }
  0x1b   : > { %v152_v4 = vld [vmem:[%s5830_s1 + $0x8] sm:$0xf] (!%p3078_p11)  ;;  %v154_v5 = vld [vmem:[%s5830_s1 + $0x18] sm:$0xf] (!%p3078_p11)  ;;  %151 = vst [vmem:[#allocation2 + $0xc] sm:$0xf] (!%p3078_p11), %v150_v3 }
  0x1c   : > { %153 = vst [vmem:[#allocation2 + $0x10] sm:$0xf] (!%p3078_p11), %v152_v4  ;;  %155 = vst [vmem:[#allocation2 + $0x14] sm:$0xf] (!%p3078_p11), %v154_v5  ;;  %v156_v6 = vld [vmem:[%s5830_s1 + $0xc] sm:$0xf] (!%p3078_p11) }
  0x1d   : > { %v158_v7 = vld [vmem:[%s5830_s1 + $0x1c] sm:$0xff] (!%p3078_p11)   ;;  %v162_v8 = vld [vmem:[%s5830_s1 + $0x30] sm:$0xf] (!%p3078_p11)  ;;  %157 = vst [vmem:[#allocation2 + $0x18] sm:$0xf] (!%p3078_p11), %v156_v6 }
  0x1e   : > { %159 = vst [vmem:[#allocation2 + $0x1c] sm:$0xff] (!%p3078_p11), %v158_v7   ;;  %163 = vst [vmem:[#allocation2 + $0x24] sm:$0xf] (!%p3078_p11), %v162_v8  ;;  %v164_v9 = vld [vmem:[%s5830_s1 + $0x24] sm:$0xf] (!%p3078_p11)  ;;  %v174_v14 = vld [vmem:[%s5830_s1 + $0x3c] sm:$0xff] (!%p3078_p11)  }
  0x1f   : > { %v166_v10 = vld [vmem:[%s5830_s1 + $0x34] sm:$0xf] (!%p3078_p11)  ;;  %v168_v11 = vld [vmem:[%s5830_s1 + $0x28] sm:$0xf] (!%p3078_p11)  ;;  %165 = vst [vmem:[#allocation2 + $0x28] sm:$0xf] (!%p3078_p11), %v164_v9 }
  0x20   : > { %167 = vst [vmem:[#allocation2 + $0x2c] sm:$0xf] %v166_v10  ;;  %169 = vst [vmem:[#allocation2 + $0x30] sm:$0xf] %v168_v11  ;;  %v170_v12 = vld [vmem:[%s5830_s1 + $0x38] sm:$0xf] }
  0x21   : > { %v172_v13 = vld [vmem:[%s5830_s1 + $0x2c] sm:$0xf]  ;;  %171 = vst [vmem:[#allocation2 + $0x34] sm:$0xf] %v170_v12  ;;  %175 = vst [vmem:[#allocation2 + $0x3c] sm:$0xff] %v174_v14   ;;  %v190_v21 = vld [vmem:[%s5830_s1 + $0x5c] sm:$0xff]  }
  0x22   : > { %173 = vst [vmem:[#allocation2 + $0x38] sm:$0xf] %v172_v13  ;;  %v178_v15 = vld [vmem:[%s5830_s1 + $0x50] sm:$0xf]  ;;  %v180_v16 = vld [vmem:[%s5830_s1 + $0x44] sm:$0xf] }
  0x23   : > { %v182_v17 = vld [vmem:[%s5830_s1 + $0x54] sm:$0xf]  ;;  %179 = vst [vmem:[#allocation2 + $0x44] sm:$0xf] %v178_v15  ;;  %181 = vst [vmem:[#allocation2 + $0x48] sm:$0xf] %v180_v16 }
  0x24   : > { %183 = vst [vmem:[#allocation2 + $0x4c] sm:$0xf] %v182_v17  ;;  %v184_v18 = vld [vmem:[%s5830_s1 + $0x48] sm:$0xf]  ;;  %v186_v19 = vld [vmem:[%s5830_s1 + $0x58] sm:$0xf] }
  0x25   : > { %v188_v20 = vld [vmem:[%s5830_s1 + $0x4c] sm:$0xf]  ;;  %185 = vst [vmem:[#allocation2 + $0x50] sm:$0xf] %v184_v18  ;;  %187 = vst [vmem:[#allocation2 + $0x54] sm:$0xf] %v186_v19 }
  0x26   : > { %189 = vst [vmem:[#allocation2 + $0x58] sm:$0xf] %v188_v20  ;;  %v194_v22 = vld [vmem:[%s5830_s1 + $0x70] sm:$0xf]  ;;  %v196_v23 = vld [vmem:[%s5830_s1 + $0x64] sm:$0xf] }
  0x27   : > { %191 = vst [vmem:[#allocation2 + $0x5c] sm:$0xff] %v190_v21   ;;  %195 = vst [vmem:[#allocation2 + $0x64] sm:$0xf] %v194_v22  ;;  %v198_v24 = vld [vmem:[%s5830_s1 + $0x74] sm:$0xf]  ;;  %v206_v28 = vld [vmem:[%s5830_s1 + $0x7c] sm:$0xff]  }
  0x28   : > { %197 = vst [vmem:[#allocation2 + $0x68] sm:$0xf] %v196_v23  ;;  %v200_v25 = vld [vmem:[%s5830_s1 + $0x68] sm:$0xf]  ;;  %v202_v26 = vld [vmem:[%s5830_s1 + $0x78] sm:$0xf] }
  0x29   : > { %199 = vst [vmem:[#allocation2 + $0x6c] sm:$0xf] %v198_v24  ;;  %201 = vst [vmem:[#allocation2 + $0x70] sm:$0xf] %v200_v25  ;;  %v204_v27 = vld [vmem:[%s5830_s1 + $0x6c] sm:$0xf] }
  0x2a   : > { %203 = vst [vmem:[#allocation2 + $0x74] sm:$0xf] %v202_v26  ;;  %v210_v29 = vld [vmem:[%s5830_s1 + $0x90] sm:$0xf]  ;;  %205 = vst [vmem:[#allocation2 + $0x78] sm:$0xf] %v204_v27 }
  0x2b   : > { %207 = vst [vmem:[#allocation2 + $0x7c] sm:$0xff] %v206_v28   ;;  %211 = vst [vmem:[#allocation2 + $0x84] sm:$0xf] %v210_v29  ;;  %v212_v30 = vld [vmem:[%s5830_s1 + $0x84] sm:$0xf]  ;;  %v222_v35 = vld [vmem:[%s5830_s1 + $0x9c] sm:$0xff]  }
  0x2c   : > { %v214_v31 = vld [vmem:[%s5830_s1 + $0x94] sm:$0xf]  ;;  %v216_v32 = vld [vmem:[%s5830_s1 + $0x88] sm:$0xf]  ;;  %213 = vst [vmem:[#allocation2 + $0x88] sm:$0xf] %v212_v30 }
  0x2d   : > { %215 = vst [vmem:[#allocation2 + $0x8c] sm:$0xf] %v214_v31  ;;  %217 = vst [vmem:[#allocation2 + $0x90] sm:$0xf] %v216_v32  ;;  %v218_v33 = vld [vmem:[%s5830_s1 + $0x98] sm:$0xf] }
  0x2e   : > { %v220_v34 = vld [vmem:[%s5830_s1 + $0x8c] sm:$0xf]  ;;  %219 = vst [vmem:[#allocation2 + $0x94] sm:$0xf] %v218_v33  ;;  %223 = vst [vmem:[#allocation2 + $0x9c] sm:$0xff] %v222_v35   ;;  %v238_v42 = vld [vmem:[%s5830_s1 + $0xbc] sm:$0xff]  }
  0x2f   : > { %221 = vst [vmem:[#allocation2 + $0x98] sm:$0xf] %v220_v34  ;;  %v226_v36 = vld [vmem:[%s5830_s1 + $0xb0] sm:$0xf]  ;;  %v228_v37 = vld [vmem:[%s5830_s1 + $0xa4] sm:$0xf] }
  0x30   : > { %v230_v38 = vld [vmem:[%s5830_s1 + $0xb4] sm:$0xf]  ;;  %227 = vst [vmem:[#allocation2 + $0xa4] sm:$0xf] %v226_v36  ;;  %229 = vst [vmem:[#allocation2 + $0xa8] sm:$0xf] %v228_v37 }
  0x31   : > { %231 = vst [vmem:[#allocation2 + $0xac] sm:$0xf] %v230_v38  ;;  %v232_v39 = vld [vmem:[%s5830_s1 + $0xa8] sm:$0xf]  ;;  %v234_v40 = vld [vmem:[%s5830_s1 + $0xb8] sm:$0xf] }
  0x32   : > { %v236_v41 = vld [vmem:[%s5830_s1 + $0xac] sm:$0xf]  ;;  %233 = vst [vmem:[#allocation2 + $0xb0] sm:$0xf] %v232_v39  ;;  %235 = vst [vmem:[#allocation2 + $0xb4] sm:$0xf] %v234_v40 }
  0x33   : > { %237 = vst [vmem:[#allocation2 + $0xb8] sm:$0xf] %v236_v41  ;;  %v242_v43 = vld [vmem:[%s5830_s1 + $0xd0] sm:$0xf]  ;;  %v244_v44 = vld [vmem:[%s5830_s1 + $0xc4] sm:$0xf] }
  0x34   : > { %239 = vst [vmem:[#allocation2 + $0xbc] sm:$0xff] %v238_v42   ;;  %243 = vst [vmem:[#allocation2 + $0xc4] sm:$0xf] %v242_v43  ;;  %v246_v45 = vld [vmem:[%s5830_s1 + $0xd4] sm:$0xf]  ;;  %v254_v49 = vld [vmem:[%s5830_s1 + $0xdc] sm:$0xff]  }
  0x35   : > { %245 = vst [vmem:[#allocation2 + $0xc8] sm:$0xf] %v244_v44  ;;  %v248_v46 = vld [vmem:[%s5830_s1 + $0xc8] sm:$0xf]  ;;  %v250_v47 = vld [vmem:[%s5830_s1 + $0xd8] sm:$0xf] }
  0x36   : > { %247 = vst [vmem:[#allocation2 + $0xcc] sm:$0xf] %v246_v45  ;;  %249 = vst [vmem:[#allocation2 + $0xd0] sm:$0xf] %v248_v46  ;;  %v252_v48 = vld [vmem:[%s5830_s1 + $0xcc] sm:$0xf] }
  0x37   : > { %251 = vst [vmem:[#allocation2 + $0xd4] sm:$0xf] %v250_v47  ;;  %v258_v50 = vld [vmem:[%s5830_s1 + $0xf0] sm:$0xf]  ;;  %253 = vst [vmem:[#allocation2 + $0xd8] sm:$0xf] %v252_v48 }
  0x38   : > { %255 = vst [vmem:[#allocation2 + $0xdc] sm:$0xff] %v254_v49   ;;  %259 = vst [vmem:[#allocation2 + $0xe4] sm:$0xf] %v258_v50  ;;  %v260_v51 = vld [vmem:[%s5830_s1 + $0xe4] sm:$0xf] }
  0x39   : > { %v262_v52 = vld [vmem:[%s5830_s1 + $0xf4] sm:$0xf]  ;;  %v264_v53 = vld [vmem:[%s5830_s1 + $0xe8] sm:$0xf]  ;;  %261 = vst [vmem:[#allocation2 + $0xe8] sm:$0xf] %v260_v51 }
  0x3a   : > { %263 = vst [vmem:[#allocation2 + $0xec] sm:$0xf] %v262_v52  ;;  %265 = vst [vmem:[#allocation2 + $0xf0] sm:$0xf] %v264_v53  ;;  %v266_v54 = vld [vmem:[%s5830_s1 + $0xf8] sm:$0xf] }
  0x3b   : > { %v268_v55 = vld [vmem:[%s5830_s1 + $0xec] sm:$0xf]  ;;  %v270_v56 = vld [vmem:[%s5830_s1 + $0xfc] sm:$0xf]  ;;  %267 = vst [vmem:[#allocation2 + $0xf4] sm:$0xf] %v266_v54 }
  0x3c   : > { %269 = vst [vmem:[#allocation2 + $0xf8] sm:$0xf] %v268_v55  ;;  %271 = vst [vmem:[#allocation2 + $0xfc] sm:$0xf] %v270_v56 }
  0x3d   : > { %430 = vsyncadd [#allocation4], 4096  ;;  %v449_v57 = vld [vmem:[%s5831_s2] sm:$0xf]  ;;  %v451_v58 = vld [vmem:[%s5831_s2 + $0x10] sm:$0xf] }
  0x3e   : > { %450 = vst [vmem:[#allocation3] sm:$0xf] %v449_v57  ;;  %452 = vst [vmem:[#allocation3 + $0x4] sm:$0xf] %v451_v58  ;;  %v453_v59 = vld [vmem:[%s5831_s2 + $0x4] sm:$0xf] }
  0x3f   : > { %v455_v60 = vld [vmem:[%s5831_s2 + $0x14] sm:$0xf]  ;;  %v457_v61 = vld [vmem:[%s5831_s2 + $0x8] sm:$0xf]  ;;  %454 = vst [vmem:[#allocation3 + $0x8] sm:$0xf] %v453_v59 }
  0x40   : > { %456 = vst [vmem:[#allocation3 + $0xc] sm:$0xf] %v455_v60  ;;  %458 = vst [vmem:[#allocation3 + $0x10] sm:$0xf] %v457_v61  ;;  %v459_v62 = vld [vmem:[%s5831_s2 + $0x18] sm:$0xf] }
  0x41   : > { %v461_v63 = vld [vmem:[%s5831_s2 + $0xc] sm:$0xf]  ;;  %v463_v0 = vld [vmem:[%s5831_s2 + $0x1c] sm:$0xff]   ;;  %460 = vst [vmem:[#allocation3 + $0x14] sm:$0xf] %v459_v62 }
  0x42   : > { %462 = vst [vmem:[#allocation3 + $0x18] sm:$0xf] %v461_v63  ;;  %464 = vst [vmem:[#allocation3 + $0x1c] sm:$0xff] %v463_v0   ;;  %v467_v1 = vld [vmem:[%s5831_s2 + $0x30] sm:$0xf]  ;;  %v479_v7 = vld [vmem:[%s5831_s2 + $0x3c] sm:$0xff]  }
  0x43   : > { %v469_v2 = vld [vmem:[%s5831_s2 + $0x24] sm:$0xf]  ;;  %v471_v3 = vld [vmem:[%s5831_s2 + $0x34] sm:$0xf]  ;;  %468 = vst [vmem:[#allocation3 + $0x24] sm:$0xf] %v467_v1 }
  0x44   : > { %470 = vst [vmem:[#allocation3 + $0x28] sm:$0xf] %v469_v2  ;;  %472 = vst [vmem:[#allocation3 + $0x2c] sm:$0xf] %v471_v3  ;;  %v473_v4 = vld [vmem:[%s5831_s2 + $0x28] sm:$0xf] }
  0x45   : > { %v475_v5 = vld [vmem:[%s5831_s2 + $0x38] sm:$0xf]  ;;  %v477_v6 = vld [vmem:[%s5831_s2 + $0x2c] sm:$0xf]  ;;  %474 = vst [vmem:[#allocation3 + $0x30] sm:$0xf] %v473_v4 }
  0x46   : > { %476 = vst [vmem:[#allocation3 + $0x34] sm:$0xf] %v475_v5  ;;  %478 = vst [vmem:[#allocation3 + $0x38] sm:$0xf] %v477_v6  ;;  %v483_v8 = vld [vmem:[%s5831_s2 + $0x50] sm:$0xf] }
  0x47   : > { %v485_v9 = vld [vmem:[%s5831_s2 + $0x44] sm:$0xf]  ;;  %480 = vst [vmem:[#allocation3 + $0x3c] sm:$0xff] %v479_v7   ;;  %484 = vst [vmem:[#allocation3 + $0x44] sm:$0xf] %v483_v8  ;;  %v495_v14 = vld [vmem:[%s5831_s2 + $0x5c] sm:$0xff]  }
  0x48   : > { %486 = vst [vmem:[#allocation3 + $0x48] sm:$0xf] %v485_v9  ;;  %v487_v10 = vld [vmem:[%s5831_s2 + $0x54] sm:$0xf]  ;;  %v489_v11 = vld [vmem:[%s5831_s2 + $0x48] sm:$0xf] }
  0x49   : > { %v491_v12 = vld [vmem:[%s5831_s2 + $0x58] sm:$0xf]  ;;  %488 = vst [vmem:[#allocation3 + $0x4c] sm:$0xf] %v487_v10  ;;  %490 = vst [vmem:[#allocation3 + $0x50] sm:$0xf] %v489_v11 }
  0x4a   : > { %492 = vst [vmem:[#allocation3 + $0x54] sm:$0xf] %v491_v12  ;;  %v493_v13 = vld [vmem:[%s5831_s2 + $0x4c] sm:$0xf]  ;;  %v499_v15 = vld [vmem:[%s5831_s2 + $0x70] sm:$0xf] }
  0x4b   : > { %494 = vst [vmem:[#allocation3 + $0x58] sm:$0xf] %v493_v13  ;;  %496 = vst [vmem:[#allocation3 + $0x5c] sm:$0xff] %v495_v14   ;;  %v501_v16 = vld [vmem:[%s5831_s2 + $0x64] sm:$0xf]  ;;  %v511_v21 = vld [vmem:[%s5831_s2 + $0x7c] sm:$0xff]  }
  0x4c   : > { %500 = vst [vmem:[#allocation3 + $0x64] sm:$0xf] %v499_v15  ;;  %v503_v17 = vld [vmem:[%s5831_s2 + $0x74] sm:$0xf]  ;;  %v505_v18 = vld [vmem:[%s5831_s2 + $0x68] sm:$0xf] }
  0x4d   : > { %502 = vst [vmem:[#allocation3 + $0x68] sm:$0xf] %v501_v16  ;;  %504 = vst [vmem:[#allocation3 + $0x6c] sm:$0xf] %v503_v17  ;;  %v507_v19 = vld [vmem:[%s5831_s2 + $0x78] sm:$0xf] }
  0x4e   : > { %506 = vst [vmem:[#allocation3 + $0x70] sm:$0xf] %v505_v18  ;;  %v509_v20 = vld [vmem:[%s5831_s2 + $0x6c] sm:$0xf]  ;;  %508 = vst [vmem:[#allocation3 + $0x74] sm:$0xf] %v507_v19 }
  0x4f   : > { %510 = vst [vmem:[#allocation3 + $0x78] sm:$0xf] %v509_v20  ;;  %512 = vst [vmem:[#allocation3 + $0x7c] sm:$0xff] %v511_v21   ;;  %v515_v22 = vld [vmem:[%s5831_s2 + $0x90] sm:$0xf]  ;;  %v527_v28 = vld [vmem:[%s5831_s2 + $0x9c] sm:$0xff]  }
  0x50   : > { %v517_v23 = vld [vmem:[%s5831_s2 + $0x84] sm:$0xf]  ;;  %v519_v24 = vld [vmem:[%s5831_s2 + $0x94] sm:$0xf]  ;;  %516 = vst [vmem:[#allocation3 + $0x84] sm:$0xf] %v515_v22 }
  0x51   : > { %518 = vst [vmem:[#allocation3 + $0x88] sm:$0xf] %v517_v23  ;;  %520 = vst [vmem:[#allocation3 + $0x8c] sm:$0xf] %v519_v24  ;;  %v521_v25 = vld [vmem:[%s5831_s2 + $0x88] sm:$0xf] }
  0x52   : > { %v523_v26 = vld [vmem:[%s5831_s2 + $0x98] sm:$0xf]  ;;  %v525_v27 = vld [vmem:[%s5831_s2 + $0x8c] sm:$0xf]  ;;  %522 = vst [vmem:[#allocation3 + $0x90] sm:$0xf] %v521_v25 }
  0x53   : > { %524 = vst [vmem:[#allocation3 + $0x94] sm:$0xf] %v523_v26  ;;  %526 = vst [vmem:[#allocation3 + $0x98] sm:$0xf] %v525_v27  ;;  %v531_v29 = vld [vmem:[%s5831_s2 + $0xb0] sm:$0xf] }
  0x54   : > { %v533_v30 = vld [vmem:[%s5831_s2 + $0xa4] sm:$0xf]  ;;  %528 = vst [vmem:[#allocation3 + $0x9c] sm:$0xff] %v527_v28   ;;  %532 = vst [vmem:[#allocation3 + $0xa4] sm:$0xf] %v531_v29  ;;  %v543_v35 = vld [vmem:[%s5831_s2 + $0xbc] sm:$0xff]  }
  0x55   : > { %534 = vst [vmem:[#allocation3 + $0xa8] sm:$0xf] %v533_v30  ;;  %v535_v31 = vld [vmem:[%s5831_s2 + $0xb4] sm:$0xf]  ;;  %v537_v32 = vld [vmem:[%s5831_s2 + $0xa8] sm:$0xf] }
  0x56   : > { %v539_v33 = vld [vmem:[%s5831_s2 + $0xb8] sm:$0xf]  ;;  %536 = vst [vmem:[#allocation3 + $0xac] sm:$0xf] %v535_v31  ;;  %538 = vst [vmem:[#allocation3 + $0xb0] sm:$0xf] %v537_v32 }
  0x57   : > { %540 = vst [vmem:[#allocation3 + $0xb4] sm:$0xf] %v539_v33  ;;  %v541_v34 = vld [vmem:[%s5831_s2 + $0xac] sm:$0xf]  ;;  %v547_v36 = vld [vmem:[%s5831_s2 + $0xd0] sm:$0xf] }
  0x58   : > { %542 = vst [vmem:[#allocation3 + $0xb8] sm:$0xf] %v541_v34  ;;  %544 = vst [vmem:[#allocation3 + $0xbc] sm:$0xff] %v543_v35   ;;  %v549_v37 = vld [vmem:[%s5831_s2 + $0xc4] sm:$0xf]  ;;  %v559_v42 = vld [vmem:[%s5831_s2 + $0xdc] sm:$0xff]  }
  0x59   : > { %548 = vst [vmem:[#allocation3 + $0xc4] sm:$0xf] %v547_v36  ;;  %v551_v38 = vld [vmem:[%s5831_s2 + $0xd4] sm:$0xf]  ;;  %v553_v39 = vld [vmem:[%s5831_s2 + $0xc8] sm:$0xf] }
  0x5a   : > { %550 = vst [vmem:[#allocation3 + $0xc8] sm:$0xf] %v549_v37  ;;  %552 = vst [vmem:[#allocation3 + $0xcc] sm:$0xf] %v551_v38  ;;  %v555_v40 = vld [vmem:[%s5831_s2 + $0xd8] sm:$0xf] }
  0x5b   : > { %554 = vst [vmem:[#allocation3 + $0xd0] sm:$0xf] %v553_v39  ;;  %v557_v41 = vld [vmem:[%s5831_s2 + $0xcc] sm:$0xf]  ;;  %556 = vst [vmem:[#allocation3 + $0xd4] sm:$0xf] %v555_v40 }
  0x5c   : > { %558 = vst [vmem:[#allocation3 + $0xd8] sm:$0xf] %v557_v41  ;;  %560 = vst [vmem:[#allocation3 + $0xdc] sm:$0xff] %v559_v42   ;;  %v563_v43 = vld [vmem:[%s5831_s2 + $0xf0] sm:$0xf]  ;;  %v575_v49 = vld [vmem:[%s5831_s2 + $0xfc] sm:$0xff]  }
  0x5d   : > { %v565_v44 = vld [vmem:[%s5831_s2 + $0xe4] sm:$0xf]  ;;  %v567_v45 = vld [vmem:[%s5831_s2 + $0xf4] sm:$0xf]  ;;  %564 = vst [vmem:[#allocation3 + $0xe4] sm:$0xf] %v563_v43 }
  0x5e   : > { %566 = vst [vmem:[#allocation3 + $0xe8] sm:$0xf] %v565_v44  ;;  %568 = vst [vmem:[#allocation3 + $0xec] sm:$0xf] %v567_v45  ;;  %v569_v46 = vld [vmem:[%s5831_s2 + $0xe8] sm:$0xf] }
  0x5f   : > { %v571_v47 = vld [vmem:[%s5831_s2 + $0xf8] sm:$0xf]  ;;  %v573_v48 = vld [vmem:[%s5831_s2 + $0xec] sm:$0xf]  ;;  %570 = vst [vmem:[#allocation3 + $0xf0] sm:$0xf] %v569_v46 }
  0x60   : > { %572 = vst [vmem:[#allocation3 + $0xf4] sm:$0xf] %v571_v47  ;;  %574 = vst [vmem:[#allocation3 + $0xf8] sm:$0xf] %v573_v48  ;;  %v579_v50 = vld [vmem:[%s5831_s2 + $0x110] sm:$0xf] }
  0x61   : > { %v581_v51 = vld [vmem:[%s5831_s2 + $0x104] sm:$0xf]  ;;  %576 = vst [vmem:[#allocation3 + $0xfc] sm:$0xff] %v575_v49   ;;  %580 = vst [vmem:[#allocation3 + $0x104] sm:$0xf] %v579_v50  ;;  %v591_v56 = vld [vmem:[%s5831_s2 + $0x11c] sm:$0xff]  }
  0x62   : > { %582 = vst [vmem:[#allocation3 + $0x108] sm:$0xf] %v581_v51  ;;  %v583_v52 = vld [vmem:[%s5831_s2 + $0x114] sm:$0xf]  ;;  %v585_v53 = vld [vmem:[%s5831_s2 + $0x108] sm:$0xf] }
  0x63   : > { %v587_v54 = vld [vmem:[%s5831_s2 + $0x118] sm:$0xf]  ;;  %584 = vst [vmem:[#allocation3 + $0x10c] sm:$0xf] %v583_v52  ;;  %586 = vst [vmem:[#allocation3 + $0x110] sm:$0xf] %v585_v53 }
  0x64   : > { %588 = vst [vmem:[#allocation3 + $0x114] sm:$0xf] %v587_v54  ;;  %v589_v55 = vld [vmem:[%s5831_s2 + $0x10c] sm:$0xf]  ;;  %v595_v57 = vld [vmem:[%s5831_s2 + $0x130] sm:$0xf] }
  0x65   : > { %590 = vst [vmem:[#allocation3 + $0x118] sm:$0xf] %v589_v55  ;;  %592 = vst [vmem:[#allocation3 + $0x11c] sm:$0xff] %v591_v56   ;;  %v597_v58 = vld [vmem:[%s5831_s2 + $0x124] sm:$0xf]  ;;  %v607_v63 = vld [vmem:[%s5831_s2 + $0x13c] sm:$0xff]  }
  0x66   : > { %596 = vst [vmem:[#allocation3 + $0x124] sm:$0xf] %v595_v57  ;;  %v599_v59 = vld [vmem:[%s5831_s2 + $0x134] sm:$0xf]  ;;  %v601_v60 = vld [vmem:[%s5831_s2 + $0x128] sm:$0xf] }
  0x67   : > { %598 = vst [vmem:[#allocation3 + $0x128] sm:$0xf] %v597_v58  ;;  %600 = vst [vmem:[#allocation3 + $0x12c] sm:$0xf] %v599_v59  ;;  %v603_v61 = vld [vmem:[%s5831_s2 + $0x138] sm:$0xf] }
  0x68   : > { %602 = vst [vmem:[#allocation3 + $0x130] sm:$0xf] %v601_v60  ;;  %v605_v62 = vld [vmem:[%s5831_s2 + $0x12c] sm:$0xf]  ;;  %604 = vst [vmem:[#allocation3 + $0x134] sm:$0xf] %v603_v61 }
  0x69   : > { %606 = vst [vmem:[#allocation3 + $0x138] sm:$0xf] %v605_v62  ;;  %608 = vst [vmem:[#allocation3 + $0x13c] sm:$0xff] %v607_v63   ;;  %v611_v0 = vld [vmem:[%s5831_s2 + $0x150] sm:$0xf]  ;;  %v623_v6 = vld [vmem:[%s5831_s2 + $0x15c] sm:$0xff]  }
  0x6a   : > { %v613_v1 = vld [vmem:[%s5831_s2 + $0x144] sm:$0xf]  ;;  %v615_v2 = vld [vmem:[%s5831_s2 + $0x154] sm:$0xf]  ;;  %612 = vst [vmem:[#allocation3 + $0x144] sm:$0xf] %v611_v0 }
  0x6b   : > { %614 = vst [vmem:[#allocation3 + $0x148] sm:$0xf] %v613_v1  ;;  %616 = vst [vmem:[#allocation3 + $0x14c] sm:$0xf] %v615_v2  ;;  %v617_v3 = vld [vmem:[%s5831_s2 + $0x148] sm:$0xf] }
  0x6c   : > { %v619_v4 = vld [vmem:[%s5831_s2 + $0x158] sm:$0xf]  ;;  %v621_v5 = vld [vmem:[%s5831_s2 + $0x14c] sm:$0xf]  ;;  %618 = vst [vmem:[#allocation3 + $0x150] sm:$0xf] %v617_v3 }
  0x6d   : > { %620 = vst [vmem:[#allocation3 + $0x154] sm:$0xf] %v619_v4  ;;  %622 = vst [vmem:[#allocation3 + $0x158] sm:$0xf] %v621_v5  ;;  %v627_v7 = vld [vmem:[%s5831_s2 + $0x170] sm:$0xf] }
  0x6e   : > { %v629_v8 = vld [vmem:[%s5831_s2 + $0x164] sm:$0xf]  ;;  %624 = vst [vmem:[#allocation3 + $0x15c] sm:$0xff] %v623_v6   ;;  %628 = vst [vmem:[#allocation3 + $0x164] sm:$0xf] %v627_v7  ;;  %v639_v13 = vld [vmem:[%s5831_s2 + $0x17c] sm:$0xff]  }
  0x6f   : > { %630 = vst [vmem:[#allocation3 + $0x168] sm:$0xf] %v629_v8  ;;  %v631_v9 = vld [vmem:[%s5831_s2 + $0x174] sm:$0xf]  ;;  %v633_v10 = vld [vmem:[%s5831_s2 + $0x168] sm:$0xf] }
  0x70   : > { %v635_v11 = vld [vmem:[%s5831_s2 + $0x178] sm:$0xf]  ;;  %632 = vst [vmem:[#allocation3 + $0x16c] sm:$0xf] %v631_v9  ;;  %634 = vst [vmem:[#allocation3 + $0x170] sm:$0xf] %v633_v10 }
  0x71   : > { %636 = vst [vmem:[#allocation3 + $0x174] sm:$0xf] %v635_v11  ;;  %v637_v12 = vld [vmem:[%s5831_s2 + $0x16c] sm:$0xf]  ;;  %v643_v14 = vld [vmem:[%s5831_s2 + $0x190] sm:$0xf] }
  0x72   : > { %638 = vst [vmem:[#allocation3 + $0x178] sm:$0xf] %v637_v12  ;;  %640 = vst [vmem:[#allocation3 + $0x17c] sm:$0xff] %v639_v13   ;;  %v645_v15 = vld [vmem:[%s5831_s2 + $0x184] sm:$0xf]  ;;  %v655_v20 = vld [vmem:[%s5831_s2 + $0x19c] sm:$0xff]  }
  0x73   : > { %644 = vst [vmem:[#allocation3 + $0x184] sm:$0xf] %v643_v14  ;;  %v647_v16 = vld [vmem:[%s5831_s2 + $0x194] sm:$0xf]  ;;  %v649_v17 = vld [vmem:[%s5831_s2 + $0x188] sm:$0xf] }
  0x74   : > { %646 = vst [vmem:[#allocation3 + $0x188] sm:$0xf] %v645_v15  ;;  %648 = vst [vmem:[#allocation3 + $0x18c] sm:$0xf] %v647_v16  ;;  %v651_v18 = vld [vmem:[%s5831_s2 + $0x198] sm:$0xf] }
  0x75   : > { %650 = vst [vmem:[#allocation3 + $0x190] sm:$0xf] %v649_v17  ;;  %v653_v19 = vld [vmem:[%s5831_s2 + $0x18c] sm:$0xf]  ;;  %652 = vst [vmem:[#allocation3 + $0x194] sm:$0xf] %v651_v18 }
  0x76   : > { %654 = vst [vmem:[#allocation3 + $0x198] sm:$0xf] %v653_v19  ;;  %656 = vst [vmem:[#allocation3 + $0x19c] sm:$0xff] %v655_v20   ;;  %v659_v21 = vld [vmem:[%s5831_s2 + $0x1b0] sm:$0xf]  ;;  %v671_v27 = vld [vmem:[%s5831_s2 + $0x1bc] sm:$0xff]  }
  0x77   : > { %v661_v22 = vld [vmem:[%s5831_s2 + $0x1a4] sm:$0xf]  ;;  %v663_v23 = vld [vmem:[%s5831_s2 + $0x1b4] sm:$0xf]  ;;  %660 = vst [vmem:[#allocation3 + $0x1a4] sm:$0xf] %v659_v21 }
  0x78   : > { %662 = vst [vmem:[#allocation3 + $0x1a8] sm:$0xf] %v661_v22  ;;  %664 = vst [vmem:[#allocation3 + $0x1ac] sm:$0xf] %v663_v23  ;;  %v665_v24 = vld [vmem:[%s5831_s2 + $0x1a8] sm:$0xf] }
  0x79   : > { %v667_v25 = vld [vmem:[%s5831_s2 + $0x1b8] sm:$0xf]  ;;  %v669_v26 = vld [vmem:[%s5831_s2 + $0x1ac] sm:$0xf]  ;;  %666 = vst [vmem:[#allocation3 + $0x1b0] sm:$0xf] %v665_v24 }
  0x7a   : > { %668 = vst [vmem:[#allocation3 + $0x1b4] sm:$0xf] %v667_v25  ;;  %670 = vst [vmem:[#allocation3 + $0x1b8] sm:$0xf] %v669_v26  ;;  %v675_v28 = vld [vmem:[%s5831_s2 + $0x1d0] sm:$0xf] }
  0x7b   : > { %v677_v29 = vld [vmem:[%s5831_s2 + $0x1c4] sm:$0xf]  ;;  %672 = vst [vmem:[#allocation3 + $0x1bc] sm:$0xff] %v671_v27   ;;  %676 = vst [vmem:[#allocation3 + $0x1c4] sm:$0xf] %v675_v28  ;;  %v687_v34 = vld [vmem:[%s5831_s2 + $0x1dc] sm:$0xff]  }
  0x7c   : > { %678 = vst [vmem:[#allocation3 + $0x1c8] sm:$0xf] %v677_v29  ;;  %v679_v30 = vld [vmem:[%s5831_s2 + $0x1d4] sm:$0xf]  ;;  %v681_v31 = vld [vmem:[%s5831_s2 + $0x1c8] sm:$0xf] }
  0x7d   : > { %v683_v32 = vld [vmem:[%s5831_s2 + $0x1d8] sm:$0xf]  ;;  %680 = vst [vmem:[#allocation3 + $0x1cc] sm:$0xf] %v679_v30  ;;  %682 = vst [vmem:[#allocation3 + $0x1d0] sm:$0xf] %v681_v31 }
  0x7e   : > { %684 = vst [vmem:[#allocation3 + $0x1d4] sm:$0xf] %v683_v32  ;;  %v685_v33 = vld [vmem:[%s5831_s2 + $0x1cc] sm:$0xf]  ;;  %v691_v35 = vld [vmem:[%s5831_s2 + $0x1f0] sm:$0xf] }
  0x7f   : > { %686 = vst [vmem:[#allocation3 + $0x1d8] sm:$0xf] %v685_v33  ;;  %688 = vst [vmem:[#allocation3 + $0x1dc] sm:$0xff] %v687_v34   ;;  %v693_v36 = vld [vmem:[%s5831_s2 + $0x1e4] sm:$0xf] }
  0x80   : > { %692 = vst [vmem:[#allocation3 + $0x1e4] sm:$0xf] %v691_v35  ;;  %v695_v37 = vld [vmem:[%s5831_s2 + $0x1f4] sm:$0xf]  ;;  %v697_v38 = vld [vmem:[%s5831_s2 + $0x1e8] sm:$0xf] }
  0x81   : > { %694 = vst [vmem:[#allocation3 + $0x1e8] sm:$0xf] %v693_v36  ;;  %696 = vst [vmem:[#allocation3 + $0x1ec] sm:$0xf] %v695_v37  ;;  %v699_v39 = vld [vmem:[%s5831_s2 + $0x1f8] sm:$0xf] }
  0x82   : > { %698 = vst [vmem:[#allocation3 + $0x1f0] sm:$0xf] %v697_v38  ;;  %v701_v40 = vld [vmem:[%s5831_s2 + $0x1ec] sm:$0xf]  ;;  %v703_v41 = vld [vmem:[%s5831_s2 + $0x1fc] sm:$0xf] }
  0x83   : > { %700 = vst [vmem:[#allocation3 + $0x1f4] sm:$0xf] %v699_v39  ;;  %702 = vst [vmem:[#allocation3 + $0x1f8] sm:$0xf] %v701_v40 }
  0x84   : > { %704 = vst [vmem:[#allocation3 + $0x1fc] sm:$0xf] %v703_v41 }
  0x85   : > { %991 = vsyncadd [#allocation4 + $0x1], 8192 }
  0x86   : > { %3695 = dma.done.wait [#allocation4], 4096 }
  0x87   : > { %3696 = vsyncadd [#allocation4], 4294963200 }
  0x88   : > { %3697 = dma.done.wait [#allocation4 + $0x1], 8192 }
  0x89   : > { %3698 = vsyncadd [#allocation4 + $0x1], 4294959104  ;;  %v3719_v42 = vmov 0.0  }
  0x8a   : > { %1000 = vst [vmem:[#allocation5] sm:$0xff] %v3719_v42  ;;  %1001 = vst [vmem:[#allocation6] sm:$0xff] %v3719_v42 }
  0x8b   : > { %1002 = vst [vmem:[#allocation7] sm:$0xff] %v3719_v42  ;;  %1003 = vst [vmem:[#allocation8] sm:$0xff] %v3719_v42 }
  0x8c PF: > { %v5833_v46 = vmov 0   ;;  %v4330_v50 = vld [vmem:[#allocation2 + $0x38] sm:$0xff]  ;;  %v4332_v51 = vld [vmem:[#allocation2 + $0x48] sm:$0xff]  ;;  %v4342_v54 = vld [vmem:[#allocation2 + $0x40] sm:$0xff]  ;;  %s2970_s25 = sshll.u32 %s3799_s4, 4  ;;  %s2957_s29 = scalar_lea.sflag [#allocation10], %s112_s24  ;;  %s5786_s25 = int_to_ptr.vmem [resolvable:$true] %s2970_s25 }
  0x8d   : > { %v4314_v44 = vld [vmem:[#allocation2] sm:$0xff]  ;;  %1141 = vmatprep.mubr.bf16.mxu0 %v5833_v46  ;;  %1182 = vmatprep.mubr.bf16.mxu1 %v5833_v46  ;;  %v4339_v53 = vld [vmem:[#allocation2 + $0x58] sm:$0xff]  ;;  %v4344_v55 = vld [vmem:[#allocation2 + $0x68] sm:$0xff]  ;;  %s3651_s5 = scalar_lea.vmem %s5786_s25, 128 }
  0x8e   : > { %v4312_v43 = vld [vmem:[#allocation2 + $0x8] sm:$0xff]  ;;  %v4348_v56 = vld [vmem:[#allocation2 + $0x50] sm:$0xff]  ;;  %v4351_v57 = vld [vmem:[#allocation2 + $0x78] sm:$0xff]  ;;  %p3652_p12 = scmp.ne.s32.totalorder %s5786_s25, %s3651_s5 }
  0x8f   : > { %6115 = vst [vmem:[#allocation16_spill] sm:$0xff] %v4312_v43  ;;  %1109 = vmatprep.subr.bf16.mxu0 %v4312_v43  ;;  %v4328_v49 = vld [vmem:[#allocation2 + $0x10] sm:$0xff]  ;;  %v4354_v58 = vld [vmem:[#allocation2 + $0x60] sm:$0xff]  ;;  %v4356_v59 = vld [vmem:[#allocation2 + $0x88] sm:$0xff] }
  0x90   : > { %1110 = vmatpush1.bf16.msra.mxu0 %v4314_v44  ;;  %v4360_v60 = vld [vmem:[#allocation2 + $0x70] sm:$0xff]  ;;  %v4363_v61 = vld [vmem:[#allocation2 + $0x98] sm:$0xff]  ;;  %v4366_v62 = vld [vmem:[#allocation2 + $0x80] sm:$0xff]  ;;  %p3653_p13 = pnand %p3652_p12, %p3780_p5 }
  0x91   : > { %v4321_v47 = vld [vmem:[#allocation2 + $0x18] sm:$0xff]  ;;  %v4325_v48 = vld [vmem:[#allocation2 + $0x20] sm:$0xff]  ;;  %v4368_v63 = vld [vmem:[#allocation2 + $0xa8] sm:$0xff] }
  0x92   : > { %6116 = vst [vmem:[#allocation17_spill] sm:$0xff] %v4321_v47  ;;  %1150 = vmatprep.subr.bf16.mxu1 %v4321_v47  ;;  %v4372_v0 = vld [vmem:[#allocation2 + $0x90] sm:$0xff]  ;;  %v4375_v1 = vld [vmem:[#allocation2 + $0xb8] sm:$0xff]  ;;  %v4378_v2 = vld [vmem:[#allocation2 + $0xa0] sm:$0xff]  ;;  %p3654_p0 = pneg %p3653_p13 }
  0x93   : > { %v4316_v45 = vld [vmem:[#allocation2 + $0x28] sm:$0xff]  ;;  %1151 = vmatpush1.bf16.msra.mxu1 %v4328_v49  ;;  %v4336_v52 = vld [vmem:[#allocation2 + $0x30] sm:$0xff]  ;;  %v4387_v5 = vld [vmem:[#allocation2 + $0xd8] sm:$0xff] }
  0x94   : > { %1111 = vmatprep.subr.bf16.mxu0 %v4316_v45  ;;  %1152 = vmatprep.subr.bf16.mxu1 %v4330_v50  ;;  %v4380_v3 = vld [vmem:[#allocation2 + $0xc8] sm:$0xff]  ;;  %v4384_v4 = vld [vmem:[#allocation2 + $0xb0] sm:$0xff]  ;;  %v4390_v6 = vld [vmem:[#allocation2 + $0xc0] sm:$0xff] }
  0x95   : > { %1112 = vmatpush1.bf16.msra.mxu0 %v4325_v48  ;;  %v4392_v7 = vld [vmem:[#allocation2 + $0xe8] sm:$0xff]  ;;  %v4396_v8 = vld [vmem:[#allocation2 + $0xd0] sm:$0xff]  ;;  %v1100_v9 = vld [vmem:[#allocation5] sm:$0xff] }
  0x96   : > { %1113 = vmatprep.subr.bf16.mxu0 %v4332_v51  ;;  %v4399_v10 = vld [vmem:[#allocation2 + $0xf8] sm:$0xff]  ;;  %v4402_v11 = vld [vmem:[#allocation2 + $0xe0] sm:$0xff]  ;;  %v4405_v12 = vld [vmem:[#allocation3 + $0x8] sm:$0xff]  ;;  %v1108_v13 = vpack.c.bf16 %v1100_v9, %v1100_v9 }
  0x97   : > { %1153 = vmatpush1.bf16.msra.mxu1 %v4336_v52  ;;  %v4408_v14 = vld [vmem:[#allocation2 + $0xf0] sm:$0xff]  ;;  %v4411_v15 = vld [vmem:[#allocation3 + $0x18] sm:$0xff]  ;;  %v4414_v16 = vld [vmem:[#allocation3] sm:$0xff] }
  0x98   : > { %1154 = vmatprep.subr.bf16.mxu1 %v4339_v53  ;;  %v4417_v17 = vld [vmem:[#allocation3 + $0x28] sm:$0xff]  ;;  %v4420_v18 = vld [vmem:[#allocation3 + $0x10] sm:$0xff]  ;;  %v4423_v19 = vld [vmem:[#allocation3 + $0x38] sm:$0xff] }
  0x99   : > { %1114 = vmatpush1.bf16.msra.mxu0 %v4342_v54  ;;  %v4426_v20 = vld [vmem:[#allocation3 + $0x20] sm:$0xff]  ;;  %v4429_v21 = vld [vmem:[#allocation3 + $0x48] sm:$0xff]  ;;  %v4432_v22 = vld [vmem:[#allocation3 + $0x30] sm:$0xff] }
  0x9a   : > { %1115 = vmatprep.subr.bf16.mxu0 %v4344_v55  ;;  %v4435_v23 = vld [vmem:[#allocation3 + $0x58] sm:$0xff]  ;;  %v4438_v24 = vld [vmem:[#allocation3 + $0x40] sm:$0xff]  ;;  %v4441_v25 = vld [vmem:[#allocation3 + $0x68] sm:$0xff] }
  0x9b   : > { %1155 = vmatpush1.bf16.msra.mxu1 %v4348_v56  ;;  %6117 = vst [vmem:[#allocation18_spill] sm:$0xff] %v4435_v23  ;;  %6118 = vst [vmem:[#allocation19_spill] sm:$0xff] %v4438_v24  ;;  %v4444_v26 = vld [vmem:[#allocation3 + $0x50] sm:$0xff]  ;;  %v4447_v27 = vld [vmem:[#allocation3 + $0x78] sm:$0xff] }
  0x9c   : > { %1156 = vmatprep.subr.bf16.mxu1 %v4351_v57  ;;  %6119 = vst [vmem:[#allocation20_spill] sm:$0xff] %v4441_v25  ;;  %6120 = vst [vmem:[#allocation21_spill] sm:$0xff] %v4444_v26  ;;  %v4450_v28 = vld [vmem:[#allocation3 + $0x60] sm:$0xff]  ;;  %v4454_v29 = vld [vmem:[#allocation3 + $0x70] sm:$0xff] }
  0x9d   : > { %1116 = vmatpush1.bf16.msra.mxu0 %v4354_v58  ;;  %6121 = vst [vmem:[#allocation22_spill] sm:$0xff] %v4447_v27  ;;  %6122 = vst [vmem:[#allocation23_spill] sm:$0xff] %v4450_v28  ;;  %v4458_v30 = vld [vmem:[#allocation3 + $0x88] sm:$0xff]  ;;  %v4460_v31 = vld [vmem:[#allocation3 + $0x98] sm:$0xff] }
  0x9e   : > { %1117 = vmatprep.subr.bf16.mxu0 %v4356_v59  ;;  %6123 = vst [vmem:[#allocation24_spill] sm:$0xff] %v4454_v29  ;;  %6124 = vst [vmem:[#allocation25_spill] sm:$0xff] %v4458_v30  ;;  %v4464_v32 = vld [vmem:[#allocation3 + $0x80] sm:$0xff]  ;;  %v4466_v33 = vld [vmem:[#allocation3 + $0x90] sm:$0xff] }
  0x9f   : > { %1157 = vmatpush1.bf16.msra.mxu1 %v4360_v60  ;;  %6125 = vst [vmem:[#allocation26_spill] sm:$0xff] %v4460_v31  ;;  %6126 = vst [vmem:[#allocation27_spill] sm:$0xff] %v4464_v32  ;;  %v4470_v34 = vld [vmem:[#allocation3 + $0xa8] sm:$0xff]  ;;  %v4472_v35 = vld [vmem:[#allocation3 + $0xb8] sm:$0xff] }
  0xa0   : > { %1158 = vmatprep.subr.bf16.mxu1 %v4363_v61  ;;  %6127 = vst [vmem:[#allocation28_spill] sm:$0xff] %v4466_v33  ;;  %6128 = vst [vmem:[#allocation29_spill] sm:$0xff] %v4470_v34  ;;  %v4476_v36 = vld [vmem:[#allocation3 + $0xa0] sm:$0xff]  ;;  %v4478_v37 = vld [vmem:[#allocation3 + $0xb0] sm:$0xff] }
  0xa1   : > { %1118 = vmatpush1.bf16.msra.mxu0 %v4366_v62  ;;  %6129 = vst [vmem:[#allocation30_spill] sm:$0xff] %v4472_v35  ;;  %6130 = vst [vmem:[#allocation31_spill] sm:$0xff] %v4476_v36  ;;  %v4482_v38 = vld [vmem:[#allocation3 + $0xc8] sm:$0xff]  ;;  %v4484_v39 = vld [vmem:[#allocation3 + $0xd8] sm:$0xff] }
  0xa2   : > { %1119 = vmatprep.subr.bf16.mxu0 %v4368_v63  ;;  %6131 = vst [vmem:[#allocation32_spill] sm:$0xff] %v4478_v37  ;;  %6132 = vst [vmem:[#allocation33_spill] sm:$0xff] %v4482_v38  ;;  %v4488_v40 = vld [vmem:[#allocation3 + $0xc0] sm:$0xff]  ;;  %v4490_v41 = vld [vmem:[#allocation3 + $0xd0] sm:$0xff] }
  0xa3   : > { %1159 = vmatpush1.bf16.msra.mxu1 %v4372_v0  ;;  %6133 = vst [vmem:[#allocation34_spill] sm:$0xff] %v4484_v39  ;;  %6134 = vst [vmem:[#allocation35_spill] sm:$0xff] %v4488_v40  ;;  %v4494_v42 = vld [vmem:[#allocation3 + $0xe8] sm:$0xff]  ;;  %v4496_v9 = vld [vmem:[#allocation3 + $0xf8] sm:$0xff] }
  0xa4   : > { %1160 = vmatprep.subr.bf16.mxu1 %v4375_v1  ;;  %6135 = vst [vmem:[#allocation36_spill] sm:$0xff] %v4490_v41  ;;  %6136 = vst [vmem:[#allocation37_spill] sm:$0xff] %v4494_v42  ;;  %v4502_v46 = vld [vmem:[#allocation3 + $0xf0] sm:$0xff] }
  0xa5   : > { %1120 = vmatpush1.bf16.msra.mxu0 %v4378_v2  ;;  %6137 = vst [vmem:[#allocation38_spill] sm:$0xff] %v4496_v9  ;;  %6139 = vst [vmem:[#allocation40_spill] sm:$0xff] %v4502_v46 }
  0xa6   : > { %1121 = vmatprep.subr.bf16.mxu0 %v4380_v3 }
  0xa7   : > { %1161 = vmatpush1.bf16.msra.mxu1 %v4384_v4 }
  0xa8   : > { %1162 = vmatprep.subr.bf16.mxu1 %v4387_v5 }
  0xa9   : > { %1122 = vmatpush1.bf16.msra.mxu0 %v4390_v6 }
  0xaa   : > { %1123 = vmatprep.subr.bf16.mxu0 %v4392_v7 }
  0xab   : > { %1163 = vmatpush1.bf16.msra.mxu1 %v4396_v8 }
  0xac   : > { %1164 = vmatprep.subr.bf16.mxu1 %v4399_v10 }
  0xad   : > { %1124 = vmatpush1.bf16.msra.mxu0 %v4402_v11 }
  0xae   : > { %1221 = vmatprep.subr.bf16.mxu0 %v4405_v12 }
  0xaf   : > { %1165 = vmatpush1.bf16.msra.mxu1 %v4408_v14 }
  0xb0   : > { %1142 = vmatmul.mubr.bf16.vlgmr.msra.gmra.mrb[0].mxu0 %v1108_v13  ;;  %1262 = vmatprep.subr.bf16.mxu1 %v4411_v15 }
  0xb1   : > { %1222 = vmatpush1.bf16.msra.mxu0 %v4414_v16 }
  0xb2   : > { %1183 = vmatmul.mubr.bf16.vlgmr.msra.gmra.mrb[0].mxu1 %v1108_v13  ;;  %1223 = vmatprep.subr.bf16.mxu0 %v4417_v17  ;;  %v4500_v13 = vld [vmem:[#allocation3 + $0xe0] sm:$0xff] }
  0xb3   : > { %1263 = vmatpush1.bf16.msra.mxu1 %v4420_v18  ;;  %6138 = vst [vmem:[#allocation39_spill] sm:$0xff] %v4500_v13 }
  0xb4   : > { %1264 = vmatprep.subr.bf16.mxu1 %v4423_v19 }
  0xb5   : > { %1224 = vmatpush1.bf16.msra.mxu0 %v4426_v20 }
  0xb6   : > { %1225 = vmatprep.subr.bf16.mxu0 %v4429_v21 }
  0xb7   : > { %1265 = vmatpush1.bf16.msra.mxu1 %v4432_v22 }
  0xb8   : > { %1266 = vmatprep.subr.bf16.mxu1 %v4435_v23 }
  0xb9   : > { %1226 = vmatpush1.bf16.msra.mxu0 %v4438_v24 }
  0xba   : > { %1227 = vmatprep.subr.bf16.mxu0 %v4441_v25 }
  0xbb   : > { %1267 = vmatpush1.bf16.msra.mxu1 %v4444_v26 }
  0xbc   : > { %1268 = vmatprep.subr.bf16.mxu1 %v4447_v27 }
  0xbd   : > { %1228 = vmatpush1.bf16.msra.mxu0 %v4450_v28 }
  0xbe   : > { %1229 = vmatprep.subr.bf16.mxu0 %v4458_v30 }
  0xbf   : > { %1269 = vmatpush1.bf16.msra.mxu1 %v4454_v29 }
  0xc0   : > { %1270 = vmatprep.subr.bf16.mxu1 %v4460_v31 }
  0xc1   : > { %1230 = vmatpush1.bf16.msra.mxu0 %v4464_v32  ;;  %v1107_v32 = vld [vmem:[%s3797_s30 + $0x18] sm:$0xff] }
  0xc2   : > { %1231 = vmatprep.subr.bf16.mxu0 %v4470_v34 }
  0xc3   : > { %1271 = vmatpush1.bf16.msra.mxu1 %v4466_v33 }
  0xc4   : > { %1272 = vmatprep.subr.bf16.mxu1 %v4472_v35 }
  0xc5   : > { %1232 = vmatpush1.bf16.msra.mxu0 %v4476_v36  ;;  %v4590_v36 = vld [vmem:[#allocation3 + $0x1f8] sm:$0xff] }
  0xc6   : > { %1233 = vmatprep.subr.bf16.mxu0 %v4482_v38  ;;  %v4513_v38 = vld [vmem:[#allocation3 + $0x110] sm:$0xff]  ;;  %6169 = vst [vmem:[#allocation70_spill] sm:$0xff] %v4590_v36 }
  0xc7   : > { %1273 = vmatpush1.bf16.msra.mxu1 %v4478_v37  ;;  %6143 = vst [vmem:[#allocation44_spill] sm:$0xff] %v4513_v38 }
  0xc8   : > { %1274 = vmatprep.subr.bf16.mxu1 %v4484_v39  ;;  %v4506_v39 = vld [vmem:[#allocation3 + $0x108] sm:$0xff] }
  0xc9   : > { %1234 = vmatpush1.bf16.msra.mxu0 %v4488_v40  ;;  %6140 = vst [vmem:[#allocation41_spill] sm:$0xff] %v4506_v39  ;;  %v4511_v40 = vld [vmem:[#allocation3 + $0x100] sm:$0xff] }
  0xca   : > { %1235 = vmatprep.subr.bf16.mxu0 %v4494_v42  ;;  %6142 = vst [vmem:[#allocation43_spill] sm:$0xff] %v4511_v40  ;;  %v4578_v42 = vld [vmem:[#allocation3 + $0x1d8] sm:$0xff] }
  0xcb   : > { %1275 = vmatpush1.bf16.msra.mxu1 %v4490_v41  ;;  %v4509_v41 = vld [vmem:[#allocation3 + $0x118] sm:$0xff]  ;;  %6165 = vst [vmem:[#allocation66_spill] sm:$0xff] %v4578_v42 }
  0xcc   : > { %1276 = vmatprep.subr.bf16.mxu1 %v4496_v9  ;;  %6141 = vst [vmem:[#allocation42_spill] sm:$0xff] %v4509_v41  ;;  %v4518_v9 = vld [vmem:[#allocation3 + $0x128] sm:$0xff] }
  0xcd   : > { %1236 = vmatpush1.bf16.msra.mxu0 %v4500_v13  ;;  %6144 = vst [vmem:[#allocation45_spill] sm:$0xff] %v4518_v9  ;;  %v4520_v13 = vld [vmem:[#allocation3 + $0x138] sm:$0xff] }
  0xce   : > { %1237 = vmatprep.subr.bf16.mxu0 %v4506_v39  ;;  %6145 = vst [vmem:[#allocation46_spill] sm:$0xff] %v4520_v13  ;;  %v4524_v39 = vld [vmem:[#allocation3 + $0x120] sm:$0xff] }
  0xcf   : > { %1277 = vmatpush1.bf16.msra.mxu1 %v4502_v46  ;;  %6146 = vst [vmem:[#allocation47_spill] sm:$0xff] %v4524_v39  ;;  %v4526_v46 = vld [vmem:[#allocation3 + $0x130] sm:$0xff] }
  0xd0   : > { %1278 = vmatprep.subr.bf16.mxu1 %v4509_v41  ;;  %6147 = vst [vmem:[#allocation48_spill] sm:$0xff] %v4526_v46  ;;  %v4530_v41 = vld [vmem:[#allocation3 + $0x148] sm:$0xff] }
  0xd1   : > { %1238 = vmatpush1.bf16.msra.mxu0 %v4511_v40  ;;  %6148 = vst [vmem:[#allocation49_spill] sm:$0xff] %v4530_v41  ;;  %v4532_v40 = vld [vmem:[#allocation3 + $0x158] sm:$0xff] }
  0xd2   : > { %1239 = vmatprep.subr.bf16.mxu0 %v4518_v9  ;;  %6149 = vst [vmem:[#allocation50_spill] sm:$0xff] %v4532_v40  ;;  %v4538_v9 = vld [vmem:[#allocation3 + $0x150] sm:$0xff] }
  0xd3   : > { %1279 = vmatpush1.bf16.msra.mxu1 %v4513_v38  ;;  %v4536_v38 = vld [vmem:[#allocation3 + $0x140] sm:$0xff]  ;;  %6151 = vst [vmem:[#allocation52_spill] sm:$0xff] %v4538_v9 }
  0xd4   : > { %1280 = vmatprep.subr.bf16.mxu1 %v4520_v13  ;;  %6150 = vst [vmem:[#allocation51_spill] sm:$0xff] %v4536_v38  ;;  %v4542_v13 = vld [vmem:[#allocation3 + $0x168] sm:$0xff] }
  0xd5   : > { %1240 = vmatpush1.bf16.msra.mxu0 %v4524_v39  ;;  %6152 = vst [vmem:[#allocation53_spill] sm:$0xff] %v4542_v13  ;;  %v4544_v39 = vld [vmem:[#allocation3 + $0x178] sm:$0xff] }
  0xd6   : > { %1241 = vmatprep.subr.bf16.mxu0 %v4530_v41  ;;  %6153 = vst [vmem:[#allocation54_spill] sm:$0xff] %v4544_v39  ;;  %v4550_v41 = vld [vmem:[#allocation3 + $0x170] sm:$0xff] }
  0xd7   : > { %1281 = vmatpush1.bf16.msra.mxu1 %v4526_v46  ;;  %v4548_v46 = vld [vmem:[#allocation3 + $0x160] sm:$0xff]  ;;  %6155 = vst [vmem:[#allocation56_spill] sm:$0xff] %v4550_v41 }
  0xd8   : > { %1282 = vmatprep.subr.bf16.mxu1 %v4532_v40  ;;  %6154 = vst [vmem:[#allocation55_spill] sm:$0xff] %v4548_v46  ;;  %v4554_v40 = vld [vmem:[#allocation3 + $0x188] sm:$0xff] }
  0xd9   : > { %1242 = vmatpush1.bf16.msra.mxu0 %v4536_v38  ;;  %6156 = vst [vmem:[#allocation57_spill] sm:$0xff] %v4554_v40  ;;  %v4556_v38 = vld [vmem:[#allocation3 + $0x198] sm:$0xff] }
  0xda   : > { %1243 = vmatprep.subr.bf16.mxu0 %v4542_v13  ;;  %6157 = vst [vmem:[#allocation58_spill] sm:$0xff] %v4556_v38  ;;  %v4562_v13 = vld [vmem:[#allocation3 + $0x190] sm:$0xff] }
  0xdb   : > { %1283 = vmatpush1.bf16.msra.mxu1 %v4538_v9  ;;  %v4560_v9 = vld [vmem:[#allocation3 + $0x180] sm:$0xff]  ;;  %6159 = vst [vmem:[#allocation60_spill] sm:$0xff] %v4562_v13 }
  0xdc   : > { %1284 = vmatprep.subr.bf16.mxu1 %v4544_v39  ;;  %6158 = vst [vmem:[#allocation59_spill] sm:$0xff] %v4560_v9  ;;  %v4566_v39 = vld [vmem:[#allocation3 + $0x1a8] sm:$0xff] }
  0xdd   : > { %1244 = vmatpush1.bf16.msra.mxu0 %v4548_v46  ;;  %6160 = vst [vmem:[#allocation61_spill] sm:$0xff] %v4566_v39  ;;  %v4568_v46 = vld [vmem:[#allocation3 + $0x1b8] sm:$0xff] }
  0xde   : > { %1245 = vmatprep.subr.bf16.mxu0 %v4554_v40  ;;  %6161 = vst [vmem:[#allocation62_spill] sm:$0xff] %v4568_v46  ;;  %v4574_v40 = vld [vmem:[#allocation3 + $0x1b0] sm:$0xff] }
  0xdf   : > { %1285 = vmatpush1.bf16.msra.mxu1 %v4550_v41  ;;  %v4570_v41 = vld [vmem:[#allocation3 + $0x1a0] sm:$0xff]  ;;  %6163 = vst [vmem:[#allocation64_spill] sm:$0xff] %v4574_v40 }
  0xe0   : > { %1286 = vmatprep.subr.bf16.mxu1 %v4556_v38  ;;  %6162 = vst [vmem:[#allocation63_spill] sm:$0xff] %v4570_v41  ;;  %v4576_v38 = vld [vmem:[#allocation3 + $0x1c8] sm:$0xff] }
  0xe1   : > { %1246 = vmatpush1.bf16.msra.mxu0 %v4560_v9  ;;  %6164 = vst [vmem:[#allocation65_spill] sm:$0xff] %v4576_v38  ;;  %v1102_v9 = vld [vmem:[#allocation7] sm:$0xff] }
  0xe2   : > { %1247 = vmatprep.subr.bf16.mxu0 %v4566_v39  ;;  %v4586_v39 = vld [vmem:[#allocation3 + $0x1d0] sm:$0xff]  ;;  %v1220_v37 = vpack.c.bf16 %v1102_v9, %v1102_v9  ;;  %v1104_v9 = vld [vmem:[%s3797_s30] sm:$0xff] }
  0xe3   : > { %1287 = vmatpush1.bf16.msra.mxu1 %v4562_v13  ;;  %v4583_v13 = vld [vmem:[#allocation3 + $0x1c0] sm:$0xff]  ;;  %6167 = vst [vmem:[#allocation68_spill] sm:$0xff] %v4586_v39 }
  0xe4   : > { %1288 = vmatprep.subr.bf16.mxu1 %v4568_v46  ;;  %6166 = vst [vmem:[#allocation67_spill] sm:$0xff] %v4583_v13  ;;  %v4588_v46 = vld [vmem:[#allocation3 + $0x1e8] sm:$0xff]  ;;  %1253 = vmatprep.mubr.bf16.mxu0 %v1220_v37 }
  0xe5   : > { %1248 = vmatpush1.bf16.msra.mxu0 %v4570_v41  ;;  %6168 = vst [vmem:[#allocation69_spill] sm:$0xff] %v4588_v46  ;;  %1294 = vmatprep.mubr.bf16.mxu1 %v1220_v37 }
  0xe6   : > { %1249 = vmatprep.subr.bf16.mxu0 %v4576_v38  ;;  %v4595_v38 = vld [vmem:[#allocation3 + $0x1e0] sm:$0xff] }
  0xe7   : > { %1289 = vmatpush1.bf16.msra.mxu1 %v4574_v40  ;;  %6170 = vst [vmem:[#allocation71_spill] sm:$0xff] %v4595_v38 }
  0xe8   : > { %1290 = vmatprep.subr.bf16.mxu1 %v4578_v42  ;;  %v4598_v42 = vld [vmem:[#allocation3 + $0x1f0] sm:$0xff] }
  0xe9   : > { %1250 = vmatpush1.bf16.msra.mxu0 %v4583_v13  ;;  %6171 = vst [vmem:[#allocation72_spill] sm:$0xff] %v4598_v42 }
  0xea   : > { %1251 = vmatprep.subr.bf16.mxu0 %v4588_v46 }
  0xeb   : > { %1291 = vmatpush1.bf16.msra.mxu1 %v4586_v39  ;;  %v1105_v39 = vld [vmem:[%s3797_s30 + $0x8] sm:$0xff] }
  0xec   : > { %1292 = vmatprep.subr.bf16.mxu1 %v4590_v36 }
  0xed   : > { %1252 = vmatpush1.bf16.msra.mxu0 %v4595_v38 }
  0xee   : > { %1340 = vmatprep.subr.bf16.mxu0 %v4312_v43 }
  0xef   : > { %1293 = vmatpush1.bf16.msra.mxu1 %v4598_v42 }
  0xf0   : > { %1381 = vmatprep.subr.bf16.mxu1 %v4321_v47  ;;  %v1106_v47 = vld [vmem:[%s3797_s30 + $0x10] sm:$0xff] }
 0x183   : > { %v1143_v13 = vpop.f32.mrb[0].mxu0 }
 0x184   : > { %v1191_v46 = vadd.f32 %v1143_v13, %v1104_v9  ;;  %v1145_v40 = vpop.f32.mrb[1].mxu0 }
 0x185   : > { %v1192_v41 = vadd.f32 %v1145_v40, %v1105_v39  ;;  %v1147_v36 = vpop.f32.mrb[2].mxu0  ;;  %v1184_v35 = vpop.f32.mrb[0].mxu1  ;;  %v1101_v40 = vld [vmem:[#allocation6] sm:$0xff] }
 0x186   : > { %v3079_v34 = vmul.f32 -1.442695, %v1191_v46  ;;  %v1148_v37 = vpop.f32.mrb[3].mxu0  ;;  %v1186_v33 = vpop.f32.mrb[1].mxu1  ;;  %v1193_v29 = vadd.f32 %v1184_v35, %v1106_v47  ;;  %v6174_v35 = vld [vmem:[#allocation24_spill] sm:$0xff] }
 0x187   : > { %v3080_v38 = vmul.f32 -1.442695, %v1192_v41  ;;  %v1188_v31 = vpop.f32.mrb[2].mxu1  ;;  %v1194_v43 = vadd.f32 %v1186_v33, %v1107_v32  ;;  %v6173_v33 = vld [vmem:[#allocation23_spill] sm:$0xff]  ;;  %v6175_v37 = vld [vmem:[#allocation25_spill] sm:$0xff] }
 0x188   : > { %3203 = vpow2.f32 %v3079_v34  ;;  %v1189_v42 = vpop.f32.mrb[3].mxu1 }
 0x189   : > { %3205 = vpow2.f32 %v3080_v38  ;;  %v3081_v30 = vmul.f32 -1.442695, %v1194_v43 }
 0x18b   : > { %3207 = vpow2.f32 %v3081_v30  ;;  %v6172_v30 = vmov 0  }
 0x18c   : > { %3209 = vtanh.f32 %v1193_v29 }
 0x192   : > { %v3204_v28 = vpop.eup %3203 }
 0x193   : > { %v3206_v13 = vpop.eup %3205  ;;  %v1198_v9 = vadd.f32 1.0, %v3204_v28 }
 0x194   : > { %v1204_v36 = vadd.f32 1.0, %v3206_v13  ;;  %v6176_v13 = vld [vmem:[#allocation26_spill] sm:$0xff] }
 0x195   : > { %3211 = vrcp.f32 %v1198_v9  ;;  %v3208_v46 = vpop.eup %3207  ;;  %v6177_v9 = vld [vmem:[#allocation27_spill] sm:$0xff] }
 0x196   : > { %3213 = vrcp.f32 %v1204_v36  ;;  %v3210_v39 = vpop.eup %3209  ;;  %v1211_v31 = vadd.f32 1.0, %v3208_v46  ;;  %v6178_v36 = vld [vmem:[#allocation28_spill] sm:$0xff]  ;;  %v6179_v46 = vld [vmem:[#allocation29_spill] sm:$0xff] }
 0x198   : > { %3215 = vrcp.f32 %v1211_v31  ;;  %v6183_v31 = vld [vmem:[#allocation33_spill] sm:$0xff] }
 0x19f   : > { %v3212_v41 = vpop.eup %3211 }
 0x1a0   : > { %v3214_v34 = vpop.eup %3213  ;;  %v1215_v42 = vmul.f32 %v3212_v41, %v3210_v39  ;;  %v6180_v39 = vld [vmem:[#allocation30_spill] sm:$0xff]  ;;  %v6182_v41 = vld [vmem:[#allocation32_spill] sm:$0xff] }
 0x1a1   : > { %v1214_v38 = vmul.f32 %v3214_v34, %v1101_v40  ;;  %v6181_v40 = vld [vmem:[#allocation31_spill] sm:$0xff]  ;;  %v6184_v34 = vld [vmem:[#allocation34_spill] sm:$0xff] }
 0x1a2   : > { %v3216_v43 = vpop.eup %3215 }
 0x1a3   : > { %v4608_v32 = vadd.f32 %v1215_v42, %v1214_v38  ;;  %v6185_v42 = vld [vmem:[#allocation35_spill] sm:$0xff]  ;;  %v6186_v38 = vld [vmem:[#allocation36_spill] sm:$0xff] }
 0x1a5   : > { %3217 = vtanh.f32 %v4608_v32 }
 0x1af   : > { %v3218_v47 = vpop.eup %3217 }
 0x1b0   : > { %v1218_v28 = vmul.f32 %v3218_v47, %v3216_v43  ;;  %v6187_v43 = vld [vmem:[#allocation37_spill] sm:$0xff]  ;;  %v6188_v47 = vld [vmem:[#allocation38_spill] sm:$0xff] }
 0x1b2   : > { %v1219_v29 = vpack.c.bf16 %v1218_v28, %v1218_v28  ;;  %v6189_v28 = vld [vmem:[#allocation39_spill] sm:$0xff] }
 0x1b4   : > { %1254 = vmatmul.mubr.bf16.vlgmr.msra.gmra.mrb[4].mxu0 %v1219_v29  ;;  %1295 = vmatmul.mubr.bf16.vlgmr.msra.gmra.mrb[4].mxu1 %v1219_v29 }
 0x1b5   : > { %1341 = vmatpush1.bf16.msra.mxu0 %v4314_v44  ;;  %1382 = vmatpush1.bf16.msra.mxu1 %v4328_v49 }
 0x1b6   : > { %1342 = vmatprep.subr.bf16.mxu0 %v4316_v45  ;;  %1383 = vmatprep.subr.bf16.mxu1 %v4330_v50 }
 0x1b7   : > { %1372 = vmatprep.mubr.bf16.mxu0 %v6172_v30  ;;  %1413 = vmatprep.mubr.bf16.mxu1 %v6172_v30 }
 0x1b9   : > { %1343 = vmatpush1.bf16.msra.mxu0 %v4325_v48  ;;  %1384 = vmatpush1.bf16.msra.mxu1 %v4336_v52 }
 0x1ba   : > { %1344 = vmatprep.subr.bf16.mxu0 %v4332_v51  ;;  %1385 = vmatprep.subr.bf16.mxu1 %v4339_v53 }
 0x1bd   : > { %1345 = vmatpush1.bf16.msra.mxu0 %v4342_v54  ;;  %1386 = vmatpush1.bf16.msra.mxu1 %v4348_v56 }
 0x1be   : > { %1346 = vmatprep.subr.bf16.mxu0 %v4344_v55  ;;  %1387 = vmatprep.subr.bf16.mxu1 %v4351_v57 }
 0x1c1   : > { %1347 = vmatpush1.bf16.msra.mxu0 %v4354_v58  ;;  %1388 = vmatpush1.bf16.msra.mxu1 %v4360_v60 }
 0x1c2   : > { %1348 = vmatprep.subr.bf16.mxu0 %v4356_v59  ;;  %1389 = vmatprep.subr.bf16.mxu1 %v4363_v61 }
 0x1c5   : > { %1349 = vmatpush1.bf16.msra.mxu0 %v4366_v62  ;;  %1390 = vmatpush1.bf16.msra.mxu1 %v4372_v0 }
 0x1c6   : > { %1350 = vmatprep.subr.bf16.mxu0 %v4368_v63  ;;  %1391 = vmatprep.subr.bf16.mxu1 %v4375_v1 }
 0x1c9   : > { %1351 = vmatpush1.bf16.msra.mxu0 %v4378_v2  ;;  %1392 = vmatpush1.bf16.msra.mxu1 %v4384_v4 }
 0x1ca   : > { %1352 = vmatprep.subr.bf16.mxu0 %v4380_v3  ;;  %1393 = vmatprep.subr.bf16.mxu1 %v4387_v5 }
 0x1cd   : > { %1353 = vmatpush1.bf16.msra.mxu0 %v4390_v6  ;;  %1394 = vmatpush1.bf16.msra.mxu1 %v4396_v8 }
 0x1ce   : > { %1354 = vmatprep.subr.bf16.mxu0 %v4392_v7  ;;  %1395 = vmatprep.subr.bf16.mxu1 %v4399_v10 }
 0x1d1   : > { %1355 = vmatpush1.bf16.msra.mxu0 %v4402_v11  ;;  %1396 = vmatpush1.bf16.msra.mxu1 %v4408_v14 }
 0x1d2   : > { %1452 = vmatprep.subr.bf16.mxu0 %v4405_v12  ;;  %1493 = vmatprep.subr.bf16.mxu1 %v4411_v15 }
 0x1d4   : > { %1373 = vmatmul.mubr.bf16.vlgmr.msra.gmra.mrb[8].mxu0 %v1219_v29  ;;  %1414 = vmatmul.mubr.bf16.vlgmr.msra.gmra.mrb[8].mxu1 %v1219_v29  ;;  %v6190_v29 = vld [vmem:[#allocation40_spill] sm:$0xff] }
 0x1d5   : > { %1453 = vmatpush1.bf16.msra.mxu0 %v4414_v16  ;;  %1494 = vmatpush1.bf16.msra.mxu1 %v4420_v18 }
 0x1d6   : > { %1454 = vmatprep.subr.bf16.mxu0 %v4417_v17  ;;  %1495 = vmatprep.subr.bf16.mxu1 %v4423_v19 }
 0x1d9   : > { %1455 = vmatpush1.bf16.msra.mxu0 %v4426_v20  ;;  %1496 = vmatpush1.bf16.msra.mxu1 %v4432_v22 }
 0x1da   : > { %1456 = vmatprep.subr.bf16.mxu0 %v4429_v21  ;;  %1497 = vmatprep.subr.bf16.mxu1 %v4435_v23 }
 0x1dd   : > { %1457 = vmatpush1.bf16.msra.mxu0 %v4438_v24  ;;  %1498 = vmatpush1.bf16.msra.mxu1 %v4444_v26 }
 0x1de   : > { %1458 = vmatprep.subr.bf16.mxu0 %v4441_v25  ;;  %1499 = vmatprep.subr.bf16.mxu1 %v4447_v27 }
 0x1e1   : > { %1459 = vmatpush1.bf16.msra.mxu0 %v6173_v33  ;;  %1500 = vmatpush1.bf16.msra.mxu1 %v6174_v35 }
 0x1e2   : > { %1460 = vmatprep.subr.bf16.mxu0 %v6175_v37  ;;  %1501 = vmatprep.subr.bf16.mxu1 %v6176_v13 }
 0x1e5   : > { %1461 = vmatpush1.bf16.msra.mxu0 %v6177_v9  ;;  %1502 = vmatpush1.bf16.msra.mxu1 %v6178_v36 }
 0x1e6   : > { %1462 = vmatprep.subr.bf16.mxu0 %v6179_v46  ;;  %1503 = vmatprep.subr.bf16.mxu1 %v6180_v39  ;;  %v6191_v39 = vld [vmem:[#allocation41_spill] sm:$0xff] }
 0x1e9   : > { %1463 = vmatpush1.bf16.msra.mxu0 %v6181_v40  ;;  %1504 = vmatpush1.bf16.msra.mxu1 %v6182_v41  ;;  %v6192_v40 = vld [vmem:[#allocation42_spill] sm:$0xff]  ;;  %v6193_v41 = vld [vmem:[#allocation43_spill] sm:$0xff] }
 0x1ea   : > { %1464 = vmatprep.subr.bf16.mxu0 %v6183_v31  ;;  %1505 = vmatprep.subr.bf16.mxu1 %v6184_v34  ;;  %v6194_v31 = vld [vmem:[#allocation44_spill] sm:$0xff]  ;;  %v6195_v34 = vld [vmem:[#allocation45_spill] sm:$0xff] }
 0x1ed   : > { %1465 = vmatpush1.bf16.msra.mxu0 %v6185_v42  ;;  %1506 = vmatpush1.bf16.msra.mxu1 %v6186_v38  ;;  %v6196_v42 = vld [vmem:[#allocation46_spill] sm:$0xff]  ;;  %v6197_v38 = vld [vmem:[#allocation47_spill] sm:$0xff] }
 0x1ee   : > { %1466 = vmatprep.subr.bf16.mxu0 %v6187_v43  ;;  %1507 = vmatprep.subr.bf16.mxu1 %v6188_v47  ;;  %v6198_v43 = vld [vmem:[#allocation48_spill] sm:$0xff]  ;;  %v6199_v47 = vld [vmem:[#allocation49_spill] sm:$0xff] }
 0x1f1   : > { %1467 = vmatpush1.bf16.msra.mxu0 %v6189_v28  ;;  %1508 = vmatpush1.bf16.msra.mxu1 %v6190_v29  ;;  %v6200_v28 = vld [vmem:[#allocation50_spill] sm:$0xff]  ;;  %v6201_v29 = vld [vmem:[#allocation51_spill] sm:$0xff] }
 0x1f2   : > { %1468 = vmatprep.subr.bf16.mxu0 %v6191_v39  ;;  %1509 = vmatprep.subr.bf16.mxu1 %v6192_v40  ;;  %v6202_v39 = vld [vmem:[#allocation52_spill] sm:$0xff]  ;;  %v6203_v40 = vld [vmem:[#allocation53_spill] sm:$0xff] }
 0x1f5   : > { %1469 = vmatpush1.bf16.msra.mxu0 %v6193_v41  ;;  %1510 = vmatpush1.bf16.msra.mxu1 %v6194_v31  ;;  %v6204_v41 = vld [vmem:[#allocation54_spill] sm:$0xff]  ;;  %v6205_v31 = vld [vmem:[#allocation55_spill] sm:$0xff] }
 0x1f6   : > { %1470 = vmatprep.subr.bf16.mxu0 %v6195_v34  ;;  %1511 = vmatprep.subr.bf16.mxu1 %v6196_v42  ;;  %v6206_v34 = vld [vmem:[#allocation56_spill] sm:$0xff]  ;;  %v6207_v42 = vld [vmem:[#allocation57_spill] sm:$0xff] }
 0x1f9   : > { %1471 = vmatpush1.bf16.msra.mxu0 %v6197_v38  ;;  %1512 = vmatpush1.bf16.msra.mxu1 %v6198_v43  ;;  %v6208_v38 = vld [vmem:[#allocation58_spill] sm:$0xff]  ;;  %v6209_v43 = vld [vmem:[#allocation59_spill] sm:$0xff] }
 0x1fa   : > { %1472 = vmatprep.subr.bf16.mxu0 %v6199_v47  ;;  %1513 = vmatprep.subr.bf16.mxu1 %v6200_v28  ;;  %v6210_v47 = vld [vmem:[#allocation60_spill] sm:$0xff]  ;;  %v6211_v28 = vld [vmem:[#allocation61_spill] sm:$0xff] }
 0x1fd   : > { %1473 = vmatpush1.bf16.msra.mxu0 %v6201_v29  ;;  %1514 = vmatpush1.bf16.msra.mxu1 %v6202_v39  ;;  %v6212_v29 = vld [vmem:[#allocation62_spill] sm:$0xff]  ;;  %v6213_v39 = vld [vmem:[#allocation63_spill] sm:$0xff] }
 0x1fe   : > { %1474 = vmatprep.subr.bf16.mxu0 %v6203_v40  ;;  %1515 = vmatprep.subr.bf16.mxu1 %v6204_v41  ;;  %v6214_v40 = vld [vmem:[#allocation64_spill] sm:$0xff]  ;;  %v6215_v41 = vld [vmem:[#allocation65_spill] sm:$0xff] }
 0x201   : > { %1475 = vmatpush1.bf16.msra.mxu0 %v6205_v31  ;;  %1516 = vmatpush1.bf16.msra.mxu1 %v6206_v34  ;;  %v6216_v31 = vld [vmem:[#allocation66_spill] sm:$0xff]  ;;  %v6217_v34 = vld [vmem:[#allocation67_spill] sm:$0xff] }
 0x202   : > { %1476 = vmatprep.subr.bf16.mxu0 %v6207_v42  ;;  %1517 = vmatprep.subr.bf16.mxu1 %v6208_v38  ;;  %v6218_v42 = vld [vmem:[#allocation68_spill] sm:$0xff]  ;;  %v6219_v38 = vld [vmem:[#allocation69_spill] sm:$0xff] }
 0x205   : > { %1477 = vmatpush1.bf16.msra.mxu0 %v6209_v43  ;;  %1518 = vmatpush1.bf16.msra.mxu1 %v6210_v47  ;;  %v6220_v43 = vld [vmem:[#allocation70_spill] sm:$0xff]  ;;  %v6221_v47 = vld [vmem:[#allocation71_spill] sm:$0xff] }
 0x206   : > { %1478 = vmatprep.subr.bf16.mxu0 %v6211_v28  ;;  %1519 = vmatprep.subr.bf16.mxu1 %v6212_v29  ;;  %v6222_v28 = vld [vmem:[#allocation72_spill] sm:$0xff] }
 0x207   : > { %v6223_v29 = vld [vmem:[#allocation16_spill] sm:$0xff] }
 0x209   : > { %1479 = vmatpush1.bf16.msra.mxu0 %v6213_v39  ;;  %1520 = vmatpush1.bf16.msra.mxu1 %v6214_v40  ;;  %v6224_v39 = vld [vmem:[#allocation17_spill] sm:$0xff] }
 0x20a   : > { %1480 = vmatprep.subr.bf16.mxu0 %v6215_v41  ;;  %1521 = vmatprep.subr.bf16.mxu1 %v6216_v31 }
 0x20d   : > { %1481 = vmatpush1.bf16.msra.mxu0 %v6217_v34  ;;  %1522 = vmatpush1.bf16.msra.mxu1 %v6218_v42 }
 0x20e   : > { %1482 = vmatprep.subr.bf16.mxu0 %v6219_v38  ;;  %1523 = vmatprep.subr.bf16.mxu1 %v6220_v43 }
 0x211   : > { %1483 = vmatpush1.bf16.msra.mxu0 %v6221_v47  ;;  %1524 = vmatpush1.bf16.msra.mxu1 %v6222_v28 }
 0x212   : > { %1571 = vmatprep.subr.bf16.mxu0 %v6223_v29  ;;  %1612 = vmatprep.subr.bf16.mxu1 %v6224_v39 }
 0x287   : > { %v1255_v40 = vpop.f32.mrb[4].mxu0  ;;  %v1296_v41 = vpop.f32.mrb[4].mxu1 }
 0x288   : > { %v3082_v46 = vmul.f32 -1.442695, %v1255_v40  ;;  %v1257_v31 = vpop.f32.mrb[5].mxu0  ;;  %v1298_v36 = vpop.f32.mrb[5].mxu1 }
 0x289   : > { %v3083_v34 = vmul.f32 -1.442695, %v1257_v31  ;;  %v1259_v9 = vpop.f32.mrb[6].mxu0  ;;  %v1300_v42 = vpop.f32.mrb[6].mxu1  ;;  %v3084_v43 = vmul.f32 -1.442695, %v1298_v36 }
 0x28a   : > { %3219 = vpow2.f32 %v3082_v46  ;;  %v1260_v38 = vpop.f32.mrb[7].mxu0  ;;  %v1301_v13 = vpop.f32.mrb[7].mxu1  ;;  %v1103_v31 = vld [vmem:[#allocation8] sm:$0xff]  ;;  %v3085_v36 = vld [vmem:[%s3797_s30 + $0x20] sm:$0xff] }
 0x28b   : > { %3221 = vpow2.f32 %v3083_v34 }
 0x28c   : > { %3223 = vpow2.f32 %v3084_v43 }
 0x28d   : > { %3225 = vtanh.f32 %v1296_v41 }
 0x294   : > { %v3220_v47 = vpop.eup %3219 }
 0x295   : > { %v3222_v37 = vpop.eup %3221  ;;  %v1306_v28 = vadd.f32 1.0, %v3220_v47  ;;  %v3086_v47 = vld [vmem:[%s3797_s30 + $0x28] sm:$0xff] }
 0x296   : > { %v1312_v39 = vadd.f32 1.0, %v3222_v37  ;;  %v3224_v40 = vpop.eup %3223 }
 0x297   : > { %3227 = vrcp.f32 %v1306_v28  ;;  %v3226_v29 = vpop.eup %3225  ;;  %v1319_v38 = vadd.f32 1.0, %v3224_v40 }
 0x298   : > { %3229 = vrcp.f32 %v1312_v39 }
 0x299   : > { %3231 = vrcp.f32 %v1319_v38 }
 0x2a1   : > { %v3228_v9 = vpop.eup %3227 }
 0x2a2   : > { %v3230_v42 = vpop.eup %3229  ;;  %v1323_v46 = vmul.f32 %v3228_v9, %v3226_v29 }
 0x2a3   : > { %v1322_v13 = vmul.f32 %v3230_v42, %v1103_v31  ;;  %v3088_v42 = vld [vmem:[%s3797_s30 + $0x38] sm:$0xff]  ;;  %v3232_v38 = vpop.eup %3231 }
 0x2a5   : > { %v4709_v34 = vadd.f32 %v1323_v46, %v1322_v13 }
 0x2a7   : > { %6225 = vst [vmem:[#allocation16_spill] sm:$0xff] %v4709_v34  ;;  %3233 = vtanh.f32 %v4709_v34  ;;  %v1374_v41 = vpop.f32.mrb[8].mxu0  ;;  %v1415_v37 = vpop.f32.mrb[8].mxu1  ;;  %v3087_v34 = vld [vmem:[%s3797_s30 + $0x30] sm:$0xff] }
 0x2a8   : > { %v1422_v43 = vadd.f32 %v3085_v36, %v1374_v41  ;;  %v1376_v28 = vpop.f32.mrb[9].mxu0  ;;  %v1417_v39 = vpop.f32.mrb[9].mxu1  ;;  %v1424_v36 = vadd.f32 %v3087_v34, %v1415_v37 }
 0x2a9   : > { %v1423_v35 = vadd.f32 %v3086_v47, %v1376_v28  ;;  %v1378_v33 = vpop.f32.mrb[10].mxu0  ;;  %v1419_v27 = vpop.f32.mrb[10].mxu1  ;;  %v1425_v46 = vadd.f32 %v3088_v42, %v1417_v39 }
 0x2aa   : > { %v3089_v29 = vmul.f32 -1.442695, %v1422_v43  ;;  %v1379_v40 = vpop.f32.mrb[11].mxu0  ;;  %v1420_v31 = vpop.f32.mrb[11].mxu1 }
 0x2ab   : > { %v3090_v9 = vmul.f32 -1.442695, %v1423_v35  ;;  %v3091_v26 = vmul.f32 -1.442695, %v1425_v46 }
 0x2ac   : > { %3235 = vpow2.f32 %v3089_v29 }
 0x2ad   : > { %3237 = vpow2.f32 %v3090_v9 }
 0x2ae   : > { %3239 = vpow2.f32 %v3091_v26 }
 0x2af   : > { %3241 = vtanh.f32 %v1424_v36  ;;  %v6266_v36 = vld [vmem:[#allocation58_spill] sm:$0xff] }
 0x2b1   : > { %v3234_v13 = vpop.eup %3233 }
 0x2b2   : > { %v1326_v25 = vmul.f32 %v3234_v13, %v3232_v38 }
 0x2b4   : > { %v1327_v41 = vrot.slane %v1326_v25, 4  ;;  %v1451_v24 = vpack.c.bf16 %v1326_v25, %v1326_v25 }
 0x2b6   : > { %v3236_v23 = vpop.eup %3235  ;;  %v1328_v47 = vadd.f32 %v1327_v41, %v1326_v25  ;;  %1484 = vmatprep.mubr.bf16.mxu0 %v1451_v24  ;;  %1525 = vmatprep.mubr.bf16.mxu1 %v1451_v24  ;;  %v6267_v41 = vld [vmem:[#allocation59_spill] sm:$0xff] }
 0x2b7   : > { %v3238_v27 = vpop.eup %3237  ;;  %v1429_v33 = vadd.f32 1.0, %v3236_v23 }
 0x2b8   : > { %v1435_v35 = vadd.f32 1.0, %v3238_v27  ;;  %v1329_v43 = vrot.slane %v1328_v47, 2  ;;  %v3240_v34 = vpop.eup %3239  ;;  %v6269_v27 = vld [vmem:[#allocation61_spill] sm:$0xff] }
 0x2b9   : > { %3243 = vrcp.f32 %v1429_v33  ;;  %v3242_v37 = vpop.eup %3241  ;;  %v1442_v42 = vadd.f32 1.0, %v3240_v34  ;;  %v6270_v33 = vld [vmem:[#allocation62_spill] sm:$0xff]  ;;  %v6277_v34 = vld [vmem:[#allocation69_spill] sm:$0xff] }
 0x2ba   : > { %3245 = vrcp.f32 %v1435_v35  ;;  %v1330_v28 = vadd.f32 %v1329_v43, %v1328_v47  ;;  %v6268_v47 = vld [vmem:[#allocation60_spill] sm:$0xff]  ;;  %v6271_v35 = vld [vmem:[#allocation63_spill] sm:$0xff] }
 0x2bb   : > { %3247 = vrcp.f32 %v1442_v42  ;;  %v6272_v43 = vld [vmem:[#allocation64_spill] sm:$0xff]  ;;  %v4820_v42 = vld [vmem:[#allocation2 + $0x18] sm:$0xff] }
 0x2bc   : > { %v1331_v39 = vrot.slane %v1330_v28, 1 }
 0x2be   : > { %v1332_v29 = vadd.f32 %v1331_v39, %v1330_v28  ;;  %v6273_v28 = vld [vmem:[#allocation65_spill] sm:$0xff]  ;;  %v6274_v39 = vld [vmem:[#allocation66_spill] sm:$0xff] }
 0x2c0   : > { %v1333_v40 = vmul.f32 0.5, %v1332_v29  ;;  %v6275_v29 = vld [vmem:[#allocation67_spill] sm:$0xff] }
 0x2c2   : > { %1334 = vst [vmem:[%s3799_s4] sm:$0x1] %v1333_v40  ;;  %v6276_v40 = vld [vmem:[#allocation68_spill] sm:$0xff] }
 0x2c3   : > { %v3244_v31 = vpop.eup %3243 }
 0x2c4   : > { %v3246_v25 = vpop.eup %3245  ;;  %v1446_v9 = vmul.f32 %v3244_v31, %v3242_v37  ;;  %v6278_v37 = vld [vmem:[#allocation70_spill] sm:$0xff]  ;;  %v6279_v31 = vld [vmem:[#allocation71_spill] sm:$0xff] }
 0x2c5   : > { %v1445_v24 = vmul.f32 %v3246_v25, %v4608_v32  ;;  %v3248_v26 = vpop.eup %3247  ;;  %v6265_v32 = vld [vmem:[#allocation57_spill] sm:$0xff]  ;;  %v6280_v25 = vld [vmem:[#allocation72_spill] sm:$0xff] }
 0x2c7   : > { %v4718_v23 = vadd.f32 %v1446_v9, %v1445_v24  ;;  %v4817_v9 = vld [vmem:[#allocation2 + $0x8] sm:$0xff] }
 0x2c8   : > { %6281 = vst [vmem:[#allocation17_spill] sm:$0xff] %v4817_v9 }
 0x2c9   : > { %3249 = vtanh.f32 %v4718_v23 }
 0x2d3   : > { %v3250_v46 = vpop.eup %3249 }
 0x2d4   : > { %v1449_v38 = vmul.f32 %v3250_v46, %v3248_v26 }
 0x2d6   : > { %v1450_v13 = vpack.c.bf16 %v1449_v38, %v1449_v38 }
 0x2d8   : > { %1485 = vmatmul.mubr.bf16.vlgmr.msra.gmra.mrb[12].mxu0 %v1450_v13  ;;  %1526 = vmatmul.mubr.bf16.vlgmr.msra.gmra.mrb[12].mxu1 %v1450_v13 }
 0x2d9   : > { %1572 = vmatpush1.bf16.msra.mxu0 %v4314_v44  ;;  %1613 = vmatpush1.bf16.msra.mxu1 %v4328_v49  ;;  %v6226_v44 = vld [vmem:[#allocation18_spill] sm:$0xff]  ;;  %v6229_v49 = vld [vmem:[#allocation20_spill] sm:$0xff] }
 0x2da   : > { %1573 = vmatprep.subr.bf16.mxu0 %v4316_v45  ;;  %1614 = vmatprep.subr.bf16.mxu1 %v4330_v50  ;;  %v6227_v45 = vld [vmem:[#allocation19_spill] sm:$0xff]  ;;  %v6230_v50 = vld [vmem:[#allocation22_spill] sm:$0xff]  ;;  %6282 = vst [vmem:[#allocation18_spill] sm:$0xff] %v4820_v42 }
 0x2db   : > { %1603 = vmatprep.mubr.bf16.mxu0 %v6172_v30  ;;  %1644 = vmatprep.mubr.bf16.mxu1 %v6172_v30 }
 0x2dd   : > { %1574 = vmatpush1.bf16.msra.mxu0 %v4325_v48  ;;  %1615 = vmatpush1.bf16.msra.mxu1 %v4336_v52  ;;  %v6228_v48 = vld [vmem:[#allocation21_spill] sm:$0xff]  ;;  %v6232_v52 = vld [vmem:[#allocation24_spill] sm:$0xff] }
 0x2de   : > { %1575 = vmatprep.subr.bf16.mxu0 %v4332_v51  ;;  %1616 = vmatprep.subr.bf16.mxu1 %v4339_v53  ;;  %v6231_v51 = vld [vmem:[#allocation23_spill] sm:$0xff]  ;;  %v6233_v53 = vld [vmem:[#allocation25_spill] sm:$0xff] }
 0x2e1   : > { %1576 = vmatpush1.bf16.msra.mxu0 %v4342_v54  ;;  %1617 = vmatpush1.bf16.msra.mxu1 %v4348_v56  ;;  %v6234_v54 = vld [vmem:[#allocation26_spill] sm:$0xff]  ;;  %v6236_v56 = vld [vmem:[#allocation28_spill] sm:$0xff] }
 0x2e2   : > { %1577 = vmatprep.subr.bf16.mxu0 %v4344_v55  ;;  %1618 = vmatprep.subr.bf16.mxu1 %v4351_v57  ;;  %v6235_v55 = vld [vmem:[#allocation27_spill] sm:$0xff]  ;;  %v6237_v57 = vld [vmem:[#allocation29_spill] sm:$0xff] }
 0x2e5   : > { %1578 = vmatpush1.bf16.msra.mxu0 %v4354_v58  ;;  %1619 = vmatpush1.bf16.msra.mxu1 %v4360_v60  ;;  %v6238_v58 = vld [vmem:[#allocation30_spill] sm:$0xff]  ;;  %v6240_v60 = vld [vmem:[#allocation32_spill] sm:$0xff] }
 0x2e6   : > { %1579 = vmatprep.subr.bf16.mxu0 %v4356_v59  ;;  %1620 = vmatprep.subr.bf16.mxu1 %v4363_v61  ;;  %v6239_v59 = vld [vmem:[#allocation31_spill] sm:$0xff]  ;;  %v6241_v61 = vld [vmem:[#allocation33_spill] sm:$0xff] }
 0x2e9   : > { %1580 = vmatpush1.bf16.msra.mxu0 %v4366_v62  ;;  %1621 = vmatpush1.bf16.msra.mxu1 %v4372_v0  ;;  %v6242_v62 = vld [vmem:[#allocation34_spill] sm:$0xff]  ;;  %v6244_v0 = vld [vmem:[#allocation36_spill] sm:$0xff] }
 0x2ea   : > { %1581 = vmatprep.subr.bf16.mxu0 %v4368_v63  ;;  %1622 = vmatprep.subr.bf16.mxu1 %v4375_v1  ;;  %v6243_v63 = vld [vmem:[#allocation35_spill] sm:$0xff]  ;;  %v6245_v1 = vld [vmem:[#allocation37_spill] sm:$0xff] }
 0x2ed   : > { %1582 = vmatpush1.bf16.msra.mxu0 %v4378_v2  ;;  %1623 = vmatpush1.bf16.msra.mxu1 %v4384_v4  ;;  %v6246_v2 = vld [vmem:[#allocation38_spill] sm:$0xff]  ;;  %v6248_v4 = vld [vmem:[#allocation40_spill] sm:$0xff] }
 0x2ee   : > { %1583 = vmatprep.subr.bf16.mxu0 %v4380_v3  ;;  %1624 = vmatprep.subr.bf16.mxu1 %v4387_v5  ;;  %v6247_v3 = vld [vmem:[#allocation39_spill] sm:$0xff]  ;;  %v6249_v5 = vld [vmem:[#allocation41_spill] sm:$0xff] }
 0x2f1   : > { %1584 = vmatpush1.bf16.msra.mxu0 %v4390_v6  ;;  %1625 = vmatpush1.bf16.msra.mxu1 %v4396_v8  ;;  %v6250_v6 = vld [vmem:[#allocation42_spill] sm:$0xff]  ;;  %v6252_v8 = vld [vmem:[#allocation44_spill] sm:$0xff] }
 0x2f2   : > { %1585 = vmatprep.subr.bf16.mxu0 %v4392_v7  ;;  %1626 = vmatprep.subr.bf16.mxu1 %v4399_v10  ;;  %v6251_v7 = vld [vmem:[#allocation43_spill] sm:$0xff]  ;;  %v6253_v10 = vld [vmem:[#allocation45_spill] sm:$0xff] }
 0x2f5   : > { %1586 = vmatpush1.bf16.msra.mxu0 %v4402_v11  ;;  %1627 = vmatpush1.bf16.msra.mxu1 %v4408_v14  ;;  %v6254_v11 = vld [vmem:[#allocation46_spill] sm:$0xff]  ;;  %v6256_v14 = vld [vmem:[#allocation48_spill] sm:$0xff] }
 0x2f6   : > { %1683 = vmatprep.subr.bf16.mxu0 %v4405_v12  ;;  %1724 = vmatprep.subr.bf16.mxu1 %v4411_v15  ;;  %v6255_v12 = vld [vmem:[#allocation47_spill] sm:$0xff]  ;;  %v6257_v15 = vld [vmem:[#allocation49_spill] sm:$0xff] }
 0x2f8   : > { %1604 = vmatmul.mubr.bf16.vlgmr.msra.gmra.mrb[16].mxu0 %v1450_v13  ;;  %1645 = vmatmul.mubr.bf16.vlgmr.msra.gmra.mrb[16].mxu1 %v1450_v13 }
 0x2f9   : > { %1684 = vmatpush1.bf16.msra.mxu0 %v4414_v16  ;;  %1725 = vmatpush1.bf16.msra.mxu1 %v4420_v18  ;;  %v6258_v16 = vld [vmem:[#allocation50_spill] sm:$0xff]  ;;  %v6260_v18 = vld [vmem:[#allocation52_spill] sm:$0xff] }
 0x2fa   : > { %1685 = vmatprep.subr.bf16.mxu0 %v4417_v17  ;;  %1726 = vmatprep.subr.bf16.mxu1 %v4423_v19  ;;  %v6259_v17 = vld [vmem:[#allocation51_spill] sm:$0xff]  ;;  %v6261_v19 = vld [vmem:[#allocation53_spill] sm:$0xff] }
 0x2fd   : > { %1686 = vmatpush1.bf16.msra.mxu0 %v4426_v20  ;;  %1727 = vmatpush1.bf16.msra.mxu1 %v4432_v22  ;;  %v6262_v20 = vld [vmem:[#allocation54_spill] sm:$0xff]  ;;  %v6264_v22 = vld [vmem:[#allocation56_spill] sm:$0xff] }
 0x2fe   : > { %1687 = vmatprep.subr.bf16.mxu0 %v4429_v21  ;;  %1728 = vmatprep.subr.bf16.mxu1 %v6226_v44  ;;  %v6263_v21 = vld [vmem:[#allocation55_spill] sm:$0xff] }
 0x301   : > { %1688 = vmatpush1.bf16.msra.mxu0 %v6227_v45  ;;  %1729 = vmatpush1.bf16.msra.mxu1 %v6228_v48 }
 0x302   : > { %1689 = vmatprep.subr.bf16.mxu0 %v6229_v49  ;;  %1730 = vmatprep.subr.bf16.mxu1 %v6230_v50 }
 0x305   : > { %1690 = vmatpush1.bf16.msra.mxu0 %v6231_v51  ;;  %1731 = vmatpush1.bf16.msra.mxu1 %v6232_v52 }
 0x306   : > { %1691 = vmatprep.subr.bf16.mxu0 %v6233_v53  ;;  %1732 = vmatprep.subr.bf16.mxu1 %v6234_v54 }
 0x309   : > { %1692 = vmatpush1.bf16.msra.mxu0 %v6235_v55  ;;  %1733 = vmatpush1.bf16.msra.mxu1 %v6236_v56 }
 0x30a   : > { %1693 = vmatprep.subr.bf16.mxu0 %v6237_v57  ;;  %1734 = vmatprep.subr.bf16.mxu1 %v6238_v58 }
 0x30d   : > { %1694 = vmatpush1.bf16.msra.mxu0 %v6239_v59  ;;  %1735 = vmatpush1.bf16.msra.mxu1 %v6240_v60 }
 0x30e   : > { %1695 = vmatprep.subr.bf16.mxu0 %v6241_v61  ;;  %1736 = vmatprep.subr.bf16.mxu1 %v6242_v62  ;;  %v6283_v62 = vld [vmem:[#allocation16_spill] sm:$0xff] }
 0x311   : > { %1696 = vmatpush1.bf16.msra.mxu0 %v6243_v63  ;;  %1737 = vmatpush1.bf16.msra.mxu1 %v6244_v0 }
 0x312   : > { %1697 = vmatprep.subr.bf16.mxu0 %v6245_v1  ;;  %1738 = vmatprep.subr.bf16.mxu1 %v6246_v2  ;;  %v3095_v1 = vld [vmem:[%s3797_s30 + $0x40] sm:$0xff]  ;;  %v3096_v2 = vld [vmem:[%s3797_s30 + $0x48] sm:$0xff] }
 0x315   : > { %1698 = vmatpush1.bf16.msra.mxu0 %v6247_v3  ;;  %1739 = vmatpush1.bf16.msra.mxu1 %v6248_v4 }
 0x316   : > { %1699 = vmatprep.subr.bf16.mxu0 %v6249_v5  ;;  %1740 = vmatprep.subr.bf16.mxu1 %v6250_v6 }
 0x319   : > { %1700 = vmatpush1.bf16.msra.mxu0 %v6251_v7  ;;  %1741 = vmatpush1.bf16.msra.mxu1 %v6252_v8 }
 0x31a   : > { %1701 = vmatprep.subr.bf16.mxu0 %v6253_v10  ;;  %1742 = vmatprep.subr.bf16.mxu1 %v6254_v11 }
 0x31d   : > { %1702 = vmatpush1.bf16.msra.mxu0 %v6255_v12  ;;  %1743 = vmatpush1.bf16.msra.mxu1 %v6256_v14 }
 0x31e   : > { %1703 = vmatprep.subr.bf16.mxu0 %v6257_v15  ;;  %1744 = vmatprep.subr.bf16.mxu1 %v6258_v16 }
 0x321   : > { %1704 = vmatpush1.bf16.msra.mxu0 %v6259_v17  ;;  %1745 = vmatpush1.bf16.msra.mxu1 %v6260_v18  ;;  %v3098_v17 = vld [vmem:[%s3797_s30 + $0x58] sm:$0xff] }
 0x322   : > { %1705 = vmatprep.subr.bf16.mxu0 %v6261_v19  ;;  %1746 = vmatprep.subr.bf16.mxu1 %v6262_v20 }
 0x325   : > { %1706 = vmatpush1.bf16.msra.mxu0 %v6263_v21  ;;  %1747 = vmatpush1.bf16.msra.mxu1 %v6264_v22  ;;  %v3097_v21 = vld [vmem:[%s3797_s30 + $0x50] sm:$0xff] }
 0x326   : > { %1707 = vmatprep.subr.bf16.mxu0 %v6265_v32  ;;  %1748 = vmatprep.subr.bf16.mxu1 %v6266_v36 }
 0x329   : > { %1708 = vmatpush1.bf16.msra.mxu0 %v6267_v41  ;;  %1749 = vmatpush1.bf16.msra.mxu1 %v6268_v47 }
 0x32a   : > { %1709 = vmatprep.subr.bf16.mxu0 %v6269_v27  ;;  %1750 = vmatprep.subr.bf16.mxu1 %v6270_v33 }
 0x32d   : > { %1710 = vmatpush1.bf16.msra.mxu0 %v6271_v35  ;;  %1751 = vmatpush1.bf16.msra.mxu1 %v6272_v43 }
 0x32e   : > { %1711 = vmatprep.subr.bf16.mxu0 %v6273_v28  ;;  %1752 = vmatprep.subr.bf16.mxu1 %v6274_v39 }
 0x331   : > { %1712 = vmatpush1.bf16.msra.mxu0 %v6275_v29  ;;  %1753 = vmatpush1.bf16.msra.mxu1 %v6276_v40 }
 0x332   : > { %1713 = vmatprep.subr.bf16.mxu0 %v6277_v34  ;;  %1754 = vmatprep.subr.bf16.mxu1 %v6278_v37 }
 0x335   : > { %1714 = vmatpush1.bf16.msra.mxu0 %v6279_v31  ;;  %1755 = vmatpush1.bf16.msra.mxu1 %v6280_v25 }
 0x336   : > { %1802 = vmatprep.subr.bf16.mxu0 %v4817_v9  ;;  %1843 = vmatprep.subr.bf16.mxu1 %v4820_v42 }
 0x3ab   : > { %v1486_v24 = vpop.f32.mrb[12].mxu0  ;;  %v1527_v26 = vpop.f32.mrb[12].mxu1 }
 0x3ac   : > { %v3092_v46 = vmul.f32 -1.442695, %v1486_v24  ;;  %v1488_v38 = vpop.f32.mrb[13].mxu0  ;;  %v1529_v13 = vpop.f32.mrb[13].mxu1 }
 0x3ad   : > { %v3093_v44 = vmul.f32 -1.442695, %v1488_v38  ;;  %v1490_v45 = vpop.f32.mrb[14].mxu0  ;;  %v1531_v48 = vpop.f32.mrb[14].mxu1  ;;  %v3094_v51 = vmul.f32 -1.442695, %v1529_v13 }
 0x3ae   : > { %3251 = vpow2.f32 %v3092_v46  ;;  %v1491_v49 = vpop.f32.mrb[15].mxu0  ;;  %v1532_v50 = vpop.f32.mrb[15].mxu1 }
 0x3af   : > { %3253 = vpow2.f32 %v3093_v44 }
 0x3b0   : > { %3255 = vpow2.f32 %v3094_v51  ;;  %v4840_v51 = vld [vmem:[#allocation2] sm:$0xff] }
 0x3b1   : > { %3257 = vtanh.f32 %v1527_v26 }
 0x3b8   : > { %v3252_v52 = vpop.eup %3251 }
 0x3b9   : > { %v3254_v53 = vpop.eup %3253  ;;  %v1537_v54 = vadd.f32 1.0, %v3252_v52  ;;  %v4843_v52 = vld [vmem:[#allocation2 + $0x10] sm:$0xff] }
 0x3ba   : > { %v1543_v55 = vadd.f32 1.0, %v3254_v53  ;;  %v3256_v56 = vpop.eup %3255  ;;  %v4849_v53 = vld [vmem:[#allocation2 + $0x38] sm:$0xff] }
 0x3bb   : > { %3259 = vrcp.f32 %v1537_v54  ;;  %v3258_v57 = vpop.eup %3257  ;;  %v1550_v61 = vadd.f32 1.0, %v3256_v56  ;;  %v4854_v54 = vld [vmem:[#allocation2 + $0x20] sm:$0xff]  ;;  %v4860_v56 = vld [vmem:[#allocation2 + $0x48] sm:$0xff] }
 0x3bc   : > { %3261 = vrcp.f32 %v1543_v55  ;;  %v4857_v55 = vld [vmem:[#allocation2 + $0x30] sm:$0xff] }
 0x3bd   : > { %3263 = vrcp.f32 %v1550_v61  ;;  %v4875_v61 = vld [vmem:[#allocation2 + $0x78] sm:$0xff] }
 0x3c5   : > { %v3260_v58 = vpop.eup %3259 }
 0x3c6   : > { %v3262_v59 = vpop.eup %3261  ;;  %v1554_v60 = vmul.f32 %v3260_v58, %v3258_v57  ;;  %v4863_v57 = vld [vmem:[#allocation2 + $0x58] sm:$0xff]  ;;  %v4866_v58 = vld [vmem:[#allocation2 + $0x40] sm:$0xff] }
 0x3c7   : > { %v1553_v63 = vmul.f32 %v3262_v59, %v6283_v62  ;;  %v3264_v19 = vpop.eup %3263  ;;  %v4869_v59 = vld [vmem:[#allocation2 + $0x50] sm:$0xff]  ;;  %v4878_v62 = vld [vmem:[#allocation2 + $0x60] sm:$0xff] }
 0x3c9   : > { %v4824_v0 = vadd.f32 %v1554_v60, %v1553_v63  ;;  %v4872_v60 = vld [vmem:[#allocation2 + $0x68] sm:$0xff]  ;;  %v4881_v63 = vld [vmem:[#allocation2 + $0x70] sm:$0xff] }
 0x3cb   : > { %3265 = vtanh.f32 %v4824_v0  ;;  %v1605_v3 = vpop.f32.mrb[16].mxu0  ;;  %v1646_v4 = vpop.f32.mrb[16].mxu1 }
 0x3cc   : > { %v1653_v5 = vadd.f32 %v3095_v1, %v1605_v3  ;;  %v1607_v6 = vpop.f32.mrb[17].mxu0  ;;  %v1648_v7 = vpop.f32.mrb[17].mxu1  ;;  %v1655_v36 = vadd.f32 %v3097_v21, %v1646_v4  ;;  %v4884_v1 = vld [vmem:[#allocation2 + $0x88] sm:$0xff]  ;;  %v4890_v3 = vld [vmem:[#allocation2 + $0x80] sm:$0xff]  ;;  %v4893_v4 = vld [vmem:[#allocation2 + $0x90] sm:$0xff] }
 0x3cd   : > { %v1654_v8 = vadd.f32 %v3096_v2, %v1607_v6  ;;  %v1609_v10 = vpop.f32.mrb[18].mxu0  ;;  %v1650_v11 = vpop.f32.mrb[18].mxu1  ;;  %v1656_v18 = vadd.f32 %v3098_v17, %v1648_v7  ;;  %v4887_v2 = vld [vmem:[#allocation2 + $0x98] sm:$0xff]  ;;  %v4902_v7 = vld [vmem:[#allocation2 + $0xa0] sm:$0xff] }
 0x3ce   : > { %v3099_v12 = vmul.f32 -1.442695, %v1653_v5  ;;  %v1610_v14 = vpop.f32.mrb[19].mxu0  ;;  %v1651_v15 = vpop.f32.mrb[19].mxu1  ;;  %v4896_v5 = vld [vmem:[#allocation2 + $0xa8] sm:$0xff]  ;;  %v4899_v6 = vld [vmem:[#allocation2 + $0xb8] sm:$0xff] }
 0x3cf   : > { %v3100_v16 = vmul.f32 -1.442695, %v1654_v8  ;;  %v3101_v32 = vmul.f32 -1.442695, %v1656_v18  ;;  %v4905_v8 = vld [vmem:[#allocation2 + $0xb0] sm:$0xff]  ;;  %v4908_v10 = vld [vmem:[#allocation2 + $0xc8] sm:$0xff] }
 0x3d0   : > { %3267 = vpow2.f32 %v3099_v12  ;;  %v4911_v11 = vld [vmem:[#allocation2 + $0xd8] sm:$0xff]  ;;  %v4914_v12 = vld [vmem:[#allocation2 + $0xc0] sm:$0xff]  ;;  %v4917_v14 = vld [vmem:[#allocation2 + $0xd0] sm:$0xff] }
 0x3d1   : > { %3269 = vpow2.f32 %v3100_v16  ;;  %v4920_v15 = vld [vmem:[#allocation2 + $0xe8] sm:$0xff]  ;;  %v4923_v16 = vld [vmem:[#allocation2 + $0xf8] sm:$0xff]  ;;  %v4926_v17 = vld [vmem:[#allocation2 + $0xe0] sm:$0xff] }
 0x3d2   : > { %3271 = vpow2.f32 %v3101_v32  ;;  %v4929_v18 = vld [vmem:[#allocation2 + $0xf0] sm:$0xff]  ;;  %v4940_v21 = vld [vmem:[#allocation3] sm:$0xff]  ;;  %v4946_v32 = vld [vmem:[#allocation3 + $0x28] sm:$0xff] }
 0x3d3   : > { %3273 = vtanh.f32 %v1655_v36  ;;  %v4949_v36 = vld [vmem:[#allocation3 + $0x38] sm:$0xff] }
 0x3d5   : > { %v3266_v20 = vpop.eup %3265 }
 0x3d6   : > { %v1557_v22 = vmul.f32 %v3266_v20, %v3264_v19  ;;  %v4932_v19 = vld [vmem:[#allocation3 + $0x8] sm:$0xff]  ;;  %v4935_v20 = vld [vmem:[#allocation3 + $0x18] sm:$0xff] }
 0x3d8   : > { %v1558_v41 = vrot.slane %v1557_v22, 4  ;;  %v1682_v47 = vpack.c.bf16 %v1557_v22, %v1557_v22 }
 0x3da   : > { %v3268_v27 = vpop.eup %3267  ;;  %v1559_v33 = vadd.f32 %v1558_v41, %v1557_v22  ;;  %1715 = vmatprep.mubr.bf16.mxu0 %v1682_v47  ;;  %1756 = vmatprep.mubr.bf16.mxu1 %v1682_v47  ;;  %v4943_v22 = vld [vmem:[#allocation3 + $0x10] sm:$0xff]  ;;  %v4952_v41 = vld [vmem:[#allocation3 + $0x20] sm:$0xff] }
 0x3db   : > { %v3270_v35 = vpop.eup %3269  ;;  %v1660_v43 = vadd.f32 1.0, %v3268_v27  ;;  %v4955_v47 = vld [vmem:[#allocation3 + $0x30] sm:$0xff]  ;;  %v4958_v27 = vld [vmem:[#allocation3 + $0x48] sm:$0xff] }
 0x3dc   : > { %v1666_v28 = vadd.f32 1.0, %v3270_v35  ;;  %v1560_v39 = vrot.slane %v1559_v33, 2  ;;  %v3272_v31 = vpop.eup %3271  ;;  %v4964_v35 = vld [vmem:[#allocation3 + $0x40] sm:$0xff] }
 0x3dd   : > { %3275 = vrcp.f32 %v1660_v43  ;;  %v3274_v25 = vpop.eup %3273  ;;  %v1673_v38 = vadd.f32 1.0, %v3272_v31  ;;  %6285 = vst [vmem:[#allocation21_spill] sm:$0xff] %v4964_v35  ;;  %v4967_v43 = vld [vmem:[#allocation3 + $0x50] sm:$0xff]  ;;  %v4988_v31 = vld [vmem:[#allocation3 + $0x80] sm:$0xff] }
 0x3de   : > { %3277 = vrcp.f32 %v1666_v28  ;;  %v1561_v29 = vadd.f32 %v1560_v39, %v1559_v33  ;;  %v4961_v33 = vld [vmem:[#allocation3 + $0x58] sm:$0xff]  ;;  %6286 = vst [vmem:[#allocation20_spill] sm:$0xff] %v4967_v43  ;;  %v4970_v28 = vld [vmem:[#allocation3 + $0x68] sm:$0xff]  ;;  %6293 = vst [vmem:[#allocation28_spill] sm:$0xff] %v4988_v31 }
 0x3df   : > { %3279 = vrcp.f32 %v1673_v38  ;;  %6284 = vst [vmem:[#allocation19_spill] sm:$0xff] %v4961_v33  ;;  %6287 = vst [vmem:[#allocation22_spill] sm:$0xff] %v4970_v28  ;;  %v4973_v39 = vld [vmem:[#allocation3 + $0x78] sm:$0xff]  ;;  %v5003_v38 = vld [vmem:[#allocation3 + $0xb0] sm:$0xff] }
 0x3e0   : > { %v1562_v40 = vrot.slane %v1561_v29, 1  ;;  %6288 = vst [vmem:[#allocation23_spill] sm:$0xff] %v4973_v39  ;;  %6298 = vst [vmem:[#allocation33_spill] sm:$0xff] %v5003_v38 }
 0x3e2   : > { %v1563_v34 = vadd.f32 %v1562_v40, %v1561_v29  ;;  %v4976_v29 = vld [vmem:[#allocation3 + $0x60] sm:$0xff]  ;;  %v4979_v40 = vld [vmem:[#allocation3 + $0x70] sm:$0xff] }
 0x3e3   : > { %6289 = vst [vmem:[#allocation24_spill] sm:$0xff] %v4976_v29  ;;  %6290 = vst [vmem:[#allocation25_spill] sm:$0xff] %v4979_v40 }
 0x3e4   : > { %v1564_v37 = vmul.f32 0.5, %v1563_v34  ;;  %v4982_v34 = vld [vmem:[#allocation3 + $0x88] sm:$0xff] }
 0x3e5   : > { %6291 = vst [vmem:[#allocation26_spill] sm:$0xff] %v4982_v34 }
 0x3e6   : > { %1565 = vst [vmem:[%s3799_s4 + $0x1] sm:$0x1] %v1564_v37  ;;  %v4985_v37 = vld [vmem:[#allocation3 + $0x98] sm:$0xff] }
 0x3e7   : > { %v3276_v24 = vpop.eup %3275  ;;  %6292 = vst [vmem:[#allocation27_spill] sm:$0xff] %v4985_v37 }
 0x3e8   : > { %v3278_v26 = vpop.eup %3277  ;;  %v1677_v46 = vmul.f32 %v3276_v24, %v3274_v25  ;;  %v4991_v25 = vld [vmem:[#allocation3 + $0x90] sm:$0xff]  ;;  %v4994_v24 = vld [vmem:[#allocation3 + $0xa8] sm:$0xff] }
 0x3e9   : > { %v1676_v13 = vmul.f32 %v3278_v26, %v4718_v23  ;;  %v3280_v45 = vpop.eup %3279  ;;  %v4846_v23 = vld [vmem:[#allocation2 + $0x28] sm:$0xff]  ;;  %6294 = vst [vmem:[#allocation29_spill] sm:$0xff] %v4991_v25  ;;  %6295 = vst [vmem:[#allocation30_spill] sm:$0xff] %v4994_v24  ;;  %v4997_v26 = vld [vmem:[#allocation3 + $0xb8] sm:$0xff] }
 0x3ea   : > { %6296 = vst [vmem:[#allocation31_spill] sm:$0xff] %v4997_v26 }
 0x3eb   : > { %v4833_v44 = vadd.f32 %v1677_v46, %v1676_v13  ;;  %v5000_v46 = vld [vmem:[#allocation3 + $0xa0] sm:$0xff]  ;;  %v5006_v13 = vld [vmem:[#allocation3 + $0xc8] sm:$0xff] }
 0x3ec   : > { %6297 = vst [vmem:[#allocation32_spill] sm:$0xff] %v5000_v46  ;;  %6299 = vst [vmem:[#allocation34_spill] sm:$0xff] %v5006_v13 }
 0x3ed   : > { %3281 = vtanh.f32 %v4833_v44 }
 0x3f7   : > { %v3282_v48 = vpop.eup %3281 }
 0x3f8   : > { %v1680_v49 = vmul.f32 %v3282_v48, %v3280_v45  ;;  %v5009_v45 = vld [vmem:[#allocation3 + $0xd8] sm:$0xff]  ;;  %v5012_v48 = vld [vmem:[#allocation3 + $0xc0] sm:$0xff] }
 0x3f9   : > { %6300 = vst [vmem:[#allocation35_spill] sm:$0xff] %v5009_v45  ;;  %6301 = vst [vmem:[#allocation36_spill] sm:$0xff] %v5012_v48 }
 0x3fa   : > { %v4836_v50 = vpack.c.bf16 %v1680_v49, %v1680_v49  ;;  %v5015_v49 = vld [vmem:[#allocation3 + $0xd0] sm:$0xff] }
 0x3fb   : > { %6302 = vst [vmem:[#allocation37_spill] sm:$0xff] %v5015_v49 }
 0x3fc   : > { %1716 = vmatmul.mubr.bf16.vlgmr.msra.gmra.mrb[20].mxu0 %v4836_v50  ;;  %1757 = vmatmul.mubr.bf16.vlgmr.msra.gmra.mrb[20].mxu1 %v4836_v50 }
 0x3fd   : > { %1803 = vmatpush1.bf16.msra.mxu0 %v4840_v51  ;;  %1844 = vmatpush1.bf16.msra.mxu1 %v4843_v52 }
 0x3fe   : > { %1804 = vmatprep.subr.bf16.mxu0 %v4846_v23  ;;  %1845 = vmatprep.subr.bf16.mxu1 %v4849_v53 }
 0x3ff   : > { %1834 = vmatprep.mubr.bf16.mxu0 %v6172_v30  ;;  %1875 = vmatprep.mubr.bf16.mxu1 %v6172_v30 }
 0x401   : > { %1805 = vmatpush1.bf16.msra.mxu0 %v4854_v54  ;;  %1846 = vmatpush1.bf16.msra.mxu1 %v4857_v55 }
 0x402   : > { %1806 = vmatprep.subr.bf16.mxu0 %v4860_v56  ;;  %1847 = vmatprep.subr.bf16.mxu1 %v4863_v57 }
 0x405   : > { %1807 = vmatpush1.bf16.msra.mxu0 %v4866_v58  ;;  %1848 = vmatpush1.bf16.msra.mxu1 %v4869_v59 }
 0x406   : > { %1808 = vmatprep.subr.bf16.mxu0 %v4872_v60  ;;  %1849 = vmatprep.subr.bf16.mxu1 %v4875_v61 }
 0x409   : > { %1809 = vmatpush1.bf16.msra.mxu0 %v4878_v62  ;;  %1850 = vmatpush1.bf16.msra.mxu1 %v4881_v63 }
 0x40a   : > { %1810 = vmatprep.subr.bf16.mxu0 %v4884_v1  ;;  %1851 = vmatprep.subr.bf16.mxu1 %v4887_v2 }
 0x40d   : > { %1811 = vmatpush1.bf16.msra.mxu0 %v4890_v3  ;;  %1852 = vmatpush1.bf16.msra.mxu1 %v4893_v4 }
 0x40e   : > { %1812 = vmatprep.subr.bf16.mxu0 %v4896_v5  ;;  %1853 = vmatprep.subr.bf16.mxu1 %v4899_v6 }
 0x411   : > { %1813 = vmatpush1.bf16.msra.mxu0 %v4902_v7  ;;  %1854 = vmatpush1.bf16.msra.mxu1 %v4905_v8 }
 0x412   : > { %1814 = vmatprep.subr.bf16.mxu0 %v4908_v10  ;;  %1855 = vmatprep.subr.bf16.mxu1 %v4911_v11 }
 0x415   : > { %1815 = vmatpush1.bf16.msra.mxu0 %v4914_v12  ;;  %1856 = vmatpush1.bf16.msra.mxu1 %v4917_v14 }
 0x416   : > { %1816 = vmatprep.subr.bf16.mxu0 %v4920_v15  ;;  %1857 = vmatprep.subr.bf16.mxu1 %v4923_v16 }
 0x419   : > { %1817 = vmatpush1.bf16.msra.mxu0 %v4926_v17  ;;  %1858 = vmatpush1.bf16.msra.mxu1 %v4929_v18 }
 0x41a   : > { %1914 = vmatprep.subr.bf16.mxu0 %v4932_v19  ;;  %1955 = vmatprep.subr.bf16.mxu1 %v4935_v20 }
 0x41c   : > { %1835 = vmatmul.mubr.bf16.vlgmr.msra.gmra.mrb[24].mxu0 %v4836_v50  ;;  %1876 = vmatmul.mubr.bf16.vlgmr.msra.gmra.mrb[24].mxu1 %v4836_v50  ;;  %v5018_v50 = vld [vmem:[#allocation3 + $0xe8] sm:$0xff] }
 0x41d   : > { %1915 = vmatpush1.bf16.msra.mxu0 %v4940_v21  ;;  %1956 = vmatpush1.bf16.msra.mxu1 %v4943_v22  ;;  %6303 = vst [vmem:[#allocation38_spill] sm:$0xff] %v5018_v50 }
 0x41e   : > { %1916 = vmatprep.subr.bf16.mxu0 %v4946_v32  ;;  %1957 = vmatprep.subr.bf16.mxu1 %v4949_v36 }
 0x421   : > { %1917 = vmatpush1.bf16.msra.mxu0 %v4952_v41  ;;  %1958 = vmatpush1.bf16.msra.mxu1 %v4955_v47 }
 0x422   : > { %1918 = vmatprep.subr.bf16.mxu0 %v4958_v27  ;;  %1959 = vmatprep.subr.bf16.mxu1 %v4961_v33 }
 0x425   : > { %1919 = vmatpush1.bf16.msra.mxu0 %v4964_v35  ;;  %1960 = vmatpush1.bf16.msra.mxu1 %v4967_v43 }
 0x426   : > { %1920 = vmatprep.subr.bf16.mxu0 %v4970_v28  ;;  %1961 = vmatprep.subr.bf16.mxu1 %v4973_v39 }
 0x429   : > { %1921 = vmatpush1.bf16.msra.mxu0 %v4976_v29  ;;  %1962 = vmatpush1.bf16.msra.mxu1 %v4979_v40 }
 0x42a   : > { %1922 = vmatprep.subr.bf16.mxu0 %v4982_v34  ;;  %1963 = vmatprep.subr.bf16.mxu1 %v4985_v37 }
 0x42d   : > { %1923 = vmatpush1.bf16.msra.mxu0 %v4988_v31  ;;  %1964 = vmatpush1.bf16.msra.mxu1 %v4991_v25 }
 0x42e   : > { %1924 = vmatprep.subr.bf16.mxu0 %v4994_v24  ;;  %1965 = vmatprep.subr.bf16.mxu1 %v4997_v26 }
 0x431   : > { %1925 = vmatpush1.bf16.msra.mxu0 %v5000_v46  ;;  %1966 = vmatpush1.bf16.msra.mxu1 %v5003_v38  ;;  %v5021_v38 = vld [vmem:[#allocation3 + $0xf8] sm:$0xff] }
 0x432   : > { %1926 = vmatprep.subr.bf16.mxu0 %v5006_v13  ;;  %1967 = vmatprep.subr.bf16.mxu1 %v5009_v45  ;;  %6304 = vst [vmem:[#allocation39_spill] sm:$0xff] %v5021_v38  ;;  %v5024_v13 = vld [vmem:[#allocation3 + $0xe0] sm:$0xff]  ;;  %v5027_v45 = vld [vmem:[#allocation3 + $0xf0] sm:$0xff] }
 0x433   : > { %6305 = vst [vmem:[#allocation40_spill] sm:$0xff] %v5024_v13  ;;  %6306 = vst [vmem:[#allocation41_spill] sm:$0xff] %v5027_v45 }
 0x435   : > { %1927 = vmatpush1.bf16.msra.mxu0 %v5012_v48  ;;  %1968 = vmatpush1.bf16.msra.mxu1 %v5015_v49  ;;  %v5030_v48 = vld [vmem:[#allocation3 + $0x108] sm:$0xff]  ;;  %v5033_v49 = vld [vmem:[#allocation3 + $0x118] sm:$0xff] }
 0x436   : > { %1928 = vmatprep.subr.bf16.mxu0 %v5018_v50  ;;  %1969 = vmatprep.subr.bf16.mxu1 %v5021_v38  ;;  %6307 = vst [vmem:[#allocation42_spill] sm:$0xff] %v5030_v48  ;;  %6308 = vst [vmem:[#allocation43_spill] sm:$0xff] %v5033_v49  ;;  %v5036_v50 = vld [vmem:[#allocation3 + $0x100] sm:$0xff]  ;;  %v5039_v38 = vld [vmem:[#allocation3 + $0x110] sm:$0xff] }
 0x437   : > { %6309 = vst [vmem:[#allocation44_spill] sm:$0xff] %v5036_v50  ;;  %6310 = vst [vmem:[#allocation45_spill] sm:$0xff] %v5039_v38 }
 0x439   : > { %1929 = vmatpush1.bf16.msra.mxu0 %v5024_v13  ;;  %1970 = vmatpush1.bf16.msra.mxu1 %v5027_v45  ;;  %v5042_v13 = vld [vmem:[#allocation3 + $0x128] sm:$0xff]  ;;  %v5045_v45 = vld [vmem:[#allocation3 + $0x138] sm:$0xff] }
 0x43a   : > { %1930 = vmatprep.subr.bf16.mxu0 %v5030_v48  ;;  %1971 = vmatprep.subr.bf16.mxu1 %v5033_v49  ;;  %6311 = vst [vmem:[#allocation46_spill] sm:$0xff] %v5042_v13  ;;  %6312 = vst [vmem:[#allocation47_spill] sm:$0xff] %v5045_v45  ;;  %v5048_v48 = vld [vmem:[#allocation3 + $0x120] sm:$0xff]  ;;  %v5051_v49 = vld [vmem:[#allocation3 + $0x130] sm:$0xff] }
 0x43b   : > { %6313 = vst [vmem:[#allocation48_spill] sm:$0xff] %v5048_v48  ;;  %6314 = vst [vmem:[#allocation49_spill] sm:$0xff] %v5051_v49 }
 0x43d   : > { %1931 = vmatpush1.bf16.msra.mxu0 %v5036_v50  ;;  %1972 = vmatpush1.bf16.msra.mxu1 %v5039_v38  ;;  %v5054_v50 = vld [vmem:[#allocation3 + $0x148] sm:$0xff]  ;;  %v5057_v38 = vld [vmem:[#allocation3 + $0x158] sm:$0xff] }
 0x43e   : > { %1932 = vmatprep.subr.bf16.mxu0 %v5042_v13  ;;  %1973 = vmatprep.subr.bf16.mxu1 %v5045_v45  ;;  %6315 = vst [vmem:[#allocation50_spill] sm:$0xff] %v5054_v50  ;;  %6316 = vst [vmem:[#allocation51_spill] sm:$0xff] %v5057_v38  ;;  %v5060_v13 = vld [vmem:[#allocation3 + $0x140] sm:$0xff]  ;;  %v5063_v45 = vld [vmem:[#allocation3 + $0x150] sm:$0xff] }
 0x43f   : > { %6317 = vst [vmem:[#allocation52_spill] sm:$0xff] %v5060_v13  ;;  %6318 = vst [vmem:[#allocation53_spill] sm:$0xff] %v5063_v45 }
 0x441   : > { %1933 = vmatpush1.bf16.msra.mxu0 %v5048_v48  ;;  %1974 = vmatpush1.bf16.msra.mxu1 %v5051_v49  ;;  %v5066_v48 = vld [vmem:[#allocation3 + $0x168] sm:$0xff]  ;;  %v5069_v49 = vld [vmem:[#allocation3 + $0x178] sm:$0xff] }
 0x442   : > { %1934 = vmatprep.subr.bf16.mxu0 %v5054_v50  ;;  %1975 = vmatprep.subr.bf16.mxu1 %v5057_v38  ;;  %6319 = vst [vmem:[#allocation54_spill] sm:$0xff] %v5066_v48  ;;  %6320 = vst [vmem:[#allocation55_spill] sm:$0xff] %v5069_v49  ;;  %v5072_v50 = vld [vmem:[#allocation3 + $0x160] sm:$0xff]  ;;  %v5075_v38 = vld [vmem:[#allocation3 + $0x170] sm:$0xff] }
 0x443   : > { %6321 = vst [vmem:[#allocation56_spill] sm:$0xff] %v5072_v50  ;;  %6322 = vst [vmem:[#allocation57_spill] sm:$0xff] %v5075_v38 }
 0x445   : > { %1935 = vmatpush1.bf16.msra.mxu0 %v5060_v13  ;;  %1976 = vmatpush1.bf16.msra.mxu1 %v5063_v45  ;;  %v5078_v13 = vld [vmem:[#allocation3 + $0x188] sm:$0xff]  ;;  %v5081_v45 = vld [vmem:[#allocation3 + $0x198] sm:$0xff] }
 0x446   : > { %1936 = vmatprep.subr.bf16.mxu0 %v5066_v48  ;;  %1977 = vmatprep.subr.bf16.mxu1 %v5069_v49  ;;  %6323 = vst [vmem:[#allocation58_spill] sm:$0xff] %v5078_v13  ;;  %6324 = vst [vmem:[#allocation59_spill] sm:$0xff] %v5081_v45  ;;  %v5084_v48 = vld [vmem:[#allocation3 + $0x180] sm:$0xff]  ;;  %v5087_v49 = vld [vmem:[#allocation3 + $0x190] sm:$0xff] }
 0x447   : > { %6325 = vst [vmem:[#allocation60_spill] sm:$0xff] %v5084_v48  ;;  %6326 = vst [vmem:[#allocation61_spill] sm:$0xff] %v5087_v49 }
 0x449   : > { %1937 = vmatpush1.bf16.msra.mxu0 %v5072_v50  ;;  %1978 = vmatpush1.bf16.msra.mxu1 %v5075_v38  ;;  %v5090_v50 = vld [vmem:[#allocation3 + $0x1a8] sm:$0xff]  ;;  %v5093_v38 = vld [vmem:[#allocation3 + $0x1b8] sm:$0xff] }
 0x44a   : > { %1938 = vmatprep.subr.bf16.mxu0 %v5078_v13  ;;  %1979 = vmatprep.subr.bf16.mxu1 %v5081_v45  ;;  %6327 = vst [vmem:[#allocation62_spill] sm:$0xff] %v5090_v50  ;;  %6328 = vst [vmem:[#allocation63_spill] sm:$0xff] %v5093_v38  ;;  %v5096_v13 = vld [vmem:[#allocation3 + $0x1a0] sm:$0xff]  ;;  %v5099_v45 = vld [vmem:[#allocation3 + $0x1b0] sm:$0xff] }
 0x44b   : > { %6329 = vst [vmem:[#allocation64_spill] sm:$0xff] %v5096_v13  ;;  %6330 = vst [vmem:[#allocation65_spill] sm:$0xff] %v5099_v45 }
 0x44d   : > { %1939 = vmatpush1.bf16.msra.mxu0 %v5084_v48  ;;  %1980 = vmatpush1.bf16.msra.mxu1 %v5087_v49  ;;  %v5102_v48 = vld [vmem:[#allocation3 + $0x1c8] sm:$0xff]  ;;  %v5105_v49 = vld [vmem:[#allocation3 + $0x1d8] sm:$0xff] }
 0x44e   : > { %1940 = vmatprep.subr.bf16.mxu0 %v5090_v50  ;;  %1981 = vmatprep.subr.bf16.mxu1 %v5093_v38  ;;  %6331 = vst [vmem:[#allocation66_spill] sm:$0xff] %v5102_v48  ;;  %6332 = vst [vmem:[#allocation67_spill] sm:$0xff] %v5105_v49  ;;  %v5108_v50 = vld [vmem:[#allocation3 + $0x1c0] sm:$0xff]  ;;  %v5111_v38 = vld [vmem:[#allocation3 + $0x1d0] sm:$0xff] }
 0x44f   : > { %6333 = vst [vmem:[#allocation68_spill] sm:$0xff] %v5108_v50  ;;  %6334 = vst [vmem:[#allocation69_spill] sm:$0xff] %v5111_v38 }
 0x451   : > { %1941 = vmatpush1.bf16.msra.mxu0 %v5096_v13  ;;  %1982 = vmatpush1.bf16.msra.mxu1 %v5099_v45  ;;  %v5114_v13 = vld [vmem:[#allocation3 + $0x1e8] sm:$0xff]  ;;  %v5117_v45 = vld [vmem:[#allocation3 + $0x1f8] sm:$0xff] }
 0x452   : > { %1942 = vmatprep.subr.bf16.mxu0 %v5102_v48  ;;  %1983 = vmatprep.subr.bf16.mxu1 %v5105_v49  ;;  %6335 = vst [vmem:[#allocation70_spill] sm:$0xff] %v5114_v13  ;;  %6336 = vst [vmem:[#allocation71_spill] sm:$0xff] %v5117_v45  ;;  %v5120_v48 = vld [vmem:[#allocation3 + $0x1e0] sm:$0xff]  ;;  %v5123_v49 = vld [vmem:[#allocation3 + $0x1f0] sm:$0xff] }
 0x453   : > { %6337 = vst [vmem:[#allocation72_spill] sm:$0xff] %v5120_v48  ;;  %6338 = vst [vmem:[#allocation16_spill] sm:$0xff] %v5123_v49 }
 0x455   : > { %1943 = vmatpush1.bf16.msra.mxu0 %v5108_v50  ;;  %1984 = vmatpush1.bf16.msra.mxu1 %v5111_v38 }
 0x456   : > { %1944 = vmatprep.subr.bf16.mxu0 %v5114_v13  ;;  %1985 = vmatprep.subr.bf16.mxu1 %v5117_v45 }
 0x459   : > { %1945 = vmatpush1.bf16.msra.mxu0 %v5120_v48  ;;  %1986 = vmatpush1.bf16.msra.mxu1 %v5123_v49 }
 0x45a   : > { %2033 = vmatprep.subr.bf16.mxu0 %v4817_v9  ;;  %2074 = vmatprep.subr.bf16.mxu1 %v4820_v42 }
 0x4cf   : > { %v1717_v38 = vpop.f32.mrb[20].mxu0  ;;  %v1758_v50 = vpop.f32.mrb[20].mxu1 }
 0x4d0   : > { %v3102_v46 = vmul.f32 -1.442695, %v1717_v38  ;;  %v1719_v13 = vpop.f32.mrb[21].mxu0  ;;  %v1760_v26 = vpop.f32.mrb[21].mxu1 }
 0x4d1   : > { %v3103_v24 = vmul.f32 -1.442695, %v1719_v13  ;;  %v1721_v25 = vpop.f32.mrb[22].mxu0  ;;  %v1762_v45 = vpop.f32.mrb[22].mxu1  ;;  %v3104_v48 = vmul.f32 -1.442695, %v1760_v26 }
 0x4d2   : > { %3283 = vpow2.f32 %v3102_v46  ;;  %v1722_v31 = vpop.f32.mrb[23].mxu0  ;;  %v1763_v37 = vpop.f32.mrb[23].mxu1 }
 0x4d3   : > { %3285 = vpow2.f32 %v3103_v24  ;;  %v3105_v24 = vld [vmem:[%s3797_s30 + $0x60] sm:$0xff] }
 0x4d4   : > { %3287 = vpow2.f32 %v3104_v48 }
 0x4d5   : > { %3289 = vtanh.f32 %v1758_v50 }
 0x4dc   : > { %v3284_v34 = vpop.eup %3283 }
 0x4dd   : > { %v3286_v49 = vpop.eup %3285  ;;  %v1768_v40 = vadd.f32 1.0, %v3284_v34  ;;  %v3106_v34 = vld [vmem:[%s3797_s30 + $0x68] sm:$0xff] }
 0x4de   : > { %v1774_v42 = vadd.f32 1.0, %v3286_v49  ;;  %v3288_v38 = vpop.eup %3287 }
 0x4df   : > { %3291 = vrcp.f32 %v1768_v40  ;;  %v3290_v9 = vpop.eup %3289  ;;  %v1781_v46 = vadd.f32 1.0, %v3288_v38 }
 0x4e0   : > { %3293 = vrcp.f32 %v1774_v42 }
 0x4e1   : > { %3295 = vrcp.f32 %v1781_v46 }
 0x4e9   : > { %v3292_v13 = vpop.eup %3291 }
 0x4ea   : > { %v3294_v25 = vpop.eup %3293  ;;  %v1785_v45 = vmul.f32 %v3292_v13, %v3290_v9 }
 0x4eb   : > { %v1784_v37 = vmul.f32 %v3294_v25, %v4824_v0 }
 0x4ed   : > { %v5129_v31 = vadd.f32 %v1785_v45, %v1784_v37  ;;  %v3108_v45 = vld [vmem:[%s3797_s30 + $0x78] sm:$0xff]  ;;  %v3296_v37 = vpop.eup %3295 }
 0x4ef   : > { %6339 = vst [vmem:[#allocation73_spill] sm:$0xff] %v5129_v31  ;;  %3297 = vtanh.f32 %v5129_v31  ;;  %v1836_v26 = vpop.f32.mrb[24].mxu0  ;;  %v1877_v48 = vpop.f32.mrb[24].mxu1  ;;  %v3107_v31 = vld [vmem:[%s3797_s30 + $0x70] sm:$0xff] }
 0x4f0   : > { %v1884_v40 = vadd.f32 %v3105_v24, %v1836_v26  ;;  %v1838_v42 = vpop.f32.mrb[25].mxu0  ;;  %v1879_v49 = vpop.f32.mrb[25].mxu1  ;;  %v1886_v24 = vadd.f32 %v3107_v31, %v1877_v48 }
 0x4f1   : > { %v1885_v50 = vadd.f32 %v3106_v34, %v1838_v42  ;;  %v1840_v29 = vpop.f32.mrb[26].mxu0  ;;  %v1881_v9 = vpop.f32.mrb[26].mxu1  ;;  %v1887_v46 = vadd.f32 %v3108_v45, %v1879_v49 }
 0x4f2   : > { %v3109_v38 = vmul.f32 -1.442695, %v1884_v40  ;;  %v1841_v13 = vpop.f32.mrb[27].mxu0  ;;  %v1882_v0 = vpop.f32.mrb[27].mxu1 }
 0x4f3   : > { %v3110_v25 = vmul.f32 -1.442695, %v1885_v50  ;;  %v3111_v43 = vmul.f32 -1.442695, %v1887_v46 }
 0x4f4   : > { %3299 = vpow2.f32 %v3109_v38 }
 0x4f5   : > { %3301 = vpow2.f32 %v3110_v25 }
 0x4f6   : > { %3303 = vpow2.f32 %v3111_v43 }
 0x4f7   : > { %3305 = vtanh.f32 %v1886_v24  ;;  %v6341_v24 = vld [vmem:[#allocation21_spill] sm:$0xff] }
 0x4f9   : > { %v3298_v39 = vpop.eup %3297 }
 0x4fa   : > { %v1788_v28 = vmul.f32 %v3298_v39, %v3296_v37 }
 0x4fc   : > { %v1789_v26 = vrot.slane %v1788_v28, 4  ;;  %v1913_v35 = vpack.c.bf16 %v1788_v28, %v1788_v28 }
 0x4fe   : > { %v3300_v33 = vpop.eup %3299  ;;  %v1790_v34 = vadd.f32 %v1789_v26, %v1788_v28  ;;  %1946 = vmatprep.mubr.bf16.mxu0 %v1913_v35  ;;  %1987 = vmatprep.mubr.bf16.mxu1 %v1913_v35  ;;  %v6342_v26 = vld [vmem:[#allocation20_spill] sm:$0xff] }
 0x4ff   : > { %v3302_v29 = vpop.eup %3301  ;;  %v1891_v40 = vadd.f32 1.0, %v3300_v33 }
 0x500   : > { %v1897_v42 = vadd.f32 1.0, %v3302_v29  ;;  %v1791_v50 = vrot.slane %v1790_v34, 2  ;;  %v3304_v31 = vpop.eup %3303  ;;  %v6344_v29 = vld [vmem:[#allocation23_spill] sm:$0xff] }
 0x501   : > { %3307 = vrcp.f32 %v1891_v40  ;;  %v3306_v48 = vpop.eup %3305  ;;  %v1904_v25 = vadd.f32 1.0, %v3304_v31  ;;  %v6345_v40 = vld [vmem:[#allocation24_spill] sm:$0xff]  ;;  %v6352_v31 = vld [vmem:[#allocation31_spill] sm:$0xff] }
 0x502   : > { %3309 = vrcp.f32 %v1897_v42  ;;  %v1792_v49 = vadd.f32 %v1791_v50, %v1790_v34  ;;  %v6343_v34 = vld [vmem:[#allocation22_spill] sm:$0xff]  ;;  %v6346_v42 = vld [vmem:[#allocation25_spill] sm:$0xff] }
 0x503   : > { %3311 = vrcp.f32 %v1904_v25  ;;  %v6347_v50 = vld [vmem:[#allocation26_spill] sm:$0xff]  ;;  %v6357_v25 = vld [vmem:[#allocation36_spill] sm:$0xff] }
 0x504   : > { %v1793_v9 = vrot.slane %v1792_v49, 1 }
 0x506   : > { %v1794_v39 = vadd.f32 %v1793_v9, %v1792_v49  ;;  %v6348_v49 = vld [vmem:[#allocation27_spill] sm:$0xff]  ;;  %v6349_v9 = vld [vmem:[#allocation28_spill] sm:$0xff] }
 0x508   : > { %v1795_v38 = vmul.f32 0.5, %v1794_v39  ;;  %v6350_v39 = vld [vmem:[#allocation29_spill] sm:$0xff] }
 0x50a   : > { %1796 = vst [vmem:[%s3799_s4 + $0x2] sm:$0x1] %v1795_v38  ;;  %v6351_v38 = vld [vmem:[#allocation30_spill] sm:$0xff] }
 0x50b   : > { %v3308_v13 = vpop.eup %3307 }
 0x50c   : > { %v3310_v28 = vpop.eup %3309  ;;  %v1908_v0 = vmul.f32 %v3308_v13, %v3306_v48  ;;  %v6353_v48 = vld [vmem:[#allocation32_spill] sm:$0xff]  ;;  %v6354_v13 = vld [vmem:[#allocation33_spill] sm:$0xff] }
 0x50d   : > { %v1907_v35 = vmul.f32 %v3310_v28, %v4833_v44  ;;  %v3312_v43 = vpop.eup %3311  ;;  %v6340_v44 = vld [vmem:[#allocation19_spill] sm:$0xff]  ;;  %v6355_v28 = vld [vmem:[#allocation34_spill] sm:$0xff] }
 0x50f   : > { %v5138_v33 = vadd.f32 %v1908_v0, %v1907_v35  ;;  %v6356_v0 = vld [vmem:[#allocation35_spill] sm:$0xff]  ;;  %v6358_v35 = vld [vmem:[#allocation37_spill] sm:$0xff] }
 0x511   : > { %3313 = vtanh.f32 %v5138_v33 }
 0x51b   : > { %v3314_v45 = vpop.eup %3313 }
 0x51c   : > { %v1911_v46 = vmul.f32 %v3314_v45, %v3312_v43  ;;  %v6359_v43 = vld [vmem:[#allocation38_spill] sm:$0xff]  ;;  %v6360_v45 = vld [vmem:[#allocation39_spill] sm:$0xff] }
 0x51e   : > { %v1912_v37 = vpack.c.bf16 %v1911_v46, %v1911_v46  ;;  %v6361_v46 = vld [vmem:[#allocation40_spill] sm:$0xff] }
 0x520   : > { %1947 = vmatmul.mubr.bf16.vlgmr.msra.gmra.mrb[28].mxu0 %v1912_v37  ;;  %1988 = vmatmul.mubr.bf16.vlgmr.msra.gmra.mrb[28].mxu1 %v1912_v37 }
 0x521   : > { %2034 = vmatpush1.bf16.msra.mxu0 %v4840_v51  ;;  %2075 = vmatpush1.bf16.msra.mxu1 %v4843_v52 }
 0x522   : > { %2035 = vmatprep.subr.bf16.mxu0 %v4846_v23  ;;  %2076 = vmatprep.subr.bf16.mxu1 %v4849_v53 }
 0x523   : > { %2065 = vmatprep.mubr.bf16.mxu0 %v6172_v30  ;;  %2106 = vmatprep.mubr.bf16.mxu1 %v6172_v30 }
 0x525   : > { %2036 = vmatpush1.bf16.msra.mxu0 %v4854_v54  ;;  %2077 = vmatpush1.bf16.msra.mxu1 %v4857_v55 }
 0x526   : > { %2037 = vmatprep.subr.bf16.mxu0 %v4860_v56  ;;  %2078 = vmatprep.subr.bf16.mxu1 %v4863_v57 }
 0x529   : > { %2038 = vmatpush1.bf16.msra.mxu0 %v4866_v58  ;;  %2079 = vmatpush1.bf16.msra.mxu1 %v4869_v59 }
 0x52a   : > { %2039 = vmatprep.subr.bf16.mxu0 %v4872_v60  ;;  %2080 = vmatprep.subr.bf16.mxu1 %v4875_v61 }
 0x52d   : > { %2040 = vmatpush1.bf16.msra.mxu0 %v4878_v62  ;;  %2081 = vmatpush1.bf16.msra.mxu1 %v4881_v63 }
 0x52e   : > { %2041 = vmatprep.subr.bf16.mxu0 %v4884_v1  ;;  %2082 = vmatprep.subr.bf16.mxu1 %v4887_v2 }
 0x531   : > { %2042 = vmatpush1.bf16.msra.mxu0 %v4890_v3  ;;  %2083 = vmatpush1.bf16.msra.mxu1 %v4893_v4 }
 0x532   : > { %2043 = vmatprep.subr.bf16.mxu0 %v4896_v5  ;;  %2084 = vmatprep.subr.bf16.mxu1 %v4899_v6 }
 0x535   : > { %2044 = vmatpush1.bf16.msra.mxu0 %v4902_v7  ;;  %2085 = vmatpush1.bf16.msra.mxu1 %v4905_v8 }
 0x536   : > { %2045 = vmatprep.subr.bf16.mxu0 %v4908_v10  ;;  %2086 = vmatprep.subr.bf16.mxu1 %v4911_v11 }
 0x539   : > { %2046 = vmatpush1.bf16.msra.mxu0 %v4914_v12  ;;  %2087 = vmatpush1.bf16.msra.mxu1 %v4917_v14 }
 0x53a   : > { %2047 = vmatprep.subr.bf16.mxu0 %v4920_v15  ;;  %2088 = vmatprep.subr.bf16.mxu1 %v4923_v16 }
 0x53d   : > { %2048 = vmatpush1.bf16.msra.mxu0 %v4926_v17  ;;  %2089 = vmatpush1.bf16.msra.mxu1 %v4929_v18 }
 0x53e   : > { %2145 = vmatprep.subr.bf16.mxu0 %v4932_v19  ;;  %2186 = vmatprep.subr.bf16.mxu1 %v4935_v20 }
 0x540   : > { %2066 = vmatmul.mubr.bf16.vlgmr.msra.gmra.mrb[32].mxu0 %v1912_v37  ;;  %2107 = vmatmul.mubr.bf16.vlgmr.msra.gmra.mrb[32].mxu1 %v1912_v37  ;;  %v6362_v37 = vld [vmem:[#allocation41_spill] sm:$0xff] }
 0x541   : > { %2146 = vmatpush1.bf16.msra.mxu0 %v4940_v21  ;;  %2187 = vmatpush1.bf16.msra.mxu1 %v4943_v22 }
 0x542   : > { %2147 = vmatprep.subr.bf16.mxu0 %v4946_v32  ;;  %2188 = vmatprep.subr.bf16.mxu1 %v4949_v36 }
 0x545   : > { %2148 = vmatpush1.bf16.msra.mxu0 %v4952_v41  ;;  %2189 = vmatpush1.bf16.msra.mxu1 %v4955_v47 }
 0x546   : > { %2149 = vmatprep.subr.bf16.mxu0 %v4958_v27  ;;  %2190 = vmatprep.subr.bf16.mxu1 %v6340_v44 }
 0x549   : > { %2150 = vmatpush1.bf16.msra.mxu0 %v6341_v24  ;;  %2191 = vmatpush1.bf16.msra.mxu1 %v6342_v26 }
 0x54a   : > { %2151 = vmatprep.subr.bf16.mxu0 %v6343_v34  ;;  %2192 = vmatprep.subr.bf16.mxu1 %v6344_v29 }
 0x54d   : > { %2152 = vmatpush1.bf16.msra.mxu0 %v6345_v40  ;;  %2193 = vmatpush1.bf16.msra.mxu1 %v6346_v42 }
 0x54e   : > { %2153 = vmatprep.subr.bf16.mxu0 %v6347_v50  ;;  %2194 = vmatprep.subr.bf16.mxu1 %v6348_v49 }
 0x551   : > { %2154 = vmatpush1.bf16.msra.mxu0 %v6349_v9  ;;  %2195 = vmatpush1.bf16.msra.mxu1 %v6350_v39 }
 0x552   : > { %2155 = vmatprep.subr.bf16.mxu0 %v6351_v38  ;;  %2196 = vmatprep.subr.bf16.mxu1 %v6352_v31  ;;  %v6363_v31 = vld [vmem:[#allocation42_spill] sm:$0xff] }
 0x555   : > { %2156 = vmatpush1.bf16.msra.mxu0 %v6353_v48  ;;  %2197 = vmatpush1.bf16.msra.mxu1 %v6354_v13  ;;  %v6364_v48 = vld [vmem:[#allocation43_spill] sm:$0xff]  ;;  %v6365_v13 = vld [vmem:[#allocation44_spill] sm:$0xff] }
 0x556   : > { %2157 = vmatprep.subr.bf16.mxu0 %v6355_v28  ;;  %2198 = vmatprep.subr.bf16.mxu1 %v6356_v0  ;;  %v6366_v28 = vld [vmem:[#allocation45_spill] sm:$0xff]  ;;  %v6367_v0 = vld [vmem:[#allocation46_spill] sm:$0xff] }
 0x559   : > { %2158 = vmatpush1.bf16.msra.mxu0 %v6357_v25  ;;  %2199 = vmatpush1.bf16.msra.mxu1 %v6358_v35  ;;  %v6368_v25 = vld [vmem:[#allocation47_spill] sm:$0xff]  ;;  %v6369_v35 = vld [vmem:[#allocation48_spill] sm:$0xff] }
 0x55a   : > { %2159 = vmatprep.subr.bf16.mxu0 %v6359_v43  ;;  %2200 = vmatprep.subr.bf16.mxu1 %v6360_v45  ;;  %v6370_v43 = vld [vmem:[#allocation49_spill] sm:$0xff]  ;;  %v6371_v45 = vld [vmem:[#allocation50_spill] sm:$0xff] }
 0x55d   : > { %2160 = vmatpush1.bf16.msra.mxu0 %v6361_v46  ;;  %2201 = vmatpush1.bf16.msra.mxu1 %v6362_v37  ;;  %v6372_v46 = vld [vmem:[#allocation51_spill] sm:$0xff]  ;;  %v6373_v37 = vld [vmem:[#allocation52_spill] sm:$0xff] }
 0x55e   : > { %2161 = vmatprep.subr.bf16.mxu0 %v6363_v31  ;;  %2202 = vmatprep.subr.bf16.mxu1 %v6364_v48  ;;  %v6374_v31 = vld [vmem:[#allocation53_spill] sm:$0xff]  ;;  %v6375_v48 = vld [vmem:[#allocation54_spill] sm:$0xff] }
 0x561   : > { %2162 = vmatpush1.bf16.msra.mxu0 %v6365_v13  ;;  %2203 = vmatpush1.bf16.msra.mxu1 %v6366_v28  ;;  %v6376_v13 = vld [vmem:[#allocation55_spill] sm:$0xff]  ;;  %v6377_v28 = vld [vmem:[#allocation56_spill] sm:$0xff] }
 0x562   : > { %2163 = vmatprep.subr.bf16.mxu0 %v6367_v0  ;;  %2204 = vmatprep.subr.bf16.mxu1 %v6368_v25  ;;  %v6378_v0 = vld [vmem:[#allocation57_spill] sm:$0xff]  ;;  %v6379_v25 = vld [vmem:[#allocation58_spill] sm:$0xff] }
 0x565   : > { %2164 = vmatpush1.bf16.msra.mxu0 %v6369_v35  ;;  %2205 = vmatpush1.bf16.msra.mxu1 %v6370_v43  ;;  %v6380_v35 = vld [vmem:[#allocation59_spill] sm:$0xff]  ;;  %v6381_v43 = vld [vmem:[#allocation60_spill] sm:$0xff] }
 0x566   : > { %2165 = vmatprep.subr.bf16.mxu0 %v6371_v45  ;;  %2206 = vmatprep.subr.bf16.mxu1 %v6372_v46  ;;  %v6382_v45 = vld [vmem:[#allocation61_spill] sm:$0xff]  ;;  %v6383_v46 = vld [vmem:[#allocation62_spill] sm:$0xff] }
 0x569   : > { %2166 = vmatpush1.bf16.msra.mxu0 %v6373_v37  ;;  %2207 = vmatpush1.bf16.msra.mxu1 %v6374_v31  ;;  %v6384_v37 = vld [vmem:[#allocation63_spill] sm:$0xff]  ;;  %v6385_v31 = vld [vmem:[#allocation64_spill] sm:$0xff] }
 0x56a   : > { %2167 = vmatprep.subr.bf16.mxu0 %v6375_v48  ;;  %2208 = vmatprep.subr.bf16.mxu1 %v6376_v13  ;;  %v6386_v48 = vld [vmem:[#allocation65_spill] sm:$0xff]  ;;  %v6387_v13 = vld [vmem:[#allocation66_spill] sm:$0xff] }
 0x56d   : > { %2168 = vmatpush1.bf16.msra.mxu0 %v6377_v28  ;;  %2209 = vmatpush1.bf16.msra.mxu1 %v6378_v0  ;;  %v6388_v28 = vld [vmem:[#allocation67_spill] sm:$0xff]  ;;  %v6389_v0 = vld [vmem:[#allocation68_spill] sm:$0xff] }
 0x56e   : > { %2169 = vmatprep.subr.bf16.mxu0 %v6379_v25  ;;  %2210 = vmatprep.subr.bf16.mxu1 %v6380_v35  ;;  %v6390_v25 = vld [vmem:[#allocation69_spill] sm:$0xff]  ;;  %v6391_v35 = vld [vmem:[#allocation70_spill] sm:$0xff] }
 0x571   : > { %2170 = vmatpush1.bf16.msra.mxu0 %v6381_v43  ;;  %2211 = vmatpush1.bf16.msra.mxu1 %v6382_v45  ;;  %v6392_v43 = vld [vmem:[#allocation71_spill] sm:$0xff]  ;;  %v6393_v45 = vld [vmem:[#allocation72_spill] sm:$0xff] }
 0x572   : > { %2171 = vmatprep.subr.bf16.mxu0 %v6383_v46  ;;  %2212 = vmatprep.subr.bf16.mxu1 %v6384_v37  ;;  %v6394_v46 = vld [vmem:[#allocation16_spill] sm:$0xff]  ;;  %v6395_v37 = vld [vmem:[#allocation17_spill] sm:$0xff] }
 0x575   : > { %2172 = vmatpush1.bf16.msra.mxu0 %v6385_v31  ;;  %2213 = vmatpush1.bf16.msra.mxu1 %v6386_v48  ;;  %v6396_v31 = vld [vmem:[#allocation18_spill] sm:$0xff] }
 0x576   : > { %2173 = vmatprep.subr.bf16.mxu0 %v6387_v13  ;;  %2214 = vmatprep.subr.bf16.mxu1 %v6388_v28 }
 0x579   : > { %2174 = vmatpush1.bf16.msra.mxu0 %v6389_v0  ;;  %2215 = vmatpush1.bf16.msra.mxu1 %v6390_v25 }
 0x57a   : > { %2175 = vmatprep.subr.bf16.mxu0 %v6391_v35  ;;  %2216 = vmatprep.subr.bf16.mxu1 %v6392_v43 }
 0x57d   : > { %2176 = vmatpush1.bf16.msra.mxu0 %v6393_v45  ;;  %2217 = vmatpush1.bf16.msra.mxu1 %v6394_v46 }
 0x57e   : > { %2264 = vmatprep.subr.bf16.mxu0 %v6395_v37  ;;  %2305 = vmatprep.subr.bf16.mxu1 %v6396_v31 }
 0x5f3   : > { %v1948_v48 = vpop.f32.mrb[28].mxu0  ;;  %v1989_v13 = vpop.f32.mrb[28].mxu1 }
 0x5f4   : > { %v3112_v38 = vmul.f32 -1.442695, %v1948_v48  ;;  %v1950_v28 = vpop.f32.mrb[29].mxu0  ;;  %v1991_v39 = vpop.f32.mrb[29].mxu1 }
 0x5f5   : > { %v3113_v0 = vmul.f32 -1.442695, %v1950_v28  ;;  %v1952_v9 = vpop.f32.mrb[30].mxu0  ;;  %v1993_v25 = vpop.f32.mrb[30].mxu1  ;;  %v3114_v43 = vmul.f32 -1.442695, %v1991_v39 }
 0x5f6   : > { %3315 = vpow2.f32 %v3112_v38  ;;  %v1953_v35 = vpop.f32.mrb[31].mxu0  ;;  %v1994_v49 = vpop.f32.mrb[31].mxu1  ;;  %v3115_v39 = vld [vmem:[%s3797_s30 + $0x80] sm:$0xff] }
 0x5f7   : > { %3317 = vpow2.f32 %v3113_v0  ;;  %v6397_v35 = vld [vmem:[#allocation73_spill] sm:$0xff] }
 0x5f8   : > { %3319 = vpow2.f32 %v3114_v43 }
 0x5f9   : > { %3321 = vtanh.f32 %v1989_v13 }
 0x600   : > { %v3316_v45 = vpop.eup %3315 }
 0x601   : > { %v3318_v46 = vpop.eup %3317  ;;  %v1999_v50 = vadd.f32 1.0, %v3316_v45  ;;  %v3116_v45 = vld [vmem:[%s3797_s30 + $0x88] sm:$0xff] }
 0x602   : > { %v2005_v31 = vadd.f32 1.0, %v3318_v46  ;;  %v3320_v48 = vpop.eup %3319 }
 0x603   : > { %3323 = vrcp.f32 %v1999_v50  ;;  %v3322_v37 = vpop.eup %3321  ;;  %v2012_v38 = vadd.f32 1.0, %v3320_v48 }
 0x604   : > { %3325 = vrcp.f32 %v2005_v31 }
 0x605   : > { %3327 = vrcp.f32 %v2012_v38 }
 0x60d   : > { %v3324_v28 = vpop.eup %3323 }
 0x60e   : > { %v3326_v9 = vpop.eup %3325  ;;  %v2016_v25 = vmul.f32 %v3324_v28, %v3322_v37 }
 0x60f   : > { %v2015_v49 = vmul.f32 %v3326_v9, %v6397_v35  ;;  %v3118_v35 = vld [vmem:[%s3797_s30 + $0x98] sm:$0xff] }
 0x611   : > { %v5240_v0 = vadd.f32 %v2016_v25, %v2015_v49  ;;  %v3328_v49 = vpop.eup %3327 }
 0x613   : > { %6398 = vst [vmem:[#allocation17_spill] sm:$0xff] %v5240_v0  ;;  %3329 = vtanh.f32 %v5240_v0  ;;  %v2067_v13 = vpop.f32.mrb[32].mxu0  ;;  %v2108_v43 = vpop.f32.mrb[32].mxu1  ;;  %v3117_v0 = vld [vmem:[%s3797_s30 + $0x90] sm:$0xff] }
 0x614   : > { %v2115_v50 = vadd.f32 %v3115_v39, %v2067_v13  ;;  %v2069_v46 = vpop.f32.mrb[33].mxu0  ;;  %v2110_v31 = vpop.f32.mrb[33].mxu1  ;;  %v2117_v39 = vadd.f32 %v3117_v0, %v2108_v43 }
 0x615   : > { %v2116_v42 = vadd.f32 %v3116_v45, %v2069_v46  ;;  %v2071_v40 = vpop.f32.mrb[34].mxu0  ;;  %v2112_v37 = vpop.f32.mrb[34].mxu1  ;;  %v2118_v38 = vadd.f32 %v3118_v35, %v2110_v31 }
 0x616   : > { %v3119_v48 = vmul.f32 -1.442695, %v2115_v50  ;;  %v2072_v28 = vpop.f32.mrb[35].mxu0  ;;  %v2113_v9 = vpop.f32.mrb[35].mxu1 }
 0x617   : > { %v3120_v25 = vmul.f32 -1.442695, %v2116_v42  ;;  %v3121_v26 = vmul.f32 -1.442695, %v2118_v38 }
 0x618   : > { %3331 = vpow2.f32 %v3119_v48 }
 0x619   : > { %3333 = vpow2.f32 %v3120_v25 }
 0x61a   : > { %3335 = vpow2.f32 %v3121_v26 }
 0x61b   : > { %3337 = vtanh.f32 %v2117_v39  ;;  %v6439_v39 = vld [vmem:[#allocation59_spill] sm:$0xff] }
 0x61d   : > { %v3330_v29 = vpop.eup %3329 }
 0x61e   : > { %v2019_v34 = vmul.f32 %v3330_v29, %v3328_v49 }
 0x620   : > { %v2020_v13 = vrot.slane %v2019_v34, 4  ;;  %v2144_v24 = vpack.c.bf16 %v2019_v34, %v2019_v34 }
 0x622   : > { %v3332_v44 = vpop.eup %3331  ;;  %v2021_v45 = vadd.f32 %v2020_v13, %v2019_v34  ;;  %2177 = vmatprep.mubr.bf16.mxu0 %v2144_v24  ;;  %2218 = vmatprep.mubr.bf16.mxu1 %v2144_v24  ;;  %v6440_v13 = vld [vmem:[#allocation60_spill] sm:$0xff] }
 0x623   : > { %v3334_v40 = vpop.eup %3333  ;;  %v2122_v50 = vadd.f32 1.0, %v3332_v44 }
 0x624   : > { %v2128_v42 = vadd.f32 1.0, %v3334_v40  ;;  %v2022_v46 = vrot.slane %v2021_v45, 2  ;;  %v3336_v0 = vpop.eup %3335  ;;  %v6442_v40 = vld [vmem:[#allocation62_spill] sm:$0xff] }
 0x625   : > { %3339 = vrcp.f32 %v2122_v50  ;;  %v3338_v43 = vpop.eup %3337  ;;  %v2135_v25 = vadd.f32 1.0, %v3336_v0  ;;  %v6443_v50 = vld [vmem:[#allocation63_spill] sm:$0xff]  ;;  %v6450_v0 = vld [vmem:[#allocation70_spill] sm:$0xff] }
 0x626   : > { %3341 = vrcp.f32 %v2128_v42  ;;  %v2023_v31 = vadd.f32 %v2022_v46, %v2021_v45  ;;  %v6441_v45 = vld [vmem:[#allocation61_spill] sm:$0xff]  ;;  %v6444_v42 = vld [vmem:[#allocation64_spill] sm:$0xff] }
 0x627   : > { %3343 = vrcp.f32 %v2135_v25  ;;  %v6445_v46 = vld [vmem:[#allocation65_spill] sm:$0xff] }
 0x628   : > { %v2024_v37 = vrot.slane %v2023_v31, 1  ;;  %v5351_v25 = vld [vmem:[#allocation2 + $0x18] sm:$0xff] }
 0x62a   : > { %v2025_v29 = vadd.f32 %v2024_v37, %v2023_v31  ;;  %v6446_v31 = vld [vmem:[#allocation66_spill] sm:$0xff]  ;;  %v6447_v37 = vld [vmem:[#allocation67_spill] sm:$0xff] }
 0x62c   : > { %v2026_v48 = vmul.f32 0.5, %v2025_v29  ;;  %v6448_v29 = vld [vmem:[#allocation68_spill] sm:$0xff] }
 0x62e   : > { %2027 = vst [vmem:[%s3799_s4 + $0x3] sm:$0x1] %v2026_v48  ;;  %v6449_v48 = vld [vmem:[#allocation69_spill] sm:$0xff] }
 0x62f   : > { %v3340_v28 = vpop.eup %3339 }
 0x630   : > { %v3342_v34 = vpop.eup %3341  ;;  %v2139_v9 = vmul.f32 %v3340_v28, %v3338_v43  ;;  %v6451_v43 = vld [vmem:[#allocation71_spill] sm:$0xff]  ;;  %v6452_v28 = vld [vmem:[#allocation72_spill] sm:$0xff] }
 0x631   : > { %v2138_v24 = vmul.f32 %v3342_v34, %v5138_v33  ;;  %v3344_v26 = vpop.eup %3343  ;;  %v6438_v33 = vld [vmem:[#allocation58_spill] sm:$0xff]  ;;  %v6453_v34 = vld [vmem:[#allocation16_spill] sm:$0xff] }
 0x633   : > { %v5249_v44 = vadd.f32 %v2139_v9, %v2138_v24  ;;  %v5348_v9 = vld [vmem:[#allocation2 + $0x8] sm:$0xff] }
 0x635   : > { %3345 = vtanh.f32 %v5249_v44 }
 0x63f   : > { %v3346_v35 = vpop.eup %3345 }
 0x640   : > { %v2142_v38 = vmul.f32 %v3346_v35, %v3344_v26 }
 0x642   : > { %v2143_v49 = vpack.c.bf16 %v2142_v38, %v2142_v38 }
 0x644   : > { %2178 = vmatmul.mubr.bf16.vlgmr.msra.gmra.mrb[36].mxu0 %v2143_v49  ;;  %2219 = vmatmul.mubr.bf16.vlgmr.msra.gmra.mrb[36].mxu1 %v2143_v49 }
 0x645   : > { %2265 = vmatpush1.bf16.msra.mxu0 %v4840_v51  ;;  %2306 = vmatpush1.bf16.msra.mxu1 %v4843_v52  ;;  %v6399_v51 = vld [vmem:[#allocation19_spill] sm:$0xff]  ;;  %v6400_v52 = vld [vmem:[#allocation21_spill] sm:$0xff] }
 0x646   : > { %2266 = vmatprep.subr.bf16.mxu0 %v4846_v23  ;;  %2307 = vmatprep.subr.bf16.mxu1 %v4849_v53  ;;  %v6401_v23 = vld [vmem:[#allocation20_spill] sm:$0xff]  ;;  %v6402_v53 = vld [vmem:[#allocation22_spill] sm:$0xff] }
 0x647   : > { %2296 = vmatprep.mubr.bf16.mxu0 %v6172_v30  ;;  %2337 = vmatprep.mubr.bf16.mxu1 %v6172_v30 }
 0x649   : > { %2267 = vmatpush1.bf16.msra.mxu0 %v4854_v54  ;;  %2308 = vmatpush1.bf16.msra.mxu1 %v4857_v55  ;;  %v6403_v54 = vld [vmem:[#allocation23_spill] sm:$0xff]  ;;  %v6404_v55 = vld [vmem:[#allocation24_spill] sm:$0xff] }
 0x64a   : > { %2268 = vmatprep.subr.bf16.mxu0 %v4860_v56  ;;  %2309 = vmatprep.subr.bf16.mxu1 %v4863_v57  ;;  %v6405_v56 = vld [vmem:[#allocation25_spill] sm:$0xff]  ;;  %v6406_v57 = vld [vmem:[#allocation26_spill] sm:$0xff] }
 0x64d   : > { %2269 = vmatpush1.bf16.msra.mxu0 %v4866_v58  ;;  %2310 = vmatpush1.bf16.msra.mxu1 %v4869_v59  ;;  %v6407_v58 = vld [vmem:[#allocation27_spill] sm:$0xff]  ;;  %v6408_v59 = vld [vmem:[#allocation28_spill] sm:$0xff] }
 0x64e   : > { %2270 = vmatprep.subr.bf16.mxu0 %v4872_v60  ;;  %2311 = vmatprep.subr.bf16.mxu1 %v4875_v61  ;;  %v6409_v60 = vld [vmem:[#allocation29_spill] sm:$0xff]  ;;  %v6410_v61 = vld [vmem:[#allocation30_spill] sm:$0xff] }
 0x651   : > { %2271 = vmatpush1.bf16.msra.mxu0 %v4878_v62  ;;  %2312 = vmatpush1.bf16.msra.mxu1 %v4881_v63  ;;  %v6411_v62 = vld [vmem:[#allocation31_spill] sm:$0xff]  ;;  %v6412_v63 = vld [vmem:[#allocation32_spill] sm:$0xff] }
 0x652   : > { %2272 = vmatprep.subr.bf16.mxu0 %v4884_v1  ;;  %2313 = vmatprep.subr.bf16.mxu1 %v4887_v2  ;;  %v6413_v1 = vld [vmem:[#allocation33_spill] sm:$0xff]  ;;  %v6414_v2 = vld [vmem:[#allocation34_spill] sm:$0xff] }
 0x655   : > { %2273 = vmatpush1.bf16.msra.mxu0 %v4890_v3  ;;  %2314 = vmatpush1.bf16.msra.mxu1 %v4893_v4  ;;  %v6415_v3 = vld [vmem:[#allocation35_spill] sm:$0xff]  ;;  %v6416_v4 = vld [vmem:[#allocation36_spill] sm:$0xff] }
 0x656   : > { %2274 = vmatprep.subr.bf16.mxu0 %v4896_v5  ;;  %2315 = vmatprep.subr.bf16.mxu1 %v4899_v6  ;;  %v6417_v5 = vld [vmem:[#allocation37_spill] sm:$0xff]  ;;  %v6418_v6 = vld [vmem:[#allocation38_spill] sm:$0xff] }
 0x659   : > { %2275 = vmatpush1.bf16.msra.mxu0 %v4902_v7  ;;  %2316 = vmatpush1.bf16.msra.mxu1 %v4905_v8  ;;  %v6419_v7 = vld [vmem:[#allocation39_spill] sm:$0xff]  ;;  %v6420_v8 = vld [vmem:[#allocation40_spill] sm:$0xff] }
 0x65a   : > { %2276 = vmatprep.subr.bf16.mxu0 %v4908_v10  ;;  %2317 = vmatprep.subr.bf16.mxu1 %v4911_v11  ;;  %v6421_v10 = vld [vmem:[#allocation41_spill] sm:$0xff]  ;;  %v6422_v11 = vld [vmem:[#allocation42_spill] sm:$0xff] }
 0x65d   : > { %2277 = vmatpush1.bf16.msra.mxu0 %v4914_v12  ;;  %2318 = vmatpush1.bf16.msra.mxu1 %v4917_v14  ;;  %v6423_v12 = vld [vmem:[#allocation43_spill] sm:$0xff]  ;;  %v6424_v14 = vld [vmem:[#allocation44_spill] sm:$0xff] }
 0x65e   : > { %2278 = vmatprep.subr.bf16.mxu0 %v4920_v15  ;;  %2319 = vmatprep.subr.bf16.mxu1 %v4923_v16  ;;  %v6425_v15 = vld [vmem:[#allocation45_spill] sm:$0xff]  ;;  %v6426_v16 = vld [vmem:[#allocation46_spill] sm:$0xff] }
 0x661   : > { %2279 = vmatpush1.bf16.msra.mxu0 %v4926_v17  ;;  %2320 = vmatpush1.bf16.msra.mxu1 %v4929_v18  ;;  %v6427_v17 = vld [vmem:[#allocation47_spill] sm:$0xff]  ;;  %v6428_v18 = vld [vmem:[#allocation48_spill] sm:$0xff] }
 0x662   : > { %2376 = vmatprep.subr.bf16.mxu0 %v4932_v19  ;;  %2417 = vmatprep.subr.bf16.mxu1 %v4935_v20  ;;  %v6429_v19 = vld [vmem:[#allocation49_spill] sm:$0xff]  ;;  %v6430_v20 = vld [vmem:[#allocation50_spill] sm:$0xff] }
 0x664   : > { %2297 = vmatmul.mubr.bf16.vlgmr.msra.gmra.mrb[40].mxu0 %v2143_v49  ;;  %2338 = vmatmul.mubr.bf16.vlgmr.msra.gmra.mrb[40].mxu1 %v2143_v49 }
 0x665   : > { %2377 = vmatpush1.bf16.msra.mxu0 %v4940_v21  ;;  %2418 = vmatpush1.bf16.msra.mxu1 %v4943_v22  ;;  %v6431_v21 = vld [vmem:[#allocation51_spill] sm:$0xff]  ;;  %v6432_v22 = vld [vmem:[#allocation52_spill] sm:$0xff] }
 0x666   : > { %2378 = vmatprep.subr.bf16.mxu0 %v4946_v32  ;;  %2419 = vmatprep.subr.bf16.mxu1 %v4949_v36  ;;  %v6433_v32 = vld [vmem:[#allocation53_spill] sm:$0xff]  ;;  %v6434_v36 = vld [vmem:[#allocation54_spill] sm:$0xff] }
 0x669   : > { %2379 = vmatpush1.bf16.msra.mxu0 %v4952_v41  ;;  %2420 = vmatpush1.bf16.msra.mxu1 %v4955_v47  ;;  %v6435_v41 = vld [vmem:[#allocation55_spill] sm:$0xff]  ;;  %v6436_v47 = vld [vmem:[#allocation56_spill] sm:$0xff] }
 0x66a   : > { %2380 = vmatprep.subr.bf16.mxu0 %v4958_v27  ;;  %2421 = vmatprep.subr.bf16.mxu1 %v6399_v51  ;;  %v6437_v27 = vld [vmem:[#allocation57_spill] sm:$0xff] }
 0x66d   : > { %2381 = vmatpush1.bf16.msra.mxu0 %v6400_v52  ;;  %2422 = vmatpush1.bf16.msra.mxu1 %v6401_v23 }
 0x66e   : > { %2382 = vmatprep.subr.bf16.mxu0 %v6402_v53  ;;  %2423 = vmatprep.subr.bf16.mxu1 %v6403_v54 }
 0x671   : > { %2383 = vmatpush1.bf16.msra.mxu0 %v6404_v55  ;;  %2424 = vmatpush1.bf16.msra.mxu1 %v6405_v56 }
 0x672   : > { %2384 = vmatprep.subr.bf16.mxu0 %v6406_v57  ;;  %2425 = vmatprep.subr.bf16.mxu1 %v6407_v58 }
 0x675   : > { %2385 = vmatpush1.bf16.msra.mxu0 %v6408_v59  ;;  %2426 = vmatpush1.bf16.msra.mxu1 %v6409_v60 }
 0x676   : > { %2386 = vmatprep.subr.bf16.mxu0 %v6410_v61  ;;  %2427 = vmatprep.subr.bf16.mxu1 %v6411_v62 }
 0x679   : > { %2387 = vmatpush1.bf16.msra.mxu0 %v6412_v63  ;;  %2428 = vmatpush1.bf16.msra.mxu1 %v6413_v1 }
 0x67a   : > { %2388 = vmatprep.subr.bf16.mxu0 %v6414_v2  ;;  %2429 = vmatprep.subr.bf16.mxu1 %v6415_v3  ;;  %v6454_v3 = vld [vmem:[#allocation17_spill] sm:$0xff] }
 0x67d   : > { %2389 = vmatpush1.bf16.msra.mxu0 %v6416_v4  ;;  %2430 = vmatpush1.bf16.msra.mxu1 %v6417_v5 }
 0x67e   : > { %2390 = vmatprep.subr.bf16.mxu0 %v6418_v6  ;;  %2431 = vmatprep.subr.bf16.mxu1 %v6419_v7  ;;  %v3125_v6 = vld [vmem:[%s3797_s30 + $0xa0] sm:$0xff]  ;;  %v3126_v7 = vld [vmem:[%s3797_s30 + $0xa8] sm:$0xff] }
 0x681   : > { %2391 = vmatpush1.bf16.msra.mxu0 %v6420_v8  ;;  %2432 = vmatpush1.bf16.msra.mxu1 %v6421_v10 }
 0x682   : > { %2392 = vmatprep.subr.bf16.mxu0 %v6422_v11  ;;  %2433 = vmatprep.subr.bf16.mxu1 %v6423_v12 }
 0x685   : > { %2393 = vmatpush1.bf16.msra.mxu0 %v6424_v14  ;;  %2434 = vmatpush1.bf16.msra.mxu1 %v6425_v15 }
 0x686   : > { %2394 = vmatprep.subr.bf16.mxu0 %v6426_v16  ;;  %2435 = vmatprep.subr.bf16.mxu1 %v6427_v17 }
 0x689   : > { %2395 = vmatpush1.bf16.msra.mxu0 %v6428_v18  ;;  %2436 = vmatpush1.bf16.msra.mxu1 %v6429_v19 }
 0x68a   : > { %2396 = vmatprep.subr.bf16.mxu0 %v6430_v20  ;;  %2437 = vmatprep.subr.bf16.mxu1 %v6431_v21 }
 0x68d   : > { %2397 = vmatpush1.bf16.msra.mxu0 %v6432_v22  ;;  %2438 = vmatpush1.bf16.msra.mxu1 %v6433_v32  ;;  %v3128_v22 = vld [vmem:[%s3797_s30 + $0xb8] sm:$0xff] }
 0x68e   : > { %2398 = vmatprep.subr.bf16.mxu0 %v6434_v36  ;;  %2439 = vmatprep.subr.bf16.mxu1 %v6435_v41 }
 0x691   : > { %2399 = vmatpush1.bf16.msra.mxu0 %v6436_v47  ;;  %2440 = vmatpush1.bf16.msra.mxu1 %v6437_v27  ;;  %v3127_v47 = vld [vmem:[%s3797_s30 + $0xb0] sm:$0xff] }
 0x692   : > { %2400 = vmatprep.subr.bf16.mxu0 %v6438_v33  ;;  %2441 = vmatprep.subr.bf16.mxu1 %v6439_v39 }
 0x695   : > { %2401 = vmatpush1.bf16.msra.mxu0 %v6440_v13  ;;  %2442 = vmatpush1.bf16.msra.mxu1 %v6441_v45 }
 0x696   : > { %2402 = vmatprep.subr.bf16.mxu0 %v6442_v40  ;;  %2443 = vmatprep.subr.bf16.mxu1 %v6443_v50 }
 0x699   : > { %2403 = vmatpush1.bf16.msra.mxu0 %v6444_v42  ;;  %2444 = vmatpush1.bf16.msra.mxu1 %v6445_v46 }
 0x69a   : > { %2404 = vmatprep.subr.bf16.mxu0 %v6446_v31  ;;  %2445 = vmatprep.subr.bf16.mxu1 %v6447_v37 }
 0x69d   : > { %2405 = vmatpush1.bf16.msra.mxu0 %v6448_v29  ;;  %2446 = vmatpush1.bf16.msra.mxu1 %v6449_v48 }
 0x69e   : > { %2406 = vmatprep.subr.bf16.mxu0 %v6450_v0  ;;  %2447 = vmatprep.subr.bf16.mxu1 %v6451_v43 }
 0x6a1   : > { %2407 = vmatpush1.bf16.msra.mxu0 %v6452_v28  ;;  %2448 = vmatpush1.bf16.msra.mxu1 %v6453_v34 }
 0x6a2   : > { %2495 = vmatprep.subr.bf16.mxu0 %v5348_v9  ;;  %2536 = vmatprep.subr.bf16.mxu1 %v5351_v25 }
 0x717   : > { %v2179_v24 = vpop.f32.mrb[36].mxu0  ;;  %v2220_v26 = vpop.f32.mrb[36].mxu1 }
 0x718   : > { %v3122_v35 = vmul.f32 -1.442695, %v2179_v24  ;;  %v2181_v38 = vpop.f32.mrb[37].mxu0  ;;  %v2222_v49 = vpop.f32.mrb[37].mxu1 }
 0x719   : > { %v3123_v51 = vmul.f32 -1.442695, %v2181_v38  ;;  %v2183_v52 = vpop.f32.mrb[38].mxu0  ;;  %v2224_v23 = vpop.f32.mrb[38].mxu1  ;;  %v3124_v55 = vmul.f32 -1.442695, %v2222_v49 }
 0x71a   : > { %3347 = vpow2.f32 %v3122_v35  ;;  %v2184_v53 = vpop.f32.mrb[39].mxu0  ;;  %v2225_v54 = vpop.f32.mrb[39].mxu1 }
 0x71b   : > { %3349 = vpow2.f32 %v3123_v51 }
 0x71c   : > { %3351 = vpow2.f32 %v3124_v55  ;;  %v5371_v55 = vld [vmem:[#allocation2] sm:$0xff] }
 0x71d   : > { %3353 = vtanh.f32 %v2220_v26 }
 0x724   : > { %v3348_v56 = vpop.eup %3347 }
 0x725   : > { %v3350_v57 = vpop.eup %3349  ;;  %v2230_v58 = vadd.f32 1.0, %v3348_v56  ;;  %v5374_v56 = vld [vmem:[#allocation2 + $0x10] sm:$0xff] }
 0x726   : > { %v2236_v59 = vadd.f32 1.0, %v3350_v57  ;;  %v3352_v60 = vpop.eup %3351  ;;  %v5380_v57 = vld [vmem:[#allocation2 + $0x38] sm:$0xff] }
 0x727   : > { %3355 = vrcp.f32 %v2230_v58  ;;  %v3354_v61 = vpop.eup %3353  ;;  %v2243_v2 = vadd.f32 1.0, %v3352_v60  ;;  %v5385_v58 = vld [vmem:[#allocation2 + $0x20] sm:$0xff]  ;;  %v5391_v60 = vld [vmem:[#allocation2 + $0x48] sm:$0xff] }
 0x728   : > { %3357 = vrcp.f32 %v2236_v59  ;;  %v5388_v59 = vld [vmem:[#allocation2 + $0x30] sm:$0xff] }
 0x729   : > { %3359 = vrcp.f32 %v2243_v2  ;;  %v5406_v2 = vld [vmem:[#allocation2 + $0x78] sm:$0xff] }
 0x731   : > { %v3356_v62 = vpop.eup %3355 }
 0x732   : > { %v3358_v63 = vpop.eup %3357  ;;  %v2247_v1 = vmul.f32 %v3356_v62, %v3354_v61  ;;  %v5394_v61 = vld [vmem:[#allocation2 + $0x58] sm:$0xff]  ;;  %v5397_v62 = vld [vmem:[#allocation2 + $0x40] sm:$0xff] }
 0x733   : > { %v2246_v4 = vmul.f32 %v3358_v63, %v6454_v3  ;;  %v3360_v36 = vpop.eup %3359  ;;  %v5400_v63 = vld [vmem:[#allocation2 + $0x50] sm:$0xff]  ;;  %v5409_v3 = vld [vmem:[#allocation2 + $0x60] sm:$0xff] }
 0x735   : > { %v5355_v5 = vadd.f32 %v2247_v1, %v2246_v4  ;;  %v5403_v1 = vld [vmem:[#allocation2 + $0x68] sm:$0xff]  ;;  %v5412_v4 = vld [vmem:[#allocation2 + $0x70] sm:$0xff] }
 0x737   : > { %3361 = vtanh.f32 %v5355_v5  ;;  %v2298_v8 = vpop.f32.mrb[40].mxu0  ;;  %v2339_v10 = vpop.f32.mrb[40].mxu1 }
 0x738   : > { %v2346_v11 = vadd.f32 %v3125_v6, %v2298_v8  ;;  %v2300_v12 = vpop.f32.mrb[41].mxu0  ;;  %v2341_v14 = vpop.f32.mrb[41].mxu1  ;;  %v2348_v39 = vadd.f32 %v3127_v47, %v2339_v10  ;;  %v5415_v6 = vld [vmem:[#allocation2 + $0x88] sm:$0xff]  ;;  %v5421_v8 = vld [vmem:[#allocation2 + $0x80] sm:$0xff]  ;;  %v5424_v10 = vld [vmem:[#allocation2 + $0x90] sm:$0xff] }
 0x739   : > { %v2347_v15 = vadd.f32 %v3126_v7, %v2300_v12  ;;  %v2302_v16 = vpop.f32.mrb[42].mxu0  ;;  %v2343_v17 = vpop.f32.mrb[42].mxu1  ;;  %v2349_v32 = vadd.f32 %v3128_v22, %v2341_v14  ;;  %v5418_v7 = vld [vmem:[#allocation2 + $0x98] sm:$0xff]  ;;  %v5433_v14 = vld [vmem:[#allocation2 + $0xa0] sm:$0xff] }
 0x73a   : > { %v3129_v18 = vmul.f32 -1.442695, %v2346_v11  ;;  %v2303_v19 = vpop.f32.mrb[43].mxu0  ;;  %v2344_v20 = vpop.f32.mrb[43].mxu1  ;;  %v5427_v11 = vld [vmem:[#allocation2 + $0xa8] sm:$0xff]  ;;  %v5430_v12 = vld [vmem:[#allocation2 + $0xb8] sm:$0xff] }
 0x73b   : > { %v3130_v21 = vmul.f32 -1.442695, %v2347_v15  ;;  %v3131_v33 = vmul.f32 -1.442695, %v2349_v32  ;;  %v5436_v15 = vld [vmem:[#allocation2 + $0xb0] sm:$0xff]  ;;  %v5439_v16 = vld [vmem:[#allocation2 + $0xc8] sm:$0xff] }
 0x73c   : > { %3363 = vpow2.f32 %v3129_v18  ;;  %v5442_v17 = vld [vmem:[#allocation2 + $0xd8] sm:$0xff]  ;;  %v5445_v18 = vld [vmem:[#allocation2 + $0xc0] sm:$0xff]  ;;  %v5448_v19 = vld [vmem:[#allocation2 + $0xd0] sm:$0xff] }
 0x73d   : > { %3365 = vpow2.f32 %v3130_v21  ;;  %v5451_v20 = vld [vmem:[#allocation2 + $0xe8] sm:$0xff]  ;;  %v5454_v21 = vld [vmem:[#allocation2 + $0xf8] sm:$0xff]  ;;  %v5457_v22 = vld [vmem:[#allocation2 + $0xe0] sm:$0xff] }
 0x73e   : > { %3367 = vpow2.f32 %v3131_v33  ;;  %v5460_v32 = vld [vmem:[#allocation2 + $0xf0] sm:$0xff]  ;;  %v5471_v47 = vld [vmem:[#allocation3] sm:$0xff]  ;;  %v5477_v33 = vld [vmem:[#allocation3 + $0x28] sm:$0xff] }
 0x73f   : > { %3369 = vtanh.f32 %v2348_v39  ;;  %v5480_v39 = vld [vmem:[#allocation3 + $0x38] sm:$0xff] }
 0x741   : > { %v3362_v41 = vpop.eup %3361 }
 0x742   : > { %v2250_v27 = vmul.f32 %v3362_v41, %v3360_v36  ;;  %v5463_v36 = vld [vmem:[#allocation3 + $0x8] sm:$0xff]  ;;  %v5466_v41 = vld [vmem:[#allocation3 + $0x18] sm:$0xff] }
 0x744   : > { %v2251_v13 = vrot.slane %v2250_v27, 4  ;;  %v2375_v45 = vpack.c.bf16 %v2250_v27, %v2250_v27 }
 0x746   : > { %v3364_v40 = vpop.eup %3363  ;;  %v2252_v50 = vadd.f32 %v2251_v13, %v2250_v27  ;;  %2408 = vmatprep.mubr.bf16.mxu0 %v2375_v45  ;;  %2449 = vmatprep.mubr.bf16.mxu1 %v2375_v45  ;;  %v5474_v27 = vld [vmem:[#allocation3 + $0x10] sm:$0xff]  ;;  %v5483_v13 = vld [vmem:[#allocation3 + $0x20] sm:$0xff] }
 0x747   : > { %v3366_v42 = vpop.eup %3365  ;;  %v2353_v46 = vadd.f32 1.0, %v3364_v40  ;;  %v5486_v45 = vld [vmem:[#allocation3 + $0x30] sm:$0xff]  ;;  %v5489_v40 = vld [vmem:[#allocation3 + $0x48] sm:$0xff] }
 0x748   : > { %v2359_v31 = vadd.f32 1.0, %v3366_v42  ;;  %v2253_v37 = vrot.slane %v2252_v50, 2  ;;  %v3368_v28 = vpop.eup %3367  ;;  %v5495_v42 = vld [vmem:[#allocation3 + $0x40] sm:$0xff] }
 0x749   : > { %3371 = vrcp.f32 %v2353_v46  ;;  %v3370_v34 = vpop.eup %3369  ;;  %v2366_v38 = vadd.f32 1.0, %v3368_v28  ;;  %6456 = vst [vmem:[#allocation73_spill] sm:$0xff] %v5495_v42  ;;  %v5498_v46 = vld [vmem:[#allocation3 + $0x50] sm:$0xff]  ;;  %v5519_v28 = vld [vmem:[#allocation3 + $0x80] sm:$0xff] }
 0x74a   : > { %3373 = vrcp.f32 %v2359_v31  ;;  %v2254_v29 = vadd.f32 %v2253_v37, %v2252_v50  ;;  %v5492_v50 = vld [vmem:[#allocation3 + $0x58] sm:$0xff]  ;;  %6457 = vst [vmem:[#allocation19_spill] sm:$0xff] %v5498_v46  ;;  %v5501_v31 = vld [vmem:[#allocation3 + $0x68] sm:$0xff]  ;;  %6464 = vst [vmem:[#allocation26_spill] sm:$0xff] %v5519_v28 }
 0x74b   : > { %3375 = vrcp.f32 %v2366_v38  ;;  %6455 = vst [vmem:[#allocation18_spill] sm:$0xff] %v5492_v50  ;;  %6458 = vst [vmem:[#allocation21_spill] sm:$0xff] %v5501_v31  ;;  %v5504_v37 = vld [vmem:[#allocation3 + $0x78] sm:$0xff]  ;;  %v5534_v38 = vld [vmem:[#allocation3 + $0xb0] sm:$0xff] }
 0x74c   : > { %v2255_v48 = vrot.slane %v2254_v29, 1  ;;  %6459 = vst [vmem:[#allocation20_spill] sm:$0xff] %v5504_v37  ;;  %6469 = vst [vmem:[#allocation31_spill] sm:$0xff] %v5534_v38 }
 0x74e   : > { %v2256_v0 = vadd.f32 %v2255_v48, %v2254_v29  ;;  %v5507_v29 = vld [vmem:[#allocation3 + $0x60] sm:$0xff]  ;;  %v5510_v48 = vld [vmem:[#allocation3 + $0x70] sm:$0xff] }
 0x74f   : > { %6460 = vst [vmem:[#allocation22_spill] sm:$0xff] %v5507_v29  ;;  %6461 = vst [vmem:[#allocation23_spill] sm:$0xff] %v5510_v48 }
 0x750   : > { %v2257_v43 = vmul.f32 0.5, %v2256_v0  ;;  %v5513_v0 = vld [vmem:[#allocation3 + $0x88] sm:$0xff] }
 0x751   : > { %6462 = vst [vmem:[#allocation24_spill] sm:$0xff] %v5513_v0 }
 0x752   : > { %2258 = vst [vmem:[%s3799_s4 + $0x4] sm:$0x1] %v2257_v43  ;;  %v5516_v43 = vld [vmem:[#allocation3 + $0x98] sm:$0xff] }
 0x753   : > { %v3372_v24 = vpop.eup %3371  ;;  %6463 = vst [vmem:[#allocation25_spill] sm:$0xff] %v5516_v43 }
 0x754   : > { %v3374_v26 = vpop.eup %3373  ;;  %v2370_v35 = vmul.f32 %v3372_v24, %v3370_v34  ;;  %v5522_v34 = vld [vmem:[#allocation3 + $0x90] sm:$0xff]  ;;  %v5525_v24 = vld [vmem:[#allocation3 + $0xa8] sm:$0xff] }
 0x755   : > { %v2369_v49 = vmul.f32 %v3374_v26, %v5249_v44  ;;  %v3376_v52 = vpop.eup %3375  ;;  %v5377_v44 = vld [vmem:[#allocation2 + $0x28] sm:$0xff]  ;;  %6465 = vst [vmem:[#allocation27_spill] sm:$0xff] %v5522_v34  ;;  %6466 = vst [vmem:[#allocation28_spill] sm:$0xff] %v5525_v24  ;;  %v5528_v26 = vld [vmem:[#allocation3 + $0xb8] sm:$0xff] }
 0x756   : > { %6467 = vst [vmem:[#allocation29_spill] sm:$0xff] %v5528_v26 }
 0x757   : > { %v5364_v51 = vadd.f32 %v2370_v35, %v2369_v49  ;;  %v5531_v35 = vld [vmem:[#allocation3 + $0xa0] sm:$0xff]  ;;  %v5537_v49 = vld [vmem:[#allocation3 + $0xc8] sm:$0xff] }
 0x758   : > { %6468 = vst [vmem:[#allocation30_spill] sm:$0xff] %v5531_v35  ;;  %6470 = vst [vmem:[#allocation32_spill] sm:$0xff] %v5537_v49 }
 0x759   : > { %3377 = vtanh.f32 %v5364_v51 }
 0x763   : > { %v3378_v23 = vpop.eup %3377 }
 0x764   : > { %v2373_v53 = vmul.f32 %v3378_v23, %v3376_v52  ;;  %v5540_v52 = vld [vmem:[#allocation3 + $0xd8] sm:$0xff]  ;;  %v5543_v23 = vld [vmem:[#allocation3 + $0xc0] sm:$0xff] }
 0x765   : > { %6471 = vst [vmem:[#allocation33_spill] sm:$0xff] %v5540_v52  ;;  %6472 = vst [vmem:[#allocation34_spill] sm:$0xff] %v5543_v23 }
 0x766   : > { %v5367_v54 = vpack.c.bf16 %v2373_v53, %v2373_v53  ;;  %v5546_v53 = vld [vmem:[#allocation3 + $0xd0] sm:$0xff] }
 0x767   : > { %6473 = vst [vmem:[#allocation35_spill] sm:$0xff] %v5546_v53 }
 0x768   : > { %2409 = vmatmul.mubr.bf16.vlgmr.msra.gmra.mrb[44].mxu0 %v5367_v54  ;;  %2450 = vmatmul.mubr.bf16.vlgmr.msra.gmra.mrb[44].mxu1 %v5367_v54 }
 0x769   : > { %2496 = vmatpush1.bf16.msra.mxu0 %v5371_v55  ;;  %2537 = vmatpush1.bf16.msra.mxu1 %v5374_v56 }
 0x76a   : > { %2497 = vmatprep.subr.bf16.mxu0 %v5377_v44  ;;  %2538 = vmatprep.subr.bf16.mxu1 %v5380_v57 }
 0x76b   : > { %2527 = vmatprep.mubr.bf16.mxu0 %v6172_v30  ;;  %2568 = vmatprep.mubr.bf16.mxu1 %v6172_v30 }
 0x76d   : > { %2498 = vmatpush1.bf16.msra.mxu0 %v5385_v58  ;;  %2539 = vmatpush1.bf16.msra.mxu1 %v5388_v59 }
 0x76e   : > { %2499 = vmatprep.subr.bf16.mxu0 %v5391_v60  ;;  %2540 = vmatprep.subr.bf16.mxu1 %v5394_v61 }
 0x771   : > { %2500 = vmatpush1.bf16.msra.mxu0 %v5397_v62  ;;  %2541 = vmatpush1.bf16.msra.mxu1 %v5400_v63 }
 0x772   : > { %2501 = vmatprep.subr.bf16.mxu0 %v5403_v1  ;;  %2542 = vmatprep.subr.bf16.mxu1 %v5406_v2 }
 0x775   : > { %2502 = vmatpush1.bf16.msra.mxu0 %v5409_v3  ;;  %2543 = vmatpush1.bf16.msra.mxu1 %v5412_v4 }
 0x776   : > { %2503 = vmatprep.subr.bf16.mxu0 %v5415_v6  ;;  %2544 = vmatprep.subr.bf16.mxu1 %v5418_v7 }
 0x779   : > { %2504 = vmatpush1.bf16.msra.mxu0 %v5421_v8  ;;  %2545 = vmatpush1.bf16.msra.mxu1 %v5424_v10 }
 0x77a   : > { %2505 = vmatprep.subr.bf16.mxu0 %v5427_v11  ;;  %2546 = vmatprep.subr.bf16.mxu1 %v5430_v12 }
 0x77d   : > { %2506 = vmatpush1.bf16.msra.mxu0 %v5433_v14  ;;  %2547 = vmatpush1.bf16.msra.mxu1 %v5436_v15 }
 0x77e   : > { %2507 = vmatprep.subr.bf16.mxu0 %v5439_v16  ;;  %2548 = vmatprep.subr.bf16.mxu1 %v5442_v17 }
 0x781   : > { %2508 = vmatpush1.bf16.msra.mxu0 %v5445_v18  ;;  %2549 = vmatpush1.bf16.msra.mxu1 %v5448_v19 }
 0x782   : > { %2509 = vmatprep.subr.bf16.mxu0 %v5451_v20  ;;  %2550 = vmatprep.subr.bf16.mxu1 %v5454_v21 }
 0x785   : > { %2510 = vmatpush1.bf16.msra.mxu0 %v5457_v22  ;;  %2551 = vmatpush1.bf16.msra.mxu1 %v5460_v32 }
 0x786   : > { %2607 = vmatprep.subr.bf16.mxu0 %v5463_v36  ;;  %2648 = vmatprep.subr.bf16.mxu1 %v5466_v41 }
 0x788   : > { %2528 = vmatmul.mubr.bf16.vlgmr.msra.gmra.mrb[48].mxu0 %v5367_v54  ;;  %2569 = vmatmul.mubr.bf16.vlgmr.msra.gmra.mrb[48].mxu1 %v5367_v54  ;;  %v5549_v54 = vld [vmem:[#allocation3 + $0xe8] sm:$0xff] }
 0x789   : > { %2608 = vmatpush1.bf16.msra.mxu0 %v5471_v47  ;;  %2649 = vmatpush1.bf16.msra.mxu1 %v5474_v27  ;;  %6474 = vst [vmem:[#allocation36_spill] sm:$0xff] %v5549_v54 }
 0x78a   : > { %2609 = vmatprep.subr.bf16.mxu0 %v5477_v33  ;;  %2650 = vmatprep.subr.bf16.mxu1 %v5480_v39 }
 0x78d   : > { %2610 = vmatpush1.bf16.msra.mxu0 %v5483_v13  ;;  %2651 = vmatpush1.bf16.msra.mxu1 %v5486_v45 }
 0x78e   : > { %2611 = vmatprep.subr.bf16.mxu0 %v5489_v40  ;;  %2652 = vmatprep.subr.bf16.mxu1 %v5492_v50 }
 0x791   : > { %2612 = vmatpush1.bf16.msra.mxu0 %v5495_v42  ;;  %2653 = vmatpush1.bf16.msra.mxu1 %v5498_v46 }
 0x792   : > { %2613 = vmatprep.subr.bf16.mxu0 %v5501_v31  ;;  %2654 = vmatprep.subr.bf16.mxu1 %v5504_v37 }
 0x795   : > { %2614 = vmatpush1.bf16.msra.mxu0 %v5507_v29  ;;  %2655 = vmatpush1.bf16.msra.mxu1 %v5510_v48 }
 0x796   : > { %2615 = vmatprep.subr.bf16.mxu0 %v5513_v0  ;;  %2656 = vmatprep.subr.bf16.mxu1 %v5516_v43 }
 0x799   : > { %2616 = vmatpush1.bf16.msra.mxu0 %v5519_v28  ;;  %2657 = vmatpush1.bf16.msra.mxu1 %v5522_v34 }
 0x79a   : > { %2617 = vmatprep.subr.bf16.mxu0 %v5525_v24  ;;  %2658 = vmatprep.subr.bf16.mxu1 %v5528_v26 }
 0x79d   : > { %2618 = vmatpush1.bf16.msra.mxu0 %v5531_v35  ;;  %2659 = vmatpush1.bf16.msra.mxu1 %v5534_v38  ;;  %v5552_v38 = vld [vmem:[#allocation3 + $0xf8] sm:$0xff] }
 0x79e   : > { %2619 = vmatprep.subr.bf16.mxu0 %v5537_v49  ;;  %2660 = vmatprep.subr.bf16.mxu1 %v5540_v52  ;;  %6475 = vst [vmem:[#allocation37_spill] sm:$0xff] %v5552_v38  ;;  %v5555_v49 = vld [vmem:[#allocation3 + $0xe0] sm:$0xff]  ;;  %v5558_v52 = vld [vmem:[#allocation3 + $0xf0] sm:$0xff] }
 0x79f   : > { %6476 = vst [vmem:[#allocation38_spill] sm:$0xff] %v5555_v49  ;;  %6477 = vst [vmem:[#allocation39_spill] sm:$0xff] %v5558_v52 }
 0x7a1   : > { %2620 = vmatpush1.bf16.msra.mxu0 %v5543_v23  ;;  %2661 = vmatpush1.bf16.msra.mxu1 %v5546_v53  ;;  %v5561_v23 = vld [vmem:[#allocation3 + $0x108] sm:$0xff]  ;;  %v5564_v53 = vld [vmem:[#allocation3 + $0x118] sm:$0xff] }
 0x7a2   : > { %2621 = vmatprep.subr.bf16.mxu0 %v5549_v54  ;;  %2662 = vmatprep.subr.bf16.mxu1 %v5552_v38  ;;  %6478 = vst [vmem:[#allocation40_spill] sm:$0xff] %v5561_v23  ;;  %6479 = vst [vmem:[#allocation41_spill] sm:$0xff] %v5564_v53  ;;  %v5567_v54 = vld [vmem:[#allocation3 + $0x100] sm:$0xff]  ;;  %v5570_v38 = vld [vmem:[#allocation3 + $0x110] sm:$0xff] }
 0x7a3   : > { %6480 = vst [vmem:[#allocation42_spill] sm:$0xff] %v5567_v54  ;;  %6481 = vst [vmem:[#allocation43_spill] sm:$0xff] %v5570_v38 }
 0x7a5   : > { %2622 = vmatpush1.bf16.msra.mxu0 %v5555_v49  ;;  %2663 = vmatpush1.bf16.msra.mxu1 %v5558_v52  ;;  %v5573_v49 = vld [vmem:[#allocation3 + $0x128] sm:$0xff]  ;;  %v5576_v52 = vld [vmem:[#allocation3 + $0x138] sm:$0xff] }
 0x7a6   : > { %2623 = vmatprep.subr.bf16.mxu0 %v5561_v23  ;;  %2664 = vmatprep.subr.bf16.mxu1 %v5564_v53  ;;  %6482 = vst [vmem:[#allocation44_spill] sm:$0xff] %v5573_v49  ;;  %6483 = vst [vmem:[#allocation45_spill] sm:$0xff] %v5576_v52  ;;  %v5579_v23 = vld [vmem:[#allocation3 + $0x120] sm:$0xff]  ;;  %v5582_v53 = vld [vmem:[#allocation3 + $0x130] sm:$0xff] }
 0x7a7   : > { %6484 = vst [vmem:[#allocation46_spill] sm:$0xff] %v5579_v23  ;;  %6485 = vst [vmem:[#allocation47_spill] sm:$0xff] %v5582_v53 }
 0x7a9   : > { %2624 = vmatpush1.bf16.msra.mxu0 %v5567_v54  ;;  %2665 = vmatpush1.bf16.msra.mxu1 %v5570_v38  ;;  %v5585_v54 = vld [vmem:[#allocation3 + $0x148] sm:$0xff]  ;;  %v5588_v38 = vld [vmem:[#allocation3 + $0x158] sm:$0xff] }
 0x7aa   : > { %2625 = vmatprep.subr.bf16.mxu0 %v5573_v49  ;;  %2666 = vmatprep.subr.bf16.mxu1 %v5576_v52  ;;  %6486 = vst [vmem:[#allocation48_spill] sm:$0xff] %v5585_v54  ;;  %6487 = vst [vmem:[#allocation49_spill] sm:$0xff] %v5588_v38  ;;  %v5591_v49 = vld [vmem:[#allocation3 + $0x140] sm:$0xff]  ;;  %v5594_v52 = vld [vmem:[#allocation3 + $0x150] sm:$0xff] }
 0x7ab   : > { %6488 = vst [vmem:[#allocation50_spill] sm:$0xff] %v5591_v49  ;;  %6489 = vst [vmem:[#allocation51_spill] sm:$0xff] %v5594_v52 }
 0x7ad   : > { %2626 = vmatpush1.bf16.msra.mxu0 %v5579_v23  ;;  %2667 = vmatpush1.bf16.msra.mxu1 %v5582_v53  ;;  %v5597_v23 = vld [vmem:[#allocation3 + $0x168] sm:$0xff]  ;;  %v5600_v53 = vld [vmem:[#allocation3 + $0x178] sm:$0xff] }
 0x7ae   : > { %2627 = vmatprep.subr.bf16.mxu0 %v5585_v54  ;;  %2668 = vmatprep.subr.bf16.mxu1 %v5588_v38  ;;  %6490 = vst [vmem:[#allocation52_spill] sm:$0xff] %v5597_v23  ;;  %6491 = vst [vmem:[#allocation53_spill] sm:$0xff] %v5600_v53  ;;  %v5603_v54 = vld [vmem:[#allocation3 + $0x160] sm:$0xff]  ;;  %v5606_v38 = vld [vmem:[#allocation3 + $0x170] sm:$0xff] }
 0x7af   : > { %6492 = vst [vmem:[#allocation54_spill] sm:$0xff] %v5603_v54  ;;  %6493 = vst [vmem:[#allocation55_spill] sm:$0xff] %v5606_v38 }
 0x7b1   : > { %2628 = vmatpush1.bf16.msra.mxu0 %v5591_v49  ;;  %2669 = vmatpush1.bf16.msra.mxu1 %v5594_v52  ;;  %v5609_v49 = vld [vmem:[#allocation3 + $0x188] sm:$0xff]  ;;  %v5612_v52 = vld [vmem:[#allocation3 + $0x198] sm:$0xff] }
 0x7b2   : > { %2629 = vmatprep.subr.bf16.mxu0 %v5597_v23  ;;  %2670 = vmatprep.subr.bf16.mxu1 %v5600_v53  ;;  %6494 = vst [vmem:[#allocation56_spill] sm:$0xff] %v5609_v49  ;;  %6495 = vst [vmem:[#allocation57_spill] sm:$0xff] %v5612_v52  ;;  %v5615_v23 = vld [vmem:[#allocation3 + $0x180] sm:$0xff]  ;;  %v5618_v53 = vld [vmem:[#allocation3 + $0x190] sm:$0xff] }
 0x7b3   : > { %6496 = vst [vmem:[#allocation58_spill] sm:$0xff] %v5615_v23  ;;  %6497 = vst [vmem:[#allocation59_spill] sm:$0xff] %v5618_v53 }
 0x7b5   : > { %2630 = vmatpush1.bf16.msra.mxu0 %v5603_v54  ;;  %2671 = vmatpush1.bf16.msra.mxu1 %v5606_v38  ;;  %v5621_v54 = vld [vmem:[#allocation3 + $0x1a8] sm:$0xff]  ;;  %v5624_v38 = vld [vmem:[#allocation3 + $0x1b8] sm:$0xff] }
 0x7b6   : > { %2631 = vmatprep.subr.bf16.mxu0 %v5609_v49  ;;  %2672 = vmatprep.subr.bf16.mxu1 %v5612_v52  ;;  %6498 = vst [vmem:[#allocation60_spill] sm:$0xff] %v5621_v54  ;;  %6499 = vst [vmem:[#allocation61_spill] sm:$0xff] %v5624_v38  ;;  %v5627_v49 = vld [vmem:[#allocation3 + $0x1a0] sm:$0xff]  ;;  %v5630_v52 = vld [vmem:[#allocation3 + $0x1b0] sm:$0xff] }
 0x7b7   : > { %6500 = vst [vmem:[#allocation62_spill] sm:$0xff] %v5627_v49  ;;  %6501 = vst [vmem:[#allocation63_spill] sm:$0xff] %v5630_v52 }
 0x7b9   : > { %2632 = vmatpush1.bf16.msra.mxu0 %v5615_v23  ;;  %2673 = vmatpush1.bf16.msra.mxu1 %v5618_v53  ;;  %v5633_v23 = vld [vmem:[#allocation3 + $0x1c8] sm:$0xff]  ;;  %v5636_v53 = vld [vmem:[#allocation3 + $0x1d8] sm:$0xff] }
 0x7ba   : > { %2633 = vmatprep.subr.bf16.mxu0 %v5621_v54  ;;  %2674 = vmatprep.subr.bf16.mxu1 %v5624_v38  ;;  %6502 = vst [vmem:[#allocation64_spill] sm:$0xff] %v5633_v23  ;;  %6503 = vst [vmem:[#allocation65_spill] sm:$0xff] %v5636_v53  ;;  %v5639_v54 = vld [vmem:[#allocation3 + $0x1c0] sm:$0xff]  ;;  %v5642_v38 = vld [vmem:[#allocation3 + $0x1d0] sm:$0xff] }
 0x7bb   : > { %6504 = vst [vmem:[#allocation66_spill] sm:$0xff] %v5639_v54  ;;  %6505 = vst [vmem:[#allocation67_spill] sm:$0xff] %v5642_v38 }
 0x7bd   : > { %2634 = vmatpush1.bf16.msra.mxu0 %v5627_v49  ;;  %2675 = vmatpush1.bf16.msra.mxu1 %v5630_v52  ;;  %v5645_v49 = vld [vmem:[#allocation3 + $0x1e8] sm:$0xff]  ;;  %v5648_v52 = vld [vmem:[#allocation3 + $0x1f8] sm:$0xff] }
 0x7be   : > { %2635 = vmatprep.subr.bf16.mxu0 %v5633_v23  ;;  %2676 = vmatprep.subr.bf16.mxu1 %v5636_v53  ;;  %6506 = vst [vmem:[#allocation68_spill] sm:$0xff] %v5645_v49  ;;  %6507 = vst [vmem:[#allocation69_spill] sm:$0xff] %v5648_v52  ;;  %v5651_v23 = vld [vmem:[#allocation3 + $0x1e0] sm:$0xff]  ;;  %v5654_v53 = vld [vmem:[#allocation3 + $0x1f0] sm:$0xff] }
 0x7bf   : > { %6508 = vst [vmem:[#allocation70_spill] sm:$0xff] %v5651_v23  ;;  %6509 = vst [vmem:[#allocation71_spill] sm:$0xff] %v5654_v53 }
 0x7c1   : > { %2636 = vmatpush1.bf16.msra.mxu0 %v5639_v54  ;;  %2677 = vmatpush1.bf16.msra.mxu1 %v5642_v38 }
 0x7c2   : > { %2637 = vmatprep.subr.bf16.mxu0 %v5645_v49  ;;  %2678 = vmatprep.subr.bf16.mxu1 %v5648_v52 }
 0x7c5   : > { %2638 = vmatpush1.bf16.msra.mxu0 %v5651_v23  ;;  %2679 = vmatpush1.bf16.msra.mxu1 %v5654_v53 }
 0x7c6   : > { %2726 = vmatprep.subr.bf16.mxu0 %v5348_v9  ;;  %2767 = vmatprep.subr.bf16.mxu1 %v5351_v25 }
 0x83b   : > { %v2410_v38 = vpop.f32.mrb[44].mxu0  ;;  %v2451_v54 = vpop.f32.mrb[44].mxu1 }
 0x83c   : > { %v3132_v35 = vmul.f32 -1.442695, %v2410_v38  ;;  %v2412_v49 = vpop.f32.mrb[45].mxu0  ;;  %v2453_v26 = vpop.f32.mrb[45].mxu1 }
 0x83d   : > { %v3133_v24 = vmul.f32 -1.442695, %v2412_v49  ;;  %v2414_v34 = vpop.f32.mrb[46].mxu0  ;;  %v2455_v52 = vpop.f32.mrb[46].mxu1  ;;  %v3134_v23 = vmul.f32 -1.442695, %v2453_v26 }
 0x83e   : > { %3379 = vpow2.f32 %v3132_v35  ;;  %v2415_v28 = vpop.f32.mrb[47].mxu0  ;;  %v2456_v43 = vpop.f32.mrb[47].mxu1 }
 0x83f   : > { %3381 = vpow2.f32 %v3133_v24  ;;  %v3135_v24 = vld [vmem:[%s3797_s30 + $0xc0] sm:$0xff] }
 0x840   : > { %3383 = vpow2.f32 %v3134_v23 }
 0x841   : > { %3385 = vtanh.f32 %v2451_v54 }
 0x848   : > { %v3380_v0 = vpop.eup %3379 }
 0x849   : > { %v3382_v53 = vpop.eup %3381  ;;  %v2461_v48 = vadd.f32 1.0, %v3380_v0  ;;  %v3136_v0 = vld [vmem:[%s3797_s30 + $0xc8] sm:$0xff] }
 0x84a   : > { %v2467_v9 = vadd.f32 1.0, %v3382_v53  ;;  %v3384_v25 = vpop.eup %3383 }
 0x84b   : > { %3387 = vrcp.f32 %v2461_v48  ;;  %v3386_v38 = vpop.eup %3385  ;;  %v2474_v35 = vadd.f32 1.0, %v3384_v25 }
 0x84c   : > { %3389 = vrcp.f32 %v2467_v9 }
 0x84d   : > { %3391 = vrcp.f32 %v2474_v35 }
 0x855   : > { %v3388_v49 = vpop.eup %3387 }
 0x856   : > { %v3390_v34 = vpop.eup %3389  ;;  %v2478_v52 = vmul.f32 %v3388_v49, %v3386_v38 }
 0x857   : > { %v2477_v43 = vmul.f32 %v3390_v34, %v5355_v5 }
 0x859   : > { %v5660_v28 = vadd.f32 %v2478_v52, %v2477_v43  ;;  %v3138_v52 = vld [vmem:[%s3797_s30 + $0xd8] sm:$0xff]  ;;  %v3392_v43 = vpop.eup %3391 }
 0x85b   : > { %6510 = vst [vmem:[#allocation72_spill] sm:$0xff] %v5660_v28  ;;  %3393 = vtanh.f32 %v5660_v28  ;;  %v2529_v26 = vpop.f32.mrb[48].mxu0  ;;  %v2570_v23 = vpop.f32.mrb[48].mxu1  ;;  %v3137_v28 = vld [vmem:[%s3797_s30 + $0xd0] sm:$0xff] }
 0x85c   : > { %v2577_v48 = vadd.f32 %v3135_v24, %v2529_v26  ;;  %v2531_v53 = vpop.f32.mrb[49].mxu0  ;;  %v2572_v54 = vpop.f32.mrb[49].mxu1  ;;  %v2579_v24 = vadd.f32 %v3137_v28, %v2570_v23 }
 0x85d   : > { %v2578_v9 = vadd.f32 %v3136_v0, %v2531_v53  ;;  %v2533_v29 = vpop.f32.mrb[50].mxu0  ;;  %v2574_v38 = vpop.f32.mrb[50].mxu1  ;;  %v2580_v35 = vadd.f32 %v3138_v52, %v2572_v54 }
 0x85e   : > { %v3139_v25 = vmul.f32 -1.442695, %v2577_v48  ;;  %v2534_v49 = vpop.f32.mrb[51].mxu0  ;;  %v2575_v5 = vpop.f32.mrb[51].mxu1 }
 0x85f   : > { %v3140_v34 = vmul.f32 -1.442695, %v2578_v9  ;;  %v3141_v46 = vmul.f32 -1.442695, %v2580_v35 }
 0x860   : > { %3395 = vpow2.f32 %v3139_v25 }
 0x861   : > { %3397 = vpow2.f32 %v3140_v34 }
 0x862   : > { %3399 = vpow2.f32 %v3141_v46 }
 0x863   : > { %3401 = vtanh.f32 %v2579_v24  ;;  %v6552_v24 = vld [vmem:[#allocation58_spill] sm:$0xff] }
 0x865   : > { %v3394_v37 = vpop.eup %3393 }
 0x866   : > { %v2481_v31 = vmul.f32 %v3394_v37, %v3392_v43 }
 0x868   : > { %v2482_v26 = vrot.slane %v2481_v31, 4  ;;  %v2606_v42 = vpack.c.bf16 %v2481_v31, %v2481_v31 }
 0x86a   : > { %v3396_v50 = vpop.eup %3395  ;;  %v2483_v0 = vadd.f32 %v2482_v26, %v2481_v31  ;;  %2639 = vmatprep.mubr.bf16.mxu0 %v2606_v42  ;;  %2680 = vmatprep.mubr.bf16.mxu1 %v2606_v42  ;;  %v6553_v26 = vld [vmem:[#allocation59_spill] sm:$0xff] }
 0x86b   : > { %v3398_v29 = vpop.eup %3397  ;;  %v2584_v48 = vadd.f32 1.0, %v3396_v50 }
 0x86c   : > { %v2590_v53 = vadd.f32 1.0, %v3398_v29  ;;  %v2484_v9 = vrot.slane %v2483_v0, 2  ;;  %v3400_v28 = vpop.eup %3399  ;;  %v6555_v29 = vld [vmem:[#allocation61_spill] sm:$0xff] }
 0x86d   : > { %3403 = vrcp.f32 %v2584_v48  ;;  %v3402_v23 = vpop.eup %3401  ;;  %v2597_v34 = vadd.f32 1.0, %v3400_v28  ;;  %v6556_v48 = vld [vmem:[#allocation62_spill] sm:$0xff]  ;;  %v6563_v28 = vld [vmem:[#allocation69_spill] sm:$0xff] }
 0x86e   : > { %3405 = vrcp.f32 %v2590_v53  ;;  %v2485_v54 = vadd.f32 %v2484_v9, %v2483_v0  ;;  %v6554_v0 = vld [vmem:[#allocation60_spill] sm:$0xff]  ;;  %v6557_v53 = vld [vmem:[#allocation63_spill] sm:$0xff] }
 0x86f   : > { %3407 = vrcp.f32 %v2597_v34  ;;  %v6558_v9 = vld [vmem:[#allocation64_spill] sm:$0xff] }
 0x870   : > { %v2486_v38 = vrot.slane %v2485_v54, 1 }
 0x872   : > { %v2487_v37 = vadd.f32 %v2486_v38, %v2485_v54  ;;  %v6559_v54 = vld [vmem:[#allocation65_spill] sm:$0xff]  ;;  %v6560_v38 = vld [vmem:[#allocation66_spill] sm:$0xff] }
 0x874   : > { %v2488_v25 = vmul.f32 0.5, %v2487_v37  ;;  %v6561_v37 = vld [vmem:[#allocation67_spill] sm:$0xff] }
 0x876   : > { %2489 = vst [vmem:[%s3799_s4 + $0x5] sm:$0x1] %v2488_v25  ;;  %v6562_v25 = vld [vmem:[#allocation68_spill] sm:$0xff] }
 0x877   : > { %v3404_v49 = vpop.eup %3403 }
 0x878   : > { %v3406_v31 = vpop.eup %3405  ;;  %v2601_v5 = vmul.f32 %v3404_v49, %v3402_v23  ;;  %v6564_v23 = vld [vmem:[#allocation70_spill] sm:$0xff]  ;;  %v6565_v49 = vld [vmem:[#allocation71_spill] sm:$0xff] }
 0x879   : > { %v2600_v42 = vmul.f32 %v3406_v31, %v5364_v51  ;;  %v3408_v46 = vpop.eup %3407  ;;  %v6512_v51 = vld [vmem:[#allocation73_spill] sm:$0xff] }
 0x87b   : > { %v5669_v50 = vadd.f32 %v2601_v5, %v2600_v42 }
 0x87d   : > { %3409 = vtanh.f32 %v5669_v50 }
 0x887   : > { %v3410_v52 = vpop.eup %3409 }
 0x888   : > { %v2604_v35 = vmul.f32 %v3410_v52, %v3408_v46 }
 0x88a   : > { %v2605_v43 = vpack.c.bf16 %v2604_v35, %v2604_v35 }
 0x88c   : > { %2640 = vmatmul.mubr.bf16.vlgmr.msra.gmra.mrb[52].mxu0 %v2605_v43  ;;  %2681 = vmatmul.mubr.bf16.vlgmr.msra.gmra.mrb[52].mxu1 %v2605_v43 }
 0x88d   : > { %2727 = vmatpush1.bf16.msra.mxu0 %v5371_v55  ;;  %2768 = vmatpush1.bf16.msra.mxu1 %v5374_v56  ;;  %v6513_v55 = vld [vmem:[#allocation19_spill] sm:$0xff]  ;;  %v6514_v56 = vld [vmem:[#allocation21_spill] sm:$0xff] }
 0x88e   : > { %2728 = vmatprep.subr.bf16.mxu0 %v5377_v44  ;;  %2769 = vmatprep.subr.bf16.mxu1 %v5380_v57  ;;  %v6515_v44 = vld [vmem:[#allocation20_spill] sm:$0xff]  ;;  %v6516_v57 = vld [vmem:[#allocation22_spill] sm:$0xff] }
 0x88f   : > { %2758 = vmatprep.mubr.bf16.mxu0 %v6172_v30  ;;  %2799 = vmatprep.mubr.bf16.mxu1 %v6172_v30  ;;  %v6511_v30 = vld [vmem:[#allocation18_spill] sm:$0xff] }
 0x891   : > { %2729 = vmatpush1.bf16.msra.mxu0 %v5385_v58  ;;  %2770 = vmatpush1.bf16.msra.mxu1 %v5388_v59  ;;  %v6517_v58 = vld [vmem:[#allocation23_spill] sm:$0xff]  ;;  %v6518_v59 = vld [vmem:[#allocation24_spill] sm:$0xff] }
 0x892   : > { %2730 = vmatprep.subr.bf16.mxu0 %v5391_v60  ;;  %2771 = vmatprep.subr.bf16.mxu1 %v5394_v61  ;;  %v6519_v60 = vld [vmem:[#allocation25_spill] sm:$0xff]  ;;  %v6520_v61 = vld [vmem:[#allocation26_spill] sm:$0xff] }
 0x895   : > { %2731 = vmatpush1.bf16.msra.mxu0 %v5397_v62  ;;  %2772 = vmatpush1.bf16.msra.mxu1 %v5400_v63  ;;  %v6521_v62 = vld [vmem:[#allocation27_spill] sm:$0xff]  ;;  %v6522_v63 = vld [vmem:[#allocation28_spill] sm:$0xff] }
 0x896   : > { %2732 = vmatprep.subr.bf16.mxu0 %v5403_v1  ;;  %2773 = vmatprep.subr.bf16.mxu1 %v5406_v2  ;;  %v6523_v1 = vld [vmem:[#allocation29_spill] sm:$0xff]  ;;  %v6524_v2 = vld [vmem:[#allocation30_spill] sm:$0xff] }
 0x899   : > { %2733 = vmatpush1.bf16.msra.mxu0 %v5409_v3  ;;  %2774 = vmatpush1.bf16.msra.mxu1 %v5412_v4  ;;  %v6525_v3 = vld [vmem:[#allocation31_spill] sm:$0xff]  ;;  %v6526_v4 = vld [vmem:[#allocation32_spill] sm:$0xff] }
 0x89a   : > { %2734 = vmatprep.subr.bf16.mxu0 %v5415_v6  ;;  %2775 = vmatprep.subr.bf16.mxu1 %v5418_v7  ;;  %v6527_v6 = vld [vmem:[#allocation33_spill] sm:$0xff]  ;;  %v6528_v7 = vld [vmem:[#allocation34_spill] sm:$0xff] }
 0x89d   : > { %2735 = vmatpush1.bf16.msra.mxu0 %v5421_v8  ;;  %2776 = vmatpush1.bf16.msra.mxu1 %v5424_v10  ;;  %v6529_v8 = vld [vmem:[#allocation35_spill] sm:$0xff]  ;;  %v6530_v10 = vld [vmem:[#allocation36_spill] sm:$0xff] }
 0x89e   : > { %2736 = vmatprep.subr.bf16.mxu0 %v5427_v11  ;;  %2777 = vmatprep.subr.bf16.mxu1 %v5430_v12  ;;  %v6531_v11 = vld [vmem:[#allocation37_spill] sm:$0xff]  ;;  %v6532_v12 = vld [vmem:[#allocation38_spill] sm:$0xff] }
 0x8a1   : > { %2737 = vmatpush1.bf16.msra.mxu0 %v5433_v14  ;;  %2778 = vmatpush1.bf16.msra.mxu1 %v5436_v15  ;;  %v6533_v14 = vld [vmem:[#allocation39_spill] sm:$0xff]  ;;  %v6534_v15 = vld [vmem:[#allocation40_spill] sm:$0xff] }
 0x8a2   : > { %2738 = vmatprep.subr.bf16.mxu0 %v5439_v16  ;;  %2779 = vmatprep.subr.bf16.mxu1 %v5442_v17  ;;  %v6535_v16 = vld [vmem:[#allocation41_spill] sm:$0xff]  ;;  %v6536_v17 = vld [vmem:[#allocation42_spill] sm:$0xff] }
 0x8a5   : > { %2739 = vmatpush1.bf16.msra.mxu0 %v5445_v18  ;;  %2780 = vmatpush1.bf16.msra.mxu1 %v5448_v19  ;;  %v6537_v18 = vld [vmem:[#allocation43_spill] sm:$0xff]  ;;  %v6538_v19 = vld [vmem:[#allocation44_spill] sm:$0xff] }
 0x8a6   : > { %2740 = vmatprep.subr.bf16.mxu0 %v5451_v20  ;;  %2781 = vmatprep.subr.bf16.mxu1 %v5454_v21  ;;  %v6539_v20 = vld [vmem:[#allocation45_spill] sm:$0xff]  ;;  %v6540_v21 = vld [vmem:[#allocation46_spill] sm:$0xff] }
 0x8a9   : > { %2741 = vmatpush1.bf16.msra.mxu0 %v5457_v22  ;;  %2782 = vmatpush1.bf16.msra.mxu1 %v5460_v32  ;;  %v6541_v22 = vld [vmem:[#allocation47_spill] sm:$0xff]  ;;  %v6542_v32 = vld [vmem:[#allocation48_spill] sm:$0xff] }
 0x8aa   : > { %2838 = vmatprep.subr.bf16.mxu0 %v5463_v36  ;;  %2879 = vmatprep.subr.bf16.mxu1 %v5466_v41  ;;  %v6543_v36 = vld [vmem:[#allocation49_spill] sm:$0xff]  ;;  %v6544_v41 = vld [vmem:[#allocation50_spill] sm:$0xff] }
 0x8ac   : > { %2759 = vmatmul.mubr.bf16.vlgmr.msra.gmra.mrb[56].mxu0 %v2605_v43  ;;  %2800 = vmatmul.mubr.bf16.vlgmr.msra.gmra.mrb[56].mxu1 %v2605_v43 }
 0x8ad   : > { %2839 = vmatpush1.bf16.msra.mxu0 %v5471_v47  ;;  %2880 = vmatpush1.bf16.msra.mxu1 %v5474_v27  ;;  %v6545_v47 = vld [vmem:[#allocation51_spill] sm:$0xff]  ;;  %v6546_v27 = vld [vmem:[#allocation52_spill] sm:$0xff] }
 0x8ae   : > { %2840 = vmatprep.subr.bf16.mxu0 %v5477_v33  ;;  %2881 = vmatprep.subr.bf16.mxu1 %v5480_v39  ;;  %v6547_v33 = vld [vmem:[#allocation53_spill] sm:$0xff]  ;;  %v6548_v39 = vld [vmem:[#allocation54_spill] sm:$0xff] }
 0x8b1   : > { %2841 = vmatpush1.bf16.msra.mxu0 %v5483_v13  ;;  %2882 = vmatpush1.bf16.msra.mxu1 %v5486_v45  ;;  %v6549_v13 = vld [vmem:[#allocation55_spill] sm:$0xff]  ;;  %v6550_v45 = vld [vmem:[#allocation56_spill] sm:$0xff] }
 0x8b2   : > { %2842 = vmatprep.subr.bf16.mxu0 %v5489_v40  ;;  %2883 = vmatprep.subr.bf16.mxu1 %v6511_v30  ;;  %v6551_v40 = vld [vmem:[#allocation57_spill] sm:$0xff] }
 0x8b5   : > { %2843 = vmatpush1.bf16.msra.mxu0 %v6512_v51  ;;  %2884 = vmatpush1.bf16.msra.mxu1 %v6513_v55 }
 0x8b6   : > { %2844 = vmatprep.subr.bf16.mxu0 %v6514_v56  ;;  %2885 = vmatprep.subr.bf16.mxu1 %v6515_v44 }
 0x8b9   : > { %2845 = vmatpush1.bf16.msra.mxu0 %v6516_v57  ;;  %2886 = vmatpush1.bf16.msra.mxu1 %v6517_v58 }
 0x8ba   : > { %2846 = vmatprep.subr.bf16.mxu0 %v6518_v59  ;;  %2887 = vmatprep.subr.bf16.mxu1 %v6519_v60 }
 0x8bd   : > { %2847 = vmatpush1.bf16.msra.mxu0 %v6520_v61  ;;  %2888 = vmatpush1.bf16.msra.mxu1 %v6521_v62 }
 0x8be   : > { %2848 = vmatprep.subr.bf16.mxu0 %v6522_v63  ;;  %2889 = vmatprep.subr.bf16.mxu1 %v6523_v1 }
 0x8c1   : > { %2849 = vmatpush1.bf16.msra.mxu0 %v6524_v2  ;;  %2890 = vmatpush1.bf16.msra.mxu1 %v6525_v3  ;;  %v6566_v2 = vld [vmem:[#allocation72_spill] sm:$0xff] }
 0x8c2   : > { %2850 = vmatprep.subr.bf16.mxu0 %v6526_v4  ;;  %2891 = vmatprep.subr.bf16.mxu1 %v6527_v6  ;;  %v3145_v6 = vld [vmem:[%s3797_s30 + $0xe0] sm:$0xff] }
 0x8c5   : > { %2851 = vmatpush1.bf16.msra.mxu0 %v6528_v7  ;;  %2892 = vmatpush1.bf16.msra.mxu1 %v6529_v8  ;;  %v3146_v7 = vld [vmem:[%s3797_s30 + $0xe8] sm:$0xff] }
 0x8c6   : > { %2852 = vmatprep.subr.bf16.mxu0 %v6530_v10  ;;  %2893 = vmatprep.subr.bf16.mxu1 %v6531_v11 }
 0x8c9   : > { %2853 = vmatpush1.bf16.msra.mxu0 %v6532_v12  ;;  %2894 = vmatpush1.bf16.msra.mxu1 %v6533_v14 }
 0x8ca   : > { %2854 = vmatprep.subr.bf16.mxu0 %v6534_v15  ;;  %2895 = vmatprep.subr.bf16.mxu1 %v6535_v16 }
 0x8cd   : > { %2855 = vmatpush1.bf16.msra.mxu0 %v6536_v17  ;;  %2896 = vmatpush1.bf16.msra.mxu1 %v6537_v18 }
 0x8ce   : > { %2856 = vmatprep.subr.bf16.mxu0 %v6538_v19  ;;  %2897 = vmatprep.subr.bf16.mxu1 %v6539_v20 }
 0x8d1   : > { %2857 = vmatpush1.bf16.msra.mxu0 %v6540_v21  ;;  %2898 = vmatpush1.bf16.msra.mxu1 %v6541_v22  ;;  %v3148_v22 = vld [vmem:[%s3797_s30 + $0xf8] sm:$0xff] }
 0x8d2   : > { %2858 = vmatprep.subr.bf16.mxu0 %v6542_v32  ;;  %2899 = vmatprep.subr.bf16.mxu1 %v6543_v36 }
 0x8d5   : > { %2859 = vmatpush1.bf16.msra.mxu0 %v6544_v41  ;;  %2900 = vmatpush1.bf16.msra.mxu1 %v6545_v47  ;;  %v3147_v47 = vld [vmem:[%s3797_s30 + $0xf0] sm:$0xff]  ;;  %s3156_s30 = sshll.u32 %s3763_s16, 7  ;;  %s3721_s16 = smov [#allocation9]  }
 0x8d6   : > { %2860 = vmatprep.subr.bf16.mxu0 %v6546_v27  ;;  %2901 = vmatprep.subr.bf16.mxu1 %v6547_v33  ;;  %s5784_s28 = scalar_lea.hbm %s5832_s3, %s3156_s30  ;;  %s3655_s6 = sshll.u32 %s3721_s16, 4  ;;  %s3656_s6 = int_to_ptr.vmem [resolvable:$false] %s3655_s6 }
 0x8d7   : > { %s3657_s7 = scalar_lea.vmem %s3656_s6, 256  ;;  %p3658_p1 = scmp.lt.s32.totalorder %s5786_s25, %s3656_s6 }
 0x8d8   : > { %p3659_p2 = scmp.lt.s32.totalorder %s3657_s7, %s3651_s5 }
 0x8d9   : > { %2861 = vmatpush1.bf16.msra.mxu0 %v6548_v39  ;;  %2902 = vmatpush1.bf16.msra.mxu1 %v6549_v13 }
 0x8da   : > { %2862 = vmatprep.subr.bf16.mxu0 %v6550_v45  ;;  %2903 = vmatprep.subr.bf16.mxu1 %v6551_v40  ;;  %p3660_p3 = por %p3659_p2, %p3658_p1 }
 0x8dc   : > { %p3661_p4 = pnand %p3660_p3, %p3654_p0 }
 0x8dd   : > { %2863 = vmatpush1.bf16.msra.mxu0 %v6552_v24  ;;  %2904 = vmatpush1.bf16.msra.mxu1 %v6553_v26 }
 0x8de   : > { %2864 = vmatprep.subr.bf16.mxu0 %v6554_v0  ;;  %2905 = vmatprep.subr.bf16.mxu1 %v6555_v29 }
 0x8e1   : > { %2865 = vmatpush1.bf16.msra.mxu0 %v6556_v48  ;;  %2906 = vmatpush1.bf16.msra.mxu1 %v6557_v53 }
 0x8e2   : > { %2866 = vmatprep.subr.bf16.mxu0 %v6558_v9  ;;  %2907 = vmatprep.subr.bf16.mxu1 %v6559_v54 }
 0x8e5   : > { %2867 = vmatpush1.bf16.msra.mxu0 %v6560_v38  ;;  %2908 = vmatpush1.bf16.msra.mxu1 %v6561_v37 }
 0x8e6   : > { %2868 = vmatprep.subr.bf16.mxu0 %v6562_v25  ;;  %2909 = vmatprep.subr.bf16.mxu1 %v6563_v28 }
 0x8e9   : > { %2869 = vmatpush1.bf16.msra.mxu0 %v6564_v23  ;;  %2910 = vmatpush1.bf16.msra.mxu1 %v6565_v49 }
 0x95f   : > { %v2641_v31 = vpop.f32.mrb[52].mxu0  ;;  %v2682_v5 = vpop.f32.mrb[52].mxu1 }
 0x960   : > { %v3142_v34 = vmul.f32 -1.442695, %v2641_v31  ;;  %v2643_v42 = vpop.f32.mrb[53].mxu0  ;;  %v2684_v46 = vpop.f32.mrb[53].mxu1 }
 0x961   : > { %v3143_v52 = vmul.f32 -1.442695, %v2643_v42  ;;  %v2645_v35 = vpop.f32.mrb[54].mxu0  ;;  %v2686_v43 = vpop.f32.mrb[54].mxu1  ;;  %v3144_v55 = vmul.f32 -1.442695, %v2684_v46 }
 0x962   : > { %3411 = vpow2.f32 %v3142_v34  ;;  %v2646_v30 = vpop.f32.mrb[55].mxu0  ;;  %v2687_v51 = vpop.f32.mrb[55].mxu1 }
 0x963   : > { %3413 = vpow2.f32 %v3143_v52 }
 0x964   : > { %3415 = vpow2.f32 %v3144_v55 }
 0x965   : > { %3417 = vtanh.f32 %v2682_v5 }
 0x96c   : > { %v3412_v56 = vpop.eup %3411 }
 0x96d   : > { %v3414_v44 = vpop.eup %3413  ;;  %v2692_v57 = vadd.f32 1.0, %v3412_v56 }
 0x96e   : > { %v2698_v58 = vadd.f32 1.0, %v3414_v44  ;;  %v3416_v59 = vpop.eup %3415 }
 0x96f   : > { %3419 = vrcp.f32 %v2692_v57  ;;  %v3418_v60 = vpop.eup %3417  ;;  %v2705_v1 = vadd.f32 1.0, %v3416_v59 }
 0x970   : > { %3421 = vrcp.f32 %v2698_v58 }
 0x971   : > { %3423 = vrcp.f32 %v2705_v1 }
 0x979   : > { %v3420_v61 = vpop.eup %3419 }
 0x97a   : > { %v3422_v62 = vpop.eup %3421  ;;  %v2709_v63 = vmul.f32 %v3420_v61, %v3418_v60 }
 0x97b   : > { %v2708_v3 = vmul.f32 %v3422_v62, %v6566_v2  ;;  %v3424_v36 = vpop.eup %3423 }
 0x97d   : > { %v5769_v4 = vadd.f32 %v2709_v63, %v2708_v3 }
 0x97f   : > { %3425 = vtanh.f32 %v5769_v4  ;;  %v2760_v8 = vpop.f32.mrb[56].mxu0  ;;  %v2801_v10 = vpop.f32.mrb[56].mxu1 }
 0x980   : > { %v2808_v11 = vadd.f32 %v3145_v6, %v2760_v8  ;;  %v2762_v12 = vpop.f32.mrb[57].mxu0  ;;  %v2803_v14 = vpop.f32.mrb[57].mxu1  ;;  %v2810_v39 = vadd.f32 %v3147_v47, %v2801_v10 }
 0x981   : > { %v2809_v15 = vadd.f32 %v3146_v7, %v2762_v12  ;;  %v2764_v16 = vpop.f32.mrb[58].mxu0  ;;  %v2805_v17 = vpop.f32.mrb[58].mxu1  ;;  %v2811_v32 = vadd.f32 %v3148_v22, %v2803_v14 }
 0x982   : > { %v3149_v18 = vmul.f32 -1.442695, %v2808_v11  ;;  %v2765_v19 = vpop.f32.mrb[59].mxu0  ;;  %v2806_v20 = vpop.f32.mrb[59].mxu1 }
 0x983   : > { %v3150_v21 = vmul.f32 -1.442695, %v2809_v15  ;;  %v3151_v33 = vmul.f32 -1.442695, %v2811_v32 }
 0x984   : > { %3427 = vpow2.f32 %v3149_v18 }
 0x985   : > { %3429 = vpow2.f32 %v3150_v21 }
 0x986   : > { %3431 = vpow2.f32 %v3151_v33 }
 0x987   : > { %3433 = vtanh.f32 %v2810_v39 }
 0x989   : > { %v3426_v41 = vpop.eup %3425 }
 0x98a   : > { %v2712_v27 = vmul.f32 %v3426_v41, %v3424_v36 }
 0x98c   : > { %v2713_v13 = vrot.slane %v2712_v27, 4  ;;  %v2837_v45 = vpack.c.bf16 %v2712_v27, %v2712_v27 }
 0x98e   : > { %v3428_v40 = vpop.eup %3427  ;;  %v2714_v24 = vadd.f32 %v2713_v13, %v2712_v27  ;;  %2870 = vmatprep.mubr.bf16.mxu0 %v2837_v45  ;;  %2911 = vmatprep.mubr.bf16.mxu1 %v2837_v45 }
 0x98f   : > { %v3430_v26 = vpop.eup %3429  ;;  %v2815_v0 = vadd.f32 1.0, %v3428_v40 }
 0x990   : > { %v2821_v29 = vadd.f32 1.0, %v3430_v26  ;;  %v2715_v48 = vrot.slane %v2714_v24, 2  ;;  %v3432_v37 = vpop.eup %3431 }
 0x991   : > { %3435 = vrcp.f32 %v2815_v0  ;;  %v3434_v25 = vpop.eup %3433  ;;  %v2828_v31 = vadd.f32 1.0, %v3432_v37 }
 0x992   : > { %3437 = vrcp.f32 %v2821_v29  ;;  %v2716_v53 = vadd.f32 %v2715_v48, %v2714_v24 }
 0x993   : > { %3439 = vrcp.f32 %v2828_v31 }
 0x994   : > { %v2717_v9 = vrot.slane %v2716_v53, 1 }
 0x996   : > { %v2718_v54 = vadd.f32 %v2717_v9, %v2716_v53 }
 0x998   : > { %v2719_v38 = vmul.f32 0.5, %v2718_v54 }
 0x99a   : > { %2720 = vst [vmem:[%s3799_s4 + $0x6] sm:$0x1] %v2719_v38 }
 0x99b   : > { %v3436_v28 = vpop.eup %3435 }
 0x99c   : > { %v3438_v23 = vpop.eup %3437  ;;  %v2832_v49 = vmul.f32 %v3436_v28, %v3434_v25 }
 0x99d   : > { %v2831_v5 = vmul.f32 %v3438_v23, %v5669_v50  ;;  %v3440_v42 = vpop.eup %3439 }
 0x99f   : > { %v2833_v34 = vadd.f32 %v2832_v49, %v2831_v5 }
 0x9a1   : > { %3441 = vtanh.f32 %v2833_v34  ;;  %2953 = vst [vmem:[#allocation6] sm:$0xff] %v2833_v34 }
 0x9ab   : > { %v3442_v46 = vpop.eup %3441 }
 0x9ac   : > { %v2835_v52 = vmul.f32 %v3442_v46, %v3440_v42 }
 0x9ae   : > { %v2836_v35 = vpack.c.bf16 %v2835_v52, %v2835_v52  ;;  %2952 = vst [vmem:[#allocation5] sm:$0xff] %v2835_v52 }
 0x9b0   : > { %2871 = vmatmul.mubr.bf16.vlgmr.msra.gmra.mrb[60].mxu0 %v2836_v35  ;;  %2912 = vmatmul.mubr.bf16.vlgmr.msra.gmra.mrb[60].mxu1 %v2836_v35 }
 0xa83   : > { %v2872_v43 = vpop.f32.mrb[60].mxu0  ;;  %v2913_v30 = vpop.f32.mrb[60].mxu1 }
 0xa84   : > { %v3152_v51 = vmul.f32 -1.442695, %v2872_v43  ;;  %v2874_v55 = vpop.f32.mrb[61].mxu0  ;;  %v2915_v56 = vpop.f32.mrb[61].mxu1 }
 0xa85   : > { %v3153_v44 = vmul.f32 -1.442695, %v2874_v55  ;;  %v2876_v57 = vpop.f32.mrb[62].mxu0  ;;  %v2917_v58 = vpop.f32.mrb[62].mxu1  ;;  %v3154_v60 = vmul.f32 -1.442695, %v2915_v56 }
 0xa86   : > { %3443 = vpow2.f32 %v3152_v51  ;;  %v2877_v50 = vpop.f32.mrb[63].mxu0  ;;  %v2918_v59 = vpop.f32.mrb[63].mxu1 }
 0xa87   : > { %3445 = vpow2.f32 %v3153_v44 }
 0xa88   : > { %3447 = vpow2.f32 %v3154_v60 }
 0xa89   : > { %3449 = vtanh.f32 %v2913_v30 }
 0xa90   : > { %v3444_v61 = vpop.eup %3443 }
 0xa91   : > { %v3446_v62 = vpop.eup %3445  ;;  %v2923_v63 = vadd.f32 1.0, %v3444_v61 }
 0xa92   : > { %v2929_v1 = vadd.f32 1.0, %v3446_v62  ;;  %v3448_v2 = vpop.eup %3447 }
 0xa93   : > { %3451 = vrcp.f32 %v2923_v63  ;;  %v3450_v3 = vpop.eup %3449  ;;  %v2936_v10 = vadd.f32 1.0, %v3448_v2 }
 0xa94   : > { %3453 = vrcp.f32 %v2929_v1 }
 0xa95   : > { %3455 = vrcp.f32 %v2936_v10 }
 0xa9d   : > { %v3452_v6 = vpop.eup %3451 }
 0xa9e   : > { %v3454_v7 = vpop.eup %3453  ;;  %v2940_v8 = vmul.f32 %v3452_v6, %v3450_v3 }
 0xa9f   : > { %v2939_v11 = vmul.f32 %v3454_v7, %v5769_v4  ;;  %v3456_v14 = vpop.eup %3455 }
 0xaa1   : > { %v2941_v12 = vadd.f32 %v2940_v8, %v2939_v11 }
 0xaa3   : > { %3457 = vtanh.f32 %v2941_v12  ;;  %2955 = vst [vmem:[#allocation8] sm:$0xff] %v2941_v12 }
 0xaad   : > { %v3458_v15 = vpop.eup %3457 }
 0xaae   : > { %v2943_v16 = vmul.f32 %v3458_v15, %v3456_v14 }
 0xab0   : > { %v2944_v17 = vrot.slane %v2943_v16, 4  ;;  %2954 = vst [vmem:[#allocation7] sm:$0xff] %v2943_v16 }
 0xab2   : > { %v2945_v18 = vadd.f32 %v2944_v17, %v2943_v16 }
 0xab4   : > { %v2946_v19 = vrot.slane %v2945_v18, 2 }
 0xab6   : > { %v2947_v20 = vadd.f32 %v2946_v19, %v2945_v18 }
 0xab8   : > { %v2948_v21 = vrot.slane %v2947_v20, 1 }
 0xaba   : > { %v2949_v22 = vadd.f32 %v2948_v21, %v2947_v20 }
 0xabc   : > { %v2950_v4 = vmul.f32 0.5, %v2949_v22 }
 0xabe   : > { %2951 = vst [vmem:[%s3799_s4 + $0x7] sm:$0x1] %v2950_v4 }
 0xabf   : > { %3664 = shalt.err (!%p3661_p4)
}
 0xac0   : > { %s3665_s24 = scalar_lea.hbm %s5784_s28, 128  ;;  %s3669_s9 = scalar_lea.hbm %s5832_s3, 256 }
 0xac1   : > { %p3666_p7 = scmp.ne.s32.totalorder %s5784_s28, %s3665_s24  ;;  %p3670_p10 = scmp.lt.u32.totalorder %s5784_s28, %s5832_s3 }
 0xac2   : > { %p3671_p11 = scmp.lt.u32.totalorder %s3669_s9, %s3665_s24  ;;  %p3673_p13 = scmp.lt.u32.totalorder %s3665_s24, %s5784_s28 }
 0xac3   : > { %p3667_p8 = pnand %p3666_p7, %p3780_p5 }
 0xac4   : > { %p3672_p12 = por %p3671_p11, %p3670_p10 }
 0xac5   : > { %p3668_p9 = pneg %p3667_p8 }
 0xac6   : > { %p3674_p0 = por %p3673_p13, %p3672_p12 }
 0xac8   : > { %p3675_p1 = pnand %p3674_p0, %p3668_p9 }
 0xaca   : > { %3678 = shalt.err (!%p3675_p1)
}
 0xacb   : > { %3162 = dma.vmem_to_hbm [thread:$0]  (%p3780_p5), %s5786_s25, 128, %s5784_s28, %s2957_s29  }
 0xacc PF: > { %p3168_p2 = scmp.ge.s32.totalorder %s3717_s15, 2  ;;  %s2982_s17 = sand.u32 1, %s3705_s12  }
 0xacd   : > { %s2983_s19 = scalar_lea.sflag [#allocation10], %s2982_s17 }
 0xace   : > { %p3165_p3 = pnand %p3168_p2, %p3784_p6 }
 0xad0   : > { %3700 = dma.done.wait (!%p3165_p3), %s2983_s19, 128  }
 0xad1   : > { %3702 = vsyncadd (!%p3165_p3), %s2983_s19, 4294967168  ;;  %p13_p4 = scmp.ge.s32.totalorder %s3767_s18, 4   ;;  %s6567_s12 = smov %s3709_s13 }
 0xad2   : > { %s6568_s13 = smov %s3713_s14  ;;  %s6569_s14 = smov %s3778_s21 }
 0xad3   : > { %s6570_s15 = smov %s3767_s18  ;;  %15 = sbr.rel (!%p13_p4) target bundleno = 3 (0x3), region = 174 }
 0xada   :  { %2988 = vsyncpa [#allocation10], 1 }
 0xadb   :  { %2990 = vsyncpa [#allocation10 + $0x1], 1 }
 0xadc   :  { %2991 = vsyncmov [#allocation4] }
 0xadf   :  { %s2992_s15 = vpop.sfrf %2991 }
 0xae0   :  { %p3159_p5 = scmp.ne.s32.totalorder %s2992_s15, 0 }
 0xae2   :  { %2996 = shalt.err (%p3159_p5)  }
 0xae3   :  { %2998 = vsyncmov [#allocation4 + $0x1] }
 0xae6   :  { %s2999_s22 = vpop.sfrf %2998 }
 0xae7   :  { %p3160_p6 = scmp.ne.s32.totalorder %s2999_s22, 0 }
 0xae9   :  { %3003 = shalt.err (%p3160_p6)  }

</bundles_post_ra>
